<compile_context>
chip_gen: v6e
topology: v6e:2x2x1
jax: 0.10.0
libtpu: 0.0.40
codegen_flags: <defaults>
</compile_context>

<pallas_src>
import functools

import numpy as np
import jax
import jax.numpy as jnp
from jax.experimental import pallas as pl
from jax.experimental.pallas import tpu as pltpu


# ----------------------------- Pallas kernel --------------------------------
def _source_kernel(phi0_ref, rad_ref, uvf_ref, noise_ref, w_ref, b_ref, o_ref,
                   *, upp, sine_amp, noise_std):
    """One tile of F frames -> (B, F, upp) merged source samples.

    phi0_ref  (B, F, D)       fractional phase at the start of each frame
    rad_ref   (B, F, D)       per-frame phase increments (fmod'd, rand_ini added)
    uvf_ref   (B, F, 1)       per-frame voiced/unvoiced flag (f32 0/1)
    noise_ref (B, F, D, upp)  Gaussian noise: harmonics on sublanes, samples on lanes
    w_ref     (D,)   SMEM     l_linear weight
    b_ref     (1,)   SMEM     l_linear bias
    o_ref     (B, F, upp)     tanh-merged source excitation (lane-dense in upp)
    """
    B, F, D = rad_ref.shape
    two_pi = 2.0 * np.pi

    # Sample index inside a frame, j = 1..upp, living on the lane axis.
    jj = (jax.lax.broadcasted_iota(jnp.int32, (1, 1, 1, upp), 3)
          .astype(jnp.float32) + 1.0)

    phi0 = phi0_ref[...][..., None]            # (B, F, D, 1)
    rad = rad_ref[...][..., None]              # (B, F, D, 1)
    phase = phi0 + jj * rad                    # (B, F, D, upp)
    phase = phase - jnp.floor(phase)           # exact under sin(2*pi*x)
    sine = jnp.sin(two_pi * phase) * sine_amp  # lane-dense EUP work

    # Nearest-neighbour upsampling of uv is just a broadcast over (D, upp).
    uv = uvf_ref[...][..., None]               # (B, F, 1, 1)
    namp = uv * noise_std + (1.0 - uv) * (sine_amp / 3.0)
    wave = sine * uv + namp * noise_ref[...]   # (B, F, D, upp)

    # Harmonic merge (Linear(D -> 1)): unrolled weighted accumulate over the D
    # sublane planes with SMEM scalar weights -- no cross-lane reduction.
    merged = wave[:, :, 0, :] * w_ref[0]
    for d in range(1, D):
        merged = merged + wave[:, :, d, :] * w_ref[d]
    o_ref[...] = jnp.tanh(merged + b_ref[0])   # (B, F, upp)


# ------------------------------- wrapper -------------------------------------
def source_module_hn_nsf_pallas(f0, upp, w_lin, b_lin, rand_ini, noise, *,
                                sampling_rate, harmonic_num,
                                sine_amp=0.1, noise_std=0.003,
                                voiced_threshold=0.0, frames_per_tile=64,
                                vmem_block_budget_bytes=24 << 20):
    """SourceModuleHnNSF.forward.

    f0       (B, L)          frame-rate F0 in Hz (0 = unvoiced)
    w_lin    (1, dim)        torch.nn.Linear(dim, 1) weight
    b_lin    (1,)            torch.nn.Linear(dim, 1) bias
    rand_ini (1, dim)        random initial phase per harmonic (rand_ini[:, 0] == 0)
    noise    (B, L*upp, dim) pre-drawn Gaussian noise
    returns  (B, L*upp, 1)   merged source excitation.
    """
    B, L = f0.shape
    dim = harmonic_num + 1
    T = L * upp
    f0 = f0.astype(jnp.float32)

    # ---- frame-rate preprocessing (tiny: B*L*dim elements) ----
    harmonics = jnp.arange(1, dim + 1, dtype=jnp.float32)
    fn = f0[..., None] * harmonics                               # (B, L, dim)
    rad = jnp.mod(fn / sampling_rate, 1.0)
    rad = rad.at[:, 0, :].add(rand_ini[0])                       # random initial phase
    uvf = (f0[..., None] > voiced_threshold).astype(jnp.float32)  # (B, L, 1)

    # Exclusive per-frame phase cumsum, scaled by the (integer) hop `upp`,
    # with frac-before-scale so f32 stays well-conditioned:
    #   phi0[f] = frac(upp * frac(sum_{t<f} rad[t]))
    cum_excl = jnp.concatenate(
        [jnp.zeros((B, 1, dim), jnp.float32),
         jnp.cumsum(rad[:, :-1, :], axis=1)], axis=1)            # (B, L, dim)
    phi0 = upp * (cum_excl - jnp.floor(cum_excl))
    phi0 = phi0 - jnp.floor(phi0)                                # in [0, 1)

    # ---- pick the tile size: keep double-buffered blocks under budget ----
    bytes_per_frame = B * (dim * upp + upp + 3 * dim + 1) * 4 * 2
    budget_frames = max(1, vmem_block_budget_bytes // bytes_per_frame)
    F = max(1, min(frames_per_tile, budget_frames, L))
    if F < L:
        F = max(8, (F // 8) * 8)          # keep the sublane (8) divisibility rule
    Lp = ((L + F - 1) // F) * F
    pad = Lp - L
    if pad:
        rad = jnp.pad(rad, ((0, 0), (0, pad), (0, 0)))
        phi0 = jnp.pad(phi0, ((0, 0), (0, pad), (0, 0)))
        uvf = jnp.pad(uvf, ((0, 0), (0, pad), (0, 0)))
        noise = jnp.pad(noise, ((0, 0), (0, pad * upp), (0, 0)))

    # Put harmonics on sublanes and samples-within-frame on lanes.
    # TODO(synk): in production generate this in-kernel with pltpu.prng_* and
    # drop this input entirely (it dominates HBM traffic).
    noise4 = (noise.astype(jnp.float32)
              .reshape(B, Lp, upp, dim)
              .transpose(0, 1, 3, 2))                            # (B, Lp, dim, upp)

    num_tiles = Lp // F

    grid_spec = pltpu.PrefetchScalarGridSpec(
        num_scalar_prefetch=0,
        grid=(num_tiles,),
        in_specs=[
            pl.BlockSpec((B, F, dim), lambda i: (0, i, 0)),          # phi0 (frame rate)
            pl.BlockSpec((B, F, dim), lambda i: (0, i, 0)),          # rad  (frame rate)
            pl.BlockSpec((B, F, 1), lambda i: (0, i, 0)),            # uv   (frame rate)
            pl.BlockSpec((B, F, dim, upp), lambda i: (0, i, 0, 0)),  # noise (sample rate)
            pl.BlockSpec(memory_space=pltpu.MemorySpace.SMEM),       # weight scalars
            pl.BlockSpec(memory_space=pltpu.MemorySpace.SMEM),       # bias scalar
        ],
        out_specs=pl.BlockSpec((B, F, upp), lambda i: (0, i, 0)),
    )

    kernel = functools.partial(_source_kernel, upp=upp,
                               sine_amp=sine_amp, noise_std=noise_std)

    out = pl.pallas_call(
        kernel,
        out_shape=jax.ShapeDtypeStruct((B, Lp, upp), jnp.float32),
        grid_spec=grid_spec,
        compiler_params=pltpu.CompilerParams(
            # No inter-tile carry any more -> tiles are independent.
            dimension_semantics=("parallel",),
            vmem_limit_bytes=48 * 1024 * 1024),
    )(phi0, rad, uvf, noise4,
      w_lin.reshape(dim).astype(jnp.float32),
      b_lin.reshape(1).astype(jnp.float32))

    return out.reshape(B, Lp * upp, 1)[:, :T, :]


# ----------------------------- pure-JAX reference ----------------------------
def source_module_ref(f0, upp, rand_ini, noise, w_lin, b_lin, *,
                      sampling_rate, harmonic_num, sine_amp=0.1,
                      noise_std=0.003, voiced_threshold=0.0):
    """Faithful f32 mirror of the PyTorch forward (which uses f64 for phase)."""
    B, L = f0.shape
    dim = harmonic_num + 1
    T = L * upp
    f0e = f0[..., None]
    fn = f0e * jnp.arange(1, dim + 1, dtype=jnp.float32)             # (B, L, dim)
    rad = jnp.mod(fn / sampling_rate, 1.0)
    rad = rad.at[:, 0, :].add(rand_ini[0])

    # tmp_over_one: frame cumsum * upp, linear-upsampled (align_corners=True)
    tmp = jnp.cumsum(rad, axis=1) * upp
    src = jnp.arange(T, dtype=jnp.float32) * ((L - 1) / (T - 1))
    i0 = jnp.clip(jnp.floor(src).astype(jnp.int32), 0, L - 2)
    frac = src - i0.astype(jnp.float32)
    too = ((1.0 - frac)[None, :, None] * tmp[:, i0, :]
           + frac[None, :, None] * tmp[:, i0 + 1, :])
    too = jnp.mod(too, 1.0)

    rad_up = jnp.repeat(rad, upp, axis=1)                            # nearest
    diff = too[:, 1:, :] - too[:, :-1, :]
    shift = jnp.concatenate(
        [jnp.zeros((B, 1, dim), jnp.float32), (diff < 0).astype(jnp.float32)],
        axis=1)
    sines = jnp.sin(jnp.cumsum(rad_up + shift, axis=1) * (2.0 * np.pi))
    sine_waves = sines * sine_amp

    uv = (f0e > voiced_threshold).astype(jnp.float32)                # (B, L, 1)
    uv = jnp.repeat(uv, upp, axis=1)                                 # (B, T, 1)
    noise_amp = uv * noise_std + (1.0 - uv) * sine_amp / 3.0
    sine_waves = sine_waves * uv + noise_amp * noise
    return jnp.tanh(sine_waves @ w_lin.T + b_lin)                    # (B, T, 1)


if __name__ == "__main__":
    key = jax.random.PRNGKey(0)
    B, L = 2, 32            # batch, number of F0 frames
    upp = 16                # upsample (hop) factor: samples per frame
    sampling_rate = 44100
    harmonic_num = 7        # -> dim = 8 (fundamental + 7 overtones)
    dim = harmonic_num + 1
    T = L * upp

    k_f0, k_uv, k_ri, k_n, k_w, k_b = jax.random.split(key, 6)
    f0 = jax.random.uniform(k_f0, (B, L), jnp.float32, minval=80.0, maxval=320.0)
    f0 = f0 * (jax.random.uniform(k_uv, (B, L)) > 0.25)     # some unvoiced frames
    rand_ini = jax.random.uniform(k_ri, (1, dim), jnp.float32)
    rand_ini = rand_ini.at[:, 0].set(0.0)                   # fundamental phase = 0
    noise = jax.random.normal(k_n, (B, T, dim), jnp.float32)
    w_lin = 0.3 * jax.random.normal(k_w, (1, dim), jnp.float32)   # Linear(dim, 1)
    b_lin = 0.1 * jax.random.normal(k_b, (1,), jnp.float32)

    out = source_module_hn_nsf_pallas(
        f0, upp, w_lin, b_lin, rand_ini, noise,
        sampling_rate=sampling_rate, harmonic_num=harmonic_num,
        frames_per_tile=8)                                   # 4 grid tiles at L=32
    jax.block_until_ready(out)
    assert out.shape == (B, T, 1)

    ref = source_module_ref(f0, upp, rand_ini, noise, w_lin, b_lin,
                            sampling_rate=sampling_rate,
                            harmonic_num=harmonic_num)
    err = float(jnp.max(jnp.abs(out - ref)))
    assert err < 5e-3, err   # f32 vs PyTorch's f64 phase path; see TODO above
    print("KERNEL_OK")
</pallas_src>

<mosaic_0001>
module attributes {stable_mosaic.version = 11 : i64} {
  func.func @_source_kernel(%arg0: i32, %arg1: memref<2x8x8xf32, #tpu.memory_space<vmem>>, %arg2: memref<2x8x8xf32, #tpu.memory_space<vmem>>, %arg3: memref<2x8x1xf32, #tpu.memory_space<vmem>>, %arg4: memref<2x8x8x16xf32, #tpu.memory_space<vmem>>, %arg5: memref<8xf32, #tpu.memory_space<smem>>, %arg6: memref<1xf32, #tpu.memory_space<smem>>, %arg7: memref<2x8x16xf32, #tpu.memory_space<vmem>>) attributes {dimension_semantics = [#tpu.dimension_semantics<parallel>], iteration_bounds = array<i64: 4>, scalar_prefetch = 0 : i64, scratch_operands = 0 : i64, tpu.core_type = #tpu.core_type<tc>, window_params = [{transform_indices = @transform_0, window_bounds = array<i64: 2, 8, 8>}, {transform_indices = @transform_1, window_bounds = array<i64: 2, 8, 8>}, {transform_indices = @transform_2, window_bounds = array<i64: 2, 8, 1>}, {transform_indices = @transform_3, window_bounds = array<i64: 2, 8, 8, 16>}, {transform_indices = @transform_4, window_bounds = array<i64: 8>}, {transform_indices = @transform_5, window_bounds = array<i64: 1>}, {transform_indices = @transform_6, window_bounds = array<i64: 2, 8, 16>}]} {
    %0 = tpu.iota {dimensions = array<i32: 3>} : vector<1x1x1x16xi32>
    %1 = arith.sitofp %0 : vector<1x1x1x16xi32> to vector<1x1x1x16xf32>
    %cst = arith.constant 1.000000e+00 : f32
    %2 = vector.broadcast %cst : f32 to vector<1x1x1x16xf32>
    %3 = arith.addf %1, %2 : vector<1x1x1x16xf32>
    %c0 = arith.constant 0 : index
    %c0_0 = arith.constant 0 : index
    %c0_1 = arith.constant 0 : index
    %4 = vector.load %arg1[%c0, %c0_0, %c0_1] : memref<2x8x8xf32, #tpu.memory_space<vmem>>, vector<2x8x8xf32>
    %5 = vector.shape_cast %4 : vector<2x8x8xf32> to vector<2x8x8x1xf32>
    %c0_2 = arith.constant 0 : index
    %c0_3 = arith.constant 0 : index
    %c0_4 = arith.constant 0 : index
    %6 = vector.load %arg2[%c0_2, %c0_3, %c0_4] : memref<2x8x8xf32, #tpu.memory_space<vmem>>, vector<2x8x8xf32>
    %7 = vector.shape_cast %6 : vector<2x8x8xf32> to vector<2x8x8x1xf32>
    %8 = vector.broadcast %3 : vector<1x1x1x16xf32> to vector<2x8x8x16xf32>
    %9 = vector.broadcast %7 : vector<2x8x8x1xf32> to vector<2x8x8x16xf32>
    %10 = arith.mulf %8, %9 : vector<2x8x8x16xf32>
    %11 = vector.broadcast %5 : vector<2x8x8x1xf32> to vector<2x8x8x16xf32>
    %12 = arith.addf %11, %10 : vector<2x8x8x16xf32>
    %13 = math.floor %12 : vector<2x8x8x16xf32>
    %14 = arith.subf %12, %13 : vector<2x8x8x16xf32>
    %cst_5 = arith.constant 6.28318548 : f32
    %15 = vector.broadcast %cst_5 : f32 to vector<2x8x8x16xf32>
    %16 = arith.mulf %15, %14 : vector<2x8x8x16xf32>
    %17 = math.sin %16 : vector<2x8x8x16xf32>
    %cst_6 = arith.constant 1.000000e-01 : f32
    %18 = vector.broadcast %cst_6 : f32 to vector<2x8x8x16xf32>
    %19 = arith.mulf %17, %18 : vector<2x8x8x16xf32>
    %c0_7 = arith.constant 0 : index
    %c0_8 = arith.constant 0 : index
    %c0_9 = arith.constant 0 : index
    %20 = vector.load %arg3[%c0_7, %c0_8, %c0_9] : memref<2x8x1xf32, #tpu.memory_space<vmem>>, vector<2x8x1xf32>
    %21 = vector.shape_cast %20 : vector<2x8x1xf32> to vector<2x8x1x1xf32>
    %cst_10 = arith.constant 3.000000e-03 : f32
    %22 = vector.broadcast %cst_10 : f32 to vector<2x8x1x1xf32>
    %23 = arith.mulf %21, %22 : vector<2x8x1x1xf32>
    %cst_11 = arith.constant 1.000000e+00 : f32
    %24 = vector.broadcast %cst_11 : f32 to vector<2x8x1x1xf32>
    %25 = arith.subf %24, %21 : vector<2x8x1x1xf32>
    %cst_12 = arith.constant 0.0333333351 : f32
    %26 = vector.broadcast %cst_12 : f32 to vector<2x8x1x1xf32>
    %27 = arith.mulf %25, %26 : vector<2x8x1x1xf32>
    %28 = arith.addf %23, %27 : vector<2x8x1x1xf32>
    %29 = vector.broadcast %21 : vector<2x8x1x1xf32> to vector<2x8x8x16xf32>
    %30 = arith.mulf %19, %29 : vector<2x8x8x16xf32>
    %c0_13 = arith.constant 0 : index
    %c0_14 = arith.constant 0 : index
    %c0_15 = arith.constant 0 : index
    %c0_16 = arith.constant 0 : index
    %31 = vector.load %arg4[%c0_13, %c0_14, %c0_15, %c0_16] : memref<2x8x8x16xf32, #tpu.memory_space<vmem>>, vector<2x8x8x16xf32>
    %32 = vector.broadcast %28 : vector<2x8x1x1xf32> to vector<2x8x8x16xf32>
    %33 = arith.mulf %32, %31 : vector<2x8x8x16xf32>
    %34 = arith.addf %30, %33 : vector<2x8x8x16xf32>
    %35 = vector.extract_strided_slice %34 {offsets = [0, 0, 0, 0], sizes = [2, 8, 1, 16], strides = [1, 1, 1, 1]} : vector<2x8x8x16xf32> to vector<2x8x1x16xf32>
    %36 = vector.shape_cast %35 : vector<2x8x1x16xf32> to vector<2x8x16xf32>
    %c0_17 = arith.constant 0 : index
    %37 = memref.load %arg5[%c0_17] : memref<8xf32, #tpu.memory_space<smem>>
    %38 = vector.broadcast %37 : f32 to vector<2x8x16xf32>
    %39 = arith.mulf %36, %38 : vector<2x8x16xf32>
    %40 = vector.extract_strided_slice %34 {offsets = [0, 0, 1, 0], sizes = [2, 8, 1, 16], strides = [1, 1, 1, 1]} : vector<2x8x8x16xf32> to vector<2x8x1x16xf32>
    %41 = vector.shape_cast %40 : vector<2x8x1x16xf32> to vector<2x8x16xf32>
    %c1 = arith.constant 1 : index
    %42 = memref.load %arg5[%c1] : memref<8xf32, #tpu.memory_space<smem>>
    %43 = vector.broadcast %42 : f32 to vector<2x8x16xf32>
    %44 = arith.mulf %41, %43 : vector<2x8x16xf32>
    %45 = arith.addf %39, %44 : vector<2x8x16xf32>
    %46 = vector.extract_strided_slice %34 {offsets = [0, 0, 2, 0], sizes = [2, 8, 1, 16], strides = [1, 1, 1, 1]} : vector<2x8x8x16xf32> to vector<2x8x1x16xf32>
    %47 = vector.shape_cast %46 : vector<2x8x1x16xf32> to vector<2x8x16xf32>
    %c2 = arith.constant 2 : index
    %48 = memref.load %arg5[%c2] : memref<8xf32, #tpu.memory_space<smem>>
    %49 = vector.broadcast %48 : f32 to vector<2x8x16xf32>
    %50 = arith.mulf %47, %49 : vector<2x8x16xf32>
    %51 = arith.addf %45, %50 : vector<2x8x16xf32>
    %52 = vector.extract_strided_slice %34 {offsets = [0, 0, 3, 0], sizes = [2, 8, 1, 16], strides = [1, 1, 1, 1]} : vector<2x8x8x16xf32> to vector<2x8x1x16xf32>
    %53 = vector.shape_cast %52 : vector<2x8x1x16xf32> to vector<2x8x16xf32>
    %c3 = arith.constant 3 : index
    %54 = memref.load %arg5[%c3] : memref<8xf32, #tpu.memory_space<smem>>
    %55 = vector.broadcast %54 : f32 to vector<2x8x16xf32>
    %56 = arith.mulf %53, %55 : vector<2x8x16xf32>
    %57 = arith.addf %51, %56 : vector<2x8x16xf32>
    %58 = vector.extract_strided_slice %34 {offsets = [0, 0, 4, 0], sizes = [2, 8, 1, 16], strides = [1, 1, 1, 1]} : vector<2x8x8x16xf32> to vector<2x8x1x16xf32>
    %59 = vector.shape_cast %58 : vector<2x8x1x16xf32> to vector<2x8x16xf32>
    %c4 = arith.constant 4 : index
    %60 = memref.load %arg5[%c4] : memref<8xf32, #tpu.memory_space<smem>>
    %61 = vector.broadcast %60 : f32 to vector<2x8x16xf32>
    %62 = arith.mulf %59, %61 : vector<2x8x16xf32>
    %63 = arith.addf %57, %62 : vector<2x8x16xf32>
    %64 = vector.extract_strided_slice %34 {offsets = [0, 0, 5, 0], sizes = [2, 8, 1, 16], strides = [1, 1, 1, 1]} : vector<2x8x8x16xf32> to vector<2x8x1x16xf32>
    %65 = vector.shape_cast %64 : vector<2x8x1x16xf32> to vector<2x8x16xf32>
    %c5 = arith.constant 5 : index
    %66 = memref.load %arg5[%c5] : memref<8xf32, #tpu.memory_space<smem>>
    %67 = vector.broadcast %66 : f32 to vector<2x8x16xf32>
    %68 = arith.mulf %65, %67 : vector<2x8x16xf32>
    %69 = arith.addf %63, %68 : vector<2x8x16xf32>
    %70 = vector.extract_strided_slice %34 {offsets = [0, 0, 6, 0], sizes = [2, 8, 1, 16], strides = [1, 1, 1, 1]} : vector<2x8x8x16xf32> to vector<2x8x1x16xf32>
    %71 = vector.shape_cast %70 : vector<2x8x1x16xf32> to vector<2x8x16xf32>
    %c6 = arith.constant 6 : index
    %72 = memref.load %arg5[%c6] : memref<8xf32, #tpu.memory_space<smem>>
    %73 = vector.broadcast %72 : f32 to vector<2x8x16xf32>
    %74 = arith.mulf %71, %73 : vector<2x8x16xf32>
    %75 = arith.addf %69, %74 : vector<2x8x16xf32>
    %76 = vector.extract_strided_slice %34 {offsets = [0, 0, 7, 0], sizes = [2, 8, 1, 16], strides = [1, 1, 1, 1]} : vector<2x8x8x16xf32> to vector<2x8x1x16xf32>
    %77 = vector.shape_cast %76 : vector<2x8x1x16xf32> to vector<2x8x16xf32>
    %c7 = arith.constant 7 : index
    %78 = memref.load %arg5[%c7] : memref<8xf32, #tpu.memory_space<smem>>
    %79 = vector.broadcast %78 : f32 to vector<2x8x16xf32>
    %80 = arith.mulf %77, %79 : vector<2x8x16xf32>
    %81 = arith.addf %75, %80 : vector<2x8x16xf32>
    %c0_18 = arith.constant 0 : index
    %82 = memref.load %arg6[%c0_18] : memref<1xf32, #tpu.memory_space<smem>>
    %83 = vector.broadcast %82 : f32 to vector<2x8x16xf32>
    %84 = arith.addf %81, %83 : vector<2x8x16xf32>
    %85 = math.tanh %84 : vector<2x8x16xf32>
    %c0_19 = arith.constant 0 : index
    %c0_20 = arith.constant 0 : index
    %c0_21 = arith.constant 0 : index
    %86 = vector.load %arg7[%c0_19, %c0_20, %c0_21] : memref<2x8x16xf32, #tpu.memory_space<vmem>>, vector<2x8x16xf32>
    tpu.vector_store %arg7[%c0_19, %c0_20, %c0_21], %85 {strides = array<i32>} : memref<2x8x16xf32, #tpu.memory_space<vmem>>, vector<2x8x16xf32>,
    return
  }
  func.func @transform_0(%arg0: i32) -> (i32, i32, i32) {
    %c0_i32 = arith.constant 0 : i32
    %c0_i32_0 = arith.constant 0 : i32
    %c0_i32_1 = arith.constant 0 : i32
    return %c0_i32, %arg0, %c0_i32_0 : i32, i32, i32
  }
  func.func @transform_1(%arg0: i32) -> (i32, i32, i32) {
    %c0_i32 = arith.constant 0 : i32
    %c0_i32_0 = arith.constant 0 : i32
    %c0_i32_1 = arith.constant 0 : i32
    return %c0_i32, %arg0, %c0_i32_0 : i32, i32, i32
  }
  func.func @transform_2(%arg0: i32) -> (i32, i32, i32) {
    %c0_i32 = arith.constant 0 : i32
    %c0_i32_0 = arith.constant 0 : i32
    %c0_i32_1 = arith.constant 0 : i32
    return %c0_i32, %arg0, %c0_i32_0 : i32, i32, i32
  }
  func.func @transform_3(%arg0: i32) -> (i32, i32, i32, i32) {
    %c0_i32 = arith.constant 0 : i32
    %c0_i32_0 = arith.constant 0 : i32
    %c0_i32_1 = arith.constant 0 : i32
    %c0_i32_2 = arith.constant 0 : i32
    return %c0_i32, %arg0, %c0_i32_0, %c0_i32_1 : i32, i32, i32, i32
  }
  func.func @transform_4(%arg0: i32) -> i32 {
    %c0_i32 = arith.constant 0 : i32
    %c0_i32_0 = arith.constant 0 : i32
    return %c0_i32 : i32
  }
  func.func @transform_5(%arg0: i32) -> i32 {
    %c0_i32 = arith.constant 0 : i32
    %c0_i32_0 = arith.constant 0 : i32
    return %c0_i32 : i32
  }
  func.func @transform_6(%arg0: i32) -> (i32, i32, i32) {
    %c0_i32 = arith.constant 0 : i32
    %c0_i32_0 = arith.constant 0 : i32
    %c0_i32_1 = arith.constant 0 : i32
    return %c0_i32, %arg0, %c0_i32_0 : i32, i32, i32
  }
}

</mosaic_0001>

<bundles_post_ra>
// kernel: tpu_custom_call.1
= control target key start
LH: loop header
LB: loop body
LE: loop exit
PB: predicated region body
PF: predicated region fallthrough
CT: control target
= control target key end

     0   :  { %s7376_s0 = inlined_call_operand.vmem [shape: f32[2,32,8], index: 0, kind: input, shape index: {}]   ;;  %s7377_s1 = inlined_call_operand.vmem [shape: f32[2,32,8], index: 1, kind: input, shape index: {}]   ;;  %s7378_s2 = inlined_call_operand.vmem [shape: f32[2,32,1], index: 2, kind: input, shape index: {}]   ;;  %s7379_s3 = inlined_call_operand.vmem [shape: f32[2,32,8,16], index: 3, kind: input, shape index: {}]   ;;  %s7380_s4 = inlined_call_operand.vmem [shape: f32[8], index: 4, kind: input, shape index: {}]   ;;  %s7381_s5 = inlined_call_operand.<no memory space> [shape: f32[1], index: 5, kind: input, shape index: {}]   ;;  %s7382_s6 = inlined_call_operand.vmem [shape: f32[2,32,16], index: 6, kind: output, shape index: {}]  }
   0x1   :  { %11 = sst [smem:[#allocation2]] %s7381_s5 }
   0x2   :  { %12 = vsyncpa [#allocation8], 0  ;;  %s4289_s23 = smov 0   ;;  %s4291_s24 = smov 0  }
   0x3   :  { %s4293_s25 = smov 0  }
   0x4 LB: > { %s4305_s5 = sadd.s32 4294967295, %s4240_s25   ;;  %s4308_s26 = sadd.s32 1, %s4240_s25   ;;  %s4240_s25 = sphi %s4293_s25, %s7840_s25   ;;  %s4236_s24 = sphi %s4291_s24, %s7839_s24   ;;  %s4232_s23 = sphi %s4289_s23, %s7838_s23  }
   0x5   : > { %s22_s27 = ssub.s32 %s4240_s25, %s4308_s26  ;;  %s25_s28 = sadd.s32 1, %s4236_s24 }
   0x6   : > { %p23_p0 = scmp.eq.s32.totalorder %s22_s27, 0  ;;  %p32_p1 = scmp.ne.s32.totalorder %s4236_s24, %s4232_s23 }
   0x7   : > { %p33_p2 = scmp.eq.s32.totalorder %s4240_s25, 0  ;;  %p182_p3 = scmp.eq.s32.totalorder %s4305_s5, 3 }
   0x8   : > { %s4318_s29 = scalar_select %p23_p0, %s4236_s24, %s25_s28  }
   0x9   : > { %p4320_p4 = por %p33_p2, %p32_p1  ;;  %p4324_p5 = por %p182_p3, %p32_p1 }
   0xa   : > { %p3897_p6 = scmp.ge.s32.totalorder %s4240_s25, 1  ;;  %p195_p7 = scmp.lt.s32.totalorder %s4240_s25, 5 }
   0xb   : > { %s7545_s7 = scalar_select %p4324_p5, 1, 0 }
   0xc   : > { %p4064_p8 = scmp.eq.s32.totalorder %s4305_s5, 0  ;;  %p4331_p9 = pnand %p3897_p6, %p195_p7 }
   0xd   : > { %s208_s11 = sshll.u32 %s7380_s4, 4  ;;  %s209_s11 = int_to_ptr.vmem [resolvable:$true] %s208_s11 }
   0xe   : > { %p4060_p10 = pneg %p4331_p9  ;;  %s4199_s12 = scalar_lea.vmem %s209_s11, 16 }
   0xf   : > { %p4200_p12 = scmp.ne.s32.totalorder %s209_s11, %s4199_s12  ;;  %p4207_p2 = scmp.lt.s32.totalorder %s209_s11, %s209_s11 }
  0x10   : > { %p4061_p11 = pnand %p4064_p8, %p4060_p10  ;;  %p4208_p3 = scmp.lt.s32.totalorder %s4199_s12, %s4199_s12 }
  0x12   : > { %p4201_p13 = pneg %p4061_p11  ;;  %p4209_p6 = por %p4208_p3, %p4207_p2 }
  0x14   : > { %p4202_p0 = pnand %p4201_p13, %p4200_p12 }
  0x16   : > { %p4203_p1 = pneg %p4202_p0 }
  0x18   : > { %p4210_p7 = pnand %p4209_p6, %p4203_p1 }
  0x1a   : > { %4213 = shalt.err (!%p4210_p7)
}
  0x1b   : > { %s4242_s13 = smov [#allocation7]   ;;  %p3899_p5 = scmp.ge.s32.totalorder %s4240_s25, 4 }
  0x1c   : > { %4063 = dma.vmem_to_smem (!%p4061_p11), %s209_s11, 16, %s4242_s13, [#allocation8]  }
  0x1d   : > { %218 = sbr.rel (%p3899_p5) target bundleno = 64 (0x40), region = 24 }
  0x22   : > { %221 = sbr.rel (!%p4320_p4) target bundleno = 40 (0x28), region = 28  ;;  %s223_s14 = sand.u32 (%p4320_p4), 1, %s4236_s24  }
  0x23   : > { %s3901_s15 = sshll.u32 (%p4320_p4), %s4240_s25, 3  ;;  %s3900_s16 = sshll.u32 (%p4320_p4), %s223_s14, 4 }
  0x24   : > { %s227_s19 = scalar_lea.vmem (%p4320_p4), %s7376_s0, %s3901_s15  ;;  %s225_s20 = scalar_lea.vmem (%p4320_p4), [#allocation3], %s3900_s16 }
  0x25   : > { %v258_v0 = vld [vmem:[%s227_s19] sm:$0xff] (%p4320_p4) }
  0x26   : > { %v260_v1 = vld [vmem:[%s227_s19 + $0x20] sm:$0xff] (%p4320_p4)  ;;  %259 = vst [vmem:[%s225_s20] sm:$0xff] (%p4320_p4), %v258_v0 }
  0x27   : > { %261 = vst [vmem:[%s225_s20 + $0x8] sm:$0xff] %v260_v1 }
  0x28 PF: > { %267 = sbr.rel (!%p4320_p4) target bundleno = 46 (0x2e), region = 66  ;;  %s269_s21 = sand.u32 (%p4320_p4), 1, %s4236_s24  }
  0x29   : > { %s3903_s22 = sshll.u32 (%p4320_p4), %s4240_s25, 3  ;;  %s3902_s27 = sshll.u32 (%p4320_p4), %s269_s21, 4 }
  0x2a   : > { %s273_s10 = scalar_lea.vmem (%p4320_p4), %s7377_s1, %s3903_s22  ;;  %s271_s11 = scalar_lea.vmem (%p4320_p4), [#allocation4], %s3902_s27 }
  0x2b   : > { %v304_v2 = vld [vmem:[%s273_s10] sm:$0xff] (%p4320_p4) }
  0x2c   : > { %v306_v3 = vld [vmem:[%s273_s10 + $0x20] sm:$0xff] (%p4320_p4)  ;;  %305 = vst [vmem:[%s271_s11] sm:$0xff] (%p4320_p4), %v304_v2 }
  0x2d   : > { %307 = vst [vmem:[%s271_s11 + $0x8] sm:$0xff] %v306_v3 }
  0x2e PF: > { %313 = sbr.rel (!%p4320_p4) target bundleno = 52 (0x34), region = 104  ;;  %s315_s12 = sand.u32 (%p4320_p4), 1, %s4236_s24  }
  0x2f   : > { %s3905_s13 = sshll.u32 (%p4320_p4), %s4240_s25, 3  ;;  %s3904_s14 = sshll.u32 (%p4320_p4), %s315_s12, 4 }
  0x30   : > { %s319_s17 = scalar_lea.vmem (%p4320_p4), %s7378_s2, %s3905_s13  ;;  %s317_s18 = scalar_lea.vmem (%p4320_p4), [#allocation5], %s3904_s14 }
  0x31   : > { %v350_v4 = vld [vmem:[%s319_s17] sm:$0xff] (%p4320_p4) }
  0x32   : > { %v352_v5 = vld [vmem:[%s319_s17 + $0x20] sm:$0xff] (%p4320_p4)  ;;  %351 = vst [vmem:[%s317_s18] sm:$0xff] (%p4320_p4), %v350_v4 }
  0x33   : > { %353 = vst [vmem:[%s317_s18 + $0x8] sm:$0xff] %v352_v5 }
  0x34 PF: > { %359 = sbr.rel (!%p4320_p4) target bundleno = 64 (0x40), region = 142  ;;  %s361_s19 = sand.u32 (%p4320_p4), 1, %s4236_s24  }
  0x35   : > { %s3991_s20 = sshll.u32 (%p4320_p4), %s4240_s25, 6  ;;  %s3906_s21 = sshll.u32 (%p4320_p4), %s361_s19, 7 }
  0x36   : > { %s4371_s28 = scalar_lea.vmem (%p4320_p4), %s7379_s3, %s3991_s20  ;;  %s363_s30 = scalar_lea.vmem (%p4320_p4), [#allocation6], %s3906_s21 }
  0x37   : > { %v425_v6 = vld [vmem:[%s4371_s28] sm:$0xff] (%p4320_p4)  ;;  %v427_v7 = vld [vmem:[%s4371_s28 + $0x8] sm:$0xff] (%p4320_p4)  ;;  %v429_v8 = vld [vmem:[%s4371_s28 + $0x10] sm:$0xff] (%p4320_p4) }
  0x38   : > { %426 = vst [vmem:[%s363_s30] sm:$0xff] (%p4320_p4), %v425_v6  ;;  %428 = vst [vmem:[%s363_s30 + $0x8] sm:$0xff] (%p4320_p4), %v427_v7  ;;  %v431_v9 = vld [vmem:[%s4371_s28 + $0x18] sm:$0xff] (%p4320_p4)  ;;  %v433_v10 = vld [vmem:[%s4371_s28 + $0x20] sm:$0xff] (%p4320_p4) }
  0x39   : > { %430 = vst [vmem:[%s363_s30 + $0x10] sm:$0xff] %v429_v8  ;;  %v435_v11 = vld [vmem:[%s4371_s28 + $0x28] sm:$0xff]  ;;  %432 = vst [vmem:[%s363_s30 + $0x18] sm:$0xff] %v431_v9  ;;  %v437_v12 = vld [vmem:[%s4371_s28 + $0x30] sm:$0xff] }
  0x3a   : > { %434 = vst [vmem:[%s363_s30 + $0x20] sm:$0xff] %v433_v10  ;;  %436 = vst [vmem:[%s363_s30 + $0x28] sm:$0xff] %v435_v11  ;;  %v439_v13 = vld [vmem:[%s4371_s28 + $0x38] sm:$0xff]  ;;  %v441_v14 = vld [vmem:[%s4371_s28 + $0x100] sm:$0xff] }
  0x3b   : > { %438 = vst [vmem:[%s363_s30 + $0x30] sm:$0xff] %v437_v12  ;;  %440 = vst [vmem:[%s363_s30 + $0x38] sm:$0xff] %v439_v13  ;;  %v443_v15 = vld [vmem:[%s4371_s28 + $0x108] sm:$0xff]  ;;  %v445_v16 = vld [vmem:[%s4371_s28 + $0x110] sm:$0xff] }
  0x3c   : > { %442 = vst [vmem:[%s363_s30 + $0x40] sm:$0xff] %v441_v14  ;;  %v447_v17 = vld [vmem:[%s4371_s28 + $0x118] sm:$0xff]  ;;  %444 = vst [vmem:[%s363_s30 + $0x48] sm:$0xff] %v443_v15  ;;  %v449_v18 = vld [vmem:[%s4371_s28 + $0x120] sm:$0xff] }
  0x3d   : > { %446 = vst [vmem:[%s363_s30 + $0x50] sm:$0xff] %v445_v16  ;;  %448 = vst [vmem:[%s363_s30 + $0x58] sm:$0xff] %v447_v17  ;;  %v451_v19 = vld [vmem:[%s4371_s28 + $0x128] sm:$0xff]  ;;  %v453_v20 = vld [vmem:[%s4371_s28 + $0x130] sm:$0xff] }
  0x3e   : > { %450 = vst [vmem:[%s363_s30 + $0x60] sm:$0xff] %v449_v18  ;;  %452 = vst [vmem:[%s363_s30 + $0x68] sm:$0xff] %v451_v19  ;;  %v455_v21 = vld [vmem:[%s4371_s28 + $0x138] sm:$0xff] }
  0x3f   : > { %454 = vst [vmem:[%s363_s30 + $0x70] sm:$0xff] %v453_v20  ;;  %456 = vst [vmem:[%s363_s30 + $0x78] sm:$0xff] %v455_v21 }
  0x40 PF: > { %465 = sbr.rel (%p4331_p9) target bundleno = 788 (0x314), region = 180 }
  0x45   : > { %s468_s25 = sand.u32 1, %s4232_s23  }
  0x46   : > { %s4392_s9 = sshll.u32 %s468_s25, 4  ;;  %s3913_s10 = sshll.u32 %s468_s25, 7 }
  0x47   : > { %s470_s11 = scalar_lea.vmem [#allocation3], %s4392_s9  ;;  %s477_s12 = scalar_lea.vmem [#allocation4], %s4392_s9 }
  0x48   : > { %s484_s13 = scalar_lea.vmem [#allocation5], %s4392_s9  ;;  %s4397_s14 = scalar_lea.vmem [#allocation6], %s3913_s10 }
  0x49   : > { %4227 = dma.done.wait (%p4064_p8), [#allocation8], 16  }
  0x4a   : > { %4229 = vsyncadd (%p4064_p8), [#allocation8], 4294967280 }
  0x4b   : > { %499 = sfence }
  0x4c   : > { %v535_v22 = vlaneseq  ;;  %v4243_v23 = vmov 0   ;;  %v4406_v25 = vld [vmem:[%s477_s12] sm:$0xff]  ;;  %v4410_v28 = vld [vmem:[%s477_s12 + $0x8] sm:$0xff]  ;;  %v4244_v58 = vmov 1966171168   ;;  %s5801_s23 = sld [smem:[#allocation7 + $0x1]] }
  0x4d   : > { %4100 = vset.pattern.permute.xlu1 %v4243_v23  ;;  %4099 = vset.pattern.permute.xlu0 %v4243_v23  ;;  %v4416_v33 = vld [vmem:[%s470_s11 + $0x8] sm:$0xff]  ;;  %v4418_v34 = vld [vmem:[%s470_s11] sm:$0xff]  ;;  %v2533_v59 = vunpack.c.l.s4 %v4244_v58  ;;  %s5847_s8 = sld [smem:[#allocation7]]  ;;  %s7342_s22 = scalar_lea.vmem [#allocation9], %s4392_s9 }
  0x4e   : > { %v4404_v24 = vshrl.u32 %v535_v22, 7  ;;  %v2527_v3 = vld [vmem:[%s484_s13] sm:$0xff]  ;;  %v2528_v4 = vld [vmem:[%s484_s13 + $0x8] sm:$0xff]  ;;  %s5857_s15 = sld [smem:[#allocation7 + $0x2]]  ;;  %p7837_p4 = scmp.ne.s32.totalorder %s7545_s7, 0 }
  0x4f   : > { %v2534_v62 = vunpack.c.0.s8 %v2533_v59  ;;  %v2531_v13 = vcombine.high %v2527_v3, %v2527_v3  ;;  %s5866_s16 = sld [smem:[#allocation7 + $0x3]]  ;;  %s3988_s27 = sshll.u32 (%p7837_p4), %s4305_s5, 3 }
  0x50   : > { %v557_v26 = vsub.s32 2, %v4404_v24  ;;  %v550_v27 = vsub.s32 1, %v4404_v24  ;;  %v4421_v35 = vsub.s32 0, %v4404_v24  ;;  %v564_v38 = vsub.s32 3, %v4404_v24  ;;  %s5874_s17 = sld [smem:[#allocation7 + $0x4]]  ;;  %s3735_s25 = scalar_lea.vmem (%p7837_p4), %s7382_s6, %s3988_s27 }
  0x51   : > { %v571_v45 = vsub.s32 4, %v4404_v24  ;;  %v578_v52 = vsub.s32 5, %v4404_v24  ;;  %v585_v57 = vsub.s32 6, %v4404_v24  ;;  %v592_v63 = vsub.s32 7, %v4404_v24  ;;  %s5912_s18 = sld [smem:[#allocation7 + $0x5]] }
  0x52   : > { %v672_v29 = vrot.slane %v4406_v25, %v557_v26  ;;  %v665_v30 = vrot.slane %v4406_v25, %v550_v27  ;;  %v728_v31 = vrot.slane %v4410_v28, %v557_v26  ;;  %v721_v32 = vrot.slane %v4410_v28, %v550_v27  ;;  %s5975_s19 = sld [smem:[#allocation7 + $0x6]] }
  0x53   : > { %v607_v36 = vrot.slane %v4416_v33, %v550_v27  ;;  %v551_v37 = vrot.slane %v4418_v34, %v550_v27  ;;  %v679_v39 = vrot.slane %v4406_v25, %v564_v38  ;;  %v658_v40 = vrot.slane %v4406_v25, %v4421_v35  ;;  %s5977_s20 = sld [smem:[#allocation7 + $0x7]] }
  0x54   : > { %674 = vbcast.lane.b32.xlu1 %v672_v29, 256  ;;  %667 = vbcast.lane.b32.xlu0 %v665_v30, 256  ;;  %v735_v41 = vrot.slane %v4410_v28, %v564_v38  ;;  %v714_v42 = vrot.slane %v4410_v28, %v4421_v35  ;;  %v614_v43 = vrot.slane %v4416_v33, %v557_v26  ;;  %s6062_s21 = sld [smem:[#allocation2]] }
  0x55   : > { %v558_v44 = vrot.slane %v4418_v34, %v557_v26  ;;  %v742_v46 = vrot.slane %v4410_v28, %v571_v45  ;;  %v686_v47 = vrot.slane %v4406_v25, %v571_v45  ;;  %v565_v48 = vrot.slane %v4418_v34, %v564_v38 }
  0x56   : > { %v544_v49 = vrot.slane %v4418_v34, %v4421_v35  ;;  %v621_v50 = vrot.slane %v4416_v33, %v564_v38  ;;  %v600_v51 = vrot.slane %v4416_v33, %v4421_v35  ;;  %v749_v53 = vrot.slane %v4410_v28, %v578_v52 }
  0x57   : > { %v693_v54 = vrot.slane %v4406_v25, %v578_v52  ;;  %v628_v55 = vrot.slane %v4416_v33, %v571_v45  ;;  %v572_v56 = vrot.slane %v4418_v34, %v571_v45  ;;  %v756_v60 = vrot.slane %v4410_v28, %v585_v57 }
  0x58   : > { %730 = vbcast.lane.b32.xlu1 %v728_v31, 256  ;;  %723 = vbcast.lane.b32.xlu0 %v721_v32, 256  ;;  %v700_v61 = vrot.slane %v4406_v25, %v585_v57  ;;  %v635_v0 = vrot.slane %v4416_v33, %v578_v52  ;;  %v579_v1 = vrot.slane %v4418_v34, %v578_v52 }
  0x59   : > { %v4455_v2 = vsub.s32 %v2534_v62, %v4404_v24  ;;  %v763_v5 = vrot.slane %v4410_v28, %v592_v63  ;;  %v707_v6 = vrot.slane %v4406_v25, %v592_v63  ;;  %v642_v9 = vrot.slane %v4416_v33, %v585_v57 }
  0x5a   : > { %v586_v10 = vrot.slane %v4418_v34, %v585_v57  ;;  %v649_v14 = vrot.slane %v4416_v33, %v592_v63  ;;  %v593_v16 = vrot.slane %v4418_v34, %v592_v63  ;;  %v2580_v45 = vcombine.high %v2528_v4, %v2528_v4 }
  0x5b   : > { %v2538_v7 = vrot.slane %v2527_v3, %v4455_v2  ;;  %v2587_v8 = vrot.slane %v2528_v4, %v4455_v2  ;;  %v4473_v19 = vrot.slane %v2531_v13, %v4455_v2 }
  0x5c   : > { %609 = vbcast.lane.b32.xlu1 %v607_v36, 256  ;;  %553 = vbcast.lane.b32.xlu0 %v551_v37, 256  ;;  %v2594_v52 = vrot.slane %v2580_v45, %v4455_v2 }
  0x5d   : > { %v2546_v11 = vcombine.high %v2538_v7, %v2538_v7  ;;  %v2595_v12 = vcombine.high %v2587_v8, %v2587_v8  ;;  %v2554_v15 = vrot.slane %v2538_v7, %v4455_v2  ;;  %v4477_v23 = vrot.slane %v2587_v8, %v4455_v2 }
  0x5e   : > { %v4482_v28 = vrot.slane %v4473_v19, %v4455_v2  ;;  %v2547_v7 = vcombine.high %v4473_v19, %v4473_v19  ;;  %v2596_v8 = vcombine.high %v2594_v52, %v2594_v52 }
  0x5f   : > { %v2568_v17 = vrot.slane %v2546_v11, %v4455_v2  ;;  %v2617_v18 = vrot.slane %v2595_v12, %v4455_v2  ;;  %v2712_v20 = vrot.slane %v2554_v15, %v4421_v35  ;;  %v2576_v21 = vcombine.high %v2554_v15, %v2554_v15 }
  0x60   : > { %681 = vbcast.lane.b32.xlu1 %v679_v39, 256  ;;  %660 = vbcast.lane.b32.xlu0 %v658_v40, 256  ;;  %v2625_v32 = vcombine.high %v4477_v23, %v4477_v23  ;;  %v2728_v38 = vrot.slane %v4482_v28, %v4421_v35  ;;  %v2669_v59 = vsub.f32 1.0, %v4477_v23  ;;  %v2744_v62 = vrot.slane %v4477_v23, %v4421_v35 }
  0x61   : > { %v2716_v24 = vrot.slane %v2568_v17, %v4421_v35  ;;  %v2578_v25 = vcombine.high %v2568_v17, %v2568_v17  ;;  %v2662_v26 = vsub.f32 1.0, %v2568_v17  ;;  %v2670_v27 = vsub.f32 1.0, %v2617_v18 }
  0x62   : > { %v2720_v29 = vrot.slane %v2576_v21, %v4421_v35  ;;  %v2646_v30 = vmul.f32 0.003, %v2568_v17  ;;  %v2654_v31 = vmul.f32 0.003, %v2617_v18  ;;  %v2663_v37 = vsub.f32 1.0, %v2576_v21 }
  0x63   : > { %v2724_v33 = vrot.slane %v2578_v25, %v4421_v35  ;;  %v2678_v34 = vmul.f32 0.033333335, %v2662_v26  ;;  %v2686_v36 = vmul.f32 0.033333335, %v2670_v27  ;;  %v2748_v39 = vrot.slane %v2617_v18, %v4421_v35 }
  0x64   : > { %737 = vbcast.lane.b32.xlu1 %v735_v41, 256  ;;  %716 = vbcast.lane.b32.xlu0 %v714_v42, 256  ;;  %v2647_v40 = vmul.f32 0.003, %v2576_v21  ;;  %v2648_v63 = vmul.f32 0.003, %v2578_v25  ;;  %v2575_v21 = vrot.slane %v2547_v7, %v4455_v2  ;;  %v2624_v26 = vrot.slane %v2596_v8, %v4455_v2 }
  0x65   : > { %v2694_v41 = vadd.f32 %v2678_v34, %v2646_v30  ;;  %v2702_v42 = vadd.f32 %v2686_v36, %v2654_v31  ;;  %v2665_v12 = vsub.f32 1.0, %v4482_v28  ;;  %v2649_v17 = vmul.f32 0.003, %v4482_v28 }
  0x66   : > { %v2650_v36 = vmul.f32 0.003, %v2575_v21 }
  0x68   : > { %616 = vbcast.lane.b32.xlu1 %v614_v43, 256  ;;  %560 = vbcast.lane.b32.xlu0 %v558_v44, 256  ;;  %v2679_v43 = vmul.f32 0.033333335, %v2663_v37  ;;  %v2671_v44 = vsub.f32 1.0, %v2625_v32  ;;  %v2577_v37 = vcombine.high %v4482_v28, %v4482_v28 }
  0x6c   : > { %744 = vbcast.lane.b32.xlu1 %v742_v46, 256  ;;  %688 = vbcast.lane.b32.xlu0 %v686_v47, 256  ;;  %v2655_v46 = vmul.f32 0.003, %v2625_v32  ;;  %v2661_v47 = vsub.f32 1.0, %v2554_v15 }
  0x6e   : > { %v2677_v58 = vmul.f32 0.033333335, %v2661_v47 }
  0x70   : > { %567 = vbcast.lane.b32.xlu1 %v565_v48, 256  ;;  %546 = vbcast.lane.b32.xlu0 %v544_v49, 256  ;;  %v2892_v48 = vrot.slane %v2694_v41, %v4421_v35  ;;  %v2924_v49 = vrot.slane %v2702_v42, %v4421_v35  ;;  %v2732_v42 = vrot.slane %v2575_v21, %v4421_v35 }
  0x74   : > { %623 = vbcast.lane.b32.xlu1 %v621_v50, 256  ;;  %602 = vbcast.lane.b32.xlu0 %v600_v51, 256  ;;  %v2695_v50 = vadd.f32 %v2679_v43, %v2647_v40  ;;  %v2687_v51 = vmul.f32 0.033333335, %v2671_v44  ;;  %v2658_v40 = vmul.f32 0.003, %v2624_v26  ;;  %v2764_v43 = vrot.slane %v2624_v26, %v4421_v35 }
  0x76   : > { %v2703_v57 = vadd.f32 %v2687_v51, %v2655_v46  ;;  %v2667_v46 = vsub.f32 1.0, %v2577_v37 }
  0x78   : > { %751 = vbcast.lane.b32.xlu1 %v749_v53, 256  ;;  %695 = vbcast.lane.b32.xlu0 %v693_v54, 256  ;;  %v2752_v53 = vrot.slane %v2625_v32, %v4421_v35  ;;  %v2645_v54 = vmul.f32 0.003, %v2554_v15  ;;  %v2928_v3 = vrot.slane %v2703_v57, %v4421_v35  ;;  %v2666_v32 = vsub.f32 1.0, %v2575_v21 }
  0x7a   : > { %v2693_v4 = vadd.f32 %v2677_v58, %v2645_v54 }
  0x7c   : > { %630 = vbcast.lane.b32.xlu1 %v628_v55, 256  ;;  %574 = vbcast.lane.b32.xlu0 %v572_v56, 256  ;;  %v2664_v55 = vsub.f32 1.0, %v2578_v25  ;;  %v2896_v56 = vrot.slane %v2695_v50, %v4421_v35  ;;  %v2888_v13 = vrot.slane %v2693_v4, %v4421_v35  ;;  %v2628_v50 = vcombine.high %v2624_v26, %v2624_v26 }
  0x7e   : > { %v2772_v8 = vrot.slane %v2628_v50, %v4421_v35 }
  0x80   : > { %758 = vbcast.lane.b32.xlu1 %v756_v60, 256  ;;  %702 = vbcast.lane.b32.xlu0 %v700_v61, 256  ;;  %v2627_v60 = vcombine.high %v2617_v18, %v2617_v18  ;;  %v2610_v61 = vrot.slane %v2594_v52, %v4455_v2 }
  0x82   : > { %v2656_v11 = vmul.f32 0.003, %v2627_v60  ;;  %v2657_v19 = vmul.f32 0.003, %v2610_v61  ;;  %v2760_v27 = vrot.slane %v2610_v61, %v4421_v35 }
  0x84   : > { %637 = vbcast.lane.b32.xlu1 %v635_v0, 256  ;;  %581 = vbcast.lane.b32.xlu0 %v579_v1, 256  ;;  %v2680_v0 = vmul.f32 0.033333335, %v2664_v55  ;;  %v2653_v1 = vmul.f32 0.003, %v4477_v23  ;;  %v2736_v55 = vrot.slane %v2577_v37, %v4421_v35 }
  0x88   : > { %765 = vbcast.lane.b32.xlu1 %v763_v5, 256  ;;  %709 = vbcast.lane.b32.xlu0 %v707_v6, 256  ;;  %v2685_v5 = vmul.f32 0.033333335, %v2669_v59  ;;  %v2672_v6 = vsub.f32 1.0, %v2627_v60 }
  0x8a   : > { %v2688_v15 = vmul.f32 0.033333335, %v2672_v6 }
  0x8c   : > { %644 = vbcast.lane.b32.xlu1 %v642_v9, 256  ;;  %588 = vbcast.lane.b32.xlu0 %v586_v10, 256  ;;  %v2756_v9 = vrot.slane %v2627_v60, %v4421_v35  ;;  %v2696_v10 = vadd.f32 %v2680_v0, %v2648_v63  ;;  %v2676_v60 = vsub.f32 1.0, %v2628_v50  ;;  %v2660_v63 = vmul.f32 0.003, %v2628_v50 }
  0x8e   : > { %v2900_v18 = vrot.slane %v2696_v10, %v4421_v35  ;;  %v2692_v4 = vmul.f32 0.033333335, %v2676_v60 }
  0x90   : > { %651 = vbcast.lane.b32.xlu1 %v649_v14, 256  ;;  %595 = vbcast.lane.b32.xlu0 %v593_v16, 256  ;;  %v2701_v14 = vadd.f32 %v2685_v5, %v2653_v1  ;;  %v2673_v16 = vsub.f32 1.0, %v2610_v61 }
  0x92   : > { %v2920_v23 = vrot.slane %v2701_v14, %v4421_v35  ;;  %v2689_v25 = vmul.f32 0.033333335, %v2673_v16 }
  0x94   : > { %2778 = vperm.xlu1 %4100, %v2716_v24   ;;  %2774 = vperm.xlu0 %4099, %v2712_v20   ;;  %v2681_v20 = vmul.f32 0.033333335, %v2665_v12  ;;  %v2704_v24 = vadd.f32 %v2688_v15, %v2656_v11  ;;  %v2705_v31 = vadd.f32 %v2689_v25, %v2657_v19 }
  0x96   : > { %v2932_v30 = vrot.slane %v2704_v24, %v4421_v35  ;;  %v2936_v2 = vrot.slane %v2705_v31, %v4421_v35 }
  0x98   : > { %2782 = vperm.xlu1 %4100, %v2720_v29   ;;  %2786 = vperm.xlu0 %4099, %v2724_v33   ;;  %v2697_v29 = vadd.f32 %v2681_v20, %v2649_v17  ;;  %v2674_v33 = vsub.f32 1.0, %v2624_v26 }
  0x9a   : > { %v2904_v34 = vrot.slane %v2697_v29, %v4421_v35  ;;  %v2690_v41 = vmul.f32 0.033333335, %v2674_v33 }
  0x9c   : > { %2790 = vperm.xlu1 %4100, %v2728_v38   ;;  %2810 = vperm.xlu0 %4099, %v2748_v39   ;;  %v2626_v38 = vcombine.high %v2610_v61, %v2610_v61  ;;  %v2682_v39 = vmul.f32 0.033333335, %v2666_v32  ;;  %v2706_v45 = vadd.f32 %v2690_v41, %v2658_v40  ;;  %v536_v61 = vand.u32 127, %v535_v22 }
  0x9d   : > { %v2708_v22 = vadd.f32 %v2692_v4, %v2660_v63 }
  0x9e   : > { %v2698_v44 = vadd.f32 %v2682_v39, %v2650_v36  ;;  %v2675_v47 = vsub.f32 1.0, %v2626_v38  ;;  %v2659_v28 = vmul.f32 0.003, %v2626_v38  ;;  %v2940_v52 = vrot.slane %v2706_v45, %v4421_v35 }
  0x9f   : > { %v537_v5 = vcvt.s32.f32 %v536_v61  ;;  %v2948_v14 = vrot.slane %v2708_v22, %v4421_v35 }
  0xa0   : > { %2954 = vperm.xlu1 %4100, %v2892_v48   ;;  %2986 = vperm.xlu0 %4099, %v2924_v49   ;;  %v2651_v48 = vmul.f32 0.003, %v2577_v37  ;;  %v2579_v49 = vcombine.high %v2575_v21, %v2575_v21  ;;  %v2908_v51 = vrot.slane %v2698_v44, %v4421_v35  ;;  %v2691_v54 = vmul.f32 0.033333335, %v2675_v47 }
  0xa1   : > { %v4529_v10 = vadd.f32 1.0, %v537_v5 }
  0xa2   : > { %v2707_v58 = vadd.f32 %v2691_v54, %v2659_v28  ;;  %v2668_v59 = vsub.f32 1.0, %v2579_v49  ;;  %v2740_v7 = vrot.slane %v2579_v49, %v4421_v35 }
  0xa4   : > { %2814 = vperm.xlu1 %4100, %v2752_v53   ;;  %2958 = vperm.xlu0 %4099, %v2896_v56   ;;  %v2683_v53 = vmul.f32 0.033333335, %v2667_v46  ;;  %v2768_v56 = vrot.slane %v2626_v38, %v4421_v35  ;;  %v2944_v1 = vrot.slane %v2707_v58, %v4421_v35 }
  0xa6   : > { %v2699_v57 = vadd.f32 %v2683_v53, %v2651_v48 }
  0xa8   : > { %2990 = vperm.xlu1 %4100, %v2928_v3   ;;  %2806 = vperm.xlu0 %4099, %v2744_v62   ;;  %v2652_v62 = vmul.f32 0.003, %v2579_v49  ;;  %v2912_v0 = vrot.slane %v2699_v57, %v4421_v35  ;;  %v2684_v3 = vmul.f32 0.033333335, %v2668_v59 }
  0xac   : > { %2818 = vperm.xlu1 %4100, %v2756_v9   ;;  %2950 = vperm.xlu0 %4099, %v2888_v13   ;;  %v2700_v9 = vadd.f32 %v2684_v3, %v2652_v62 }
  0xae   : > { %v2916_v13 = vrot.slane %v2700_v9, %v4421_v35 }
  0xb0   : > { %2962 = vperm.xlu1 %4100, %v2900_v18   ;;  %2982 = vperm.xlu0 %4099, %v2920_v23  }
  0xb4   : > { %2994 = vperm.xlu1 %4100, %v2932_v30   ;;  %2822 = vperm.xlu0 %4099, %v2760_v27  }
  0xb8   : > { %2966 = vperm.xlu1 %4100, %v2904_v34   ;;  %2998 = vperm.xlu0 %4099, %v2936_v2  }
  0xbc   : > { %2794 = vperm.xlu1 %4100, %v2732_v42   ;;  %2826 = vperm.xlu0 %4099, %v2764_v43  }
  0xc0   : > { %2970 = vperm.xlu1 %4100, %v2908_v51   ;;  %3002 = vperm.xlu0 %4099, %v2940_v52  }
  0xc4   : > { %2798 = vperm.xlu1 %4100, %v2736_v55   ;;  %2830 = vperm.xlu0 %4099, %v2768_v56  }
  0xc6   : > { %v668_v6 = vpop.permute.xlu0 %667  ;;  %v675_v15 = vpop.permute.xlu1 %674 }
  0xc7   : > { %v768_v23 = vmul.f32 %v668_v6, %v4529_v10  ;;  %v769_v33 = vmul.f32 %v675_v15, %v4529_v10 }
  0xc8   : > { %2974 = vperm.xlu1 %4100, %v2912_v0   ;;  %3006 = vperm.xlu0 %4099, %v2944_v1  }
  0xca   : > { %v724_v11 = vpop.permute.xlu0 %723  ;;  %v731_v16 = vpop.permute.xlu1 %730 }
  0xcb   : > { %v776_v12 = vmul.f32 %v724_v11, %v4529_v10  ;;  %v777_v35 = vmul.f32 %v731_v16, %v4529_v10 }
  0xcc   : > { %2802 = vperm.xlu1 %4100, %v2740_v7   ;;  %2834 = vperm.xlu0 %4099, %v2772_v8  }
  0xce   : > { %v610_v17 = vpop.permute.xlu1 %609  ;;  %v554_v18 = vpop.permute.xlu0 %553 }
  0xcf   : > { %v792_v24 = vadd.f32 %v776_v12, %v610_v17  ;;  %v784_v26 = vadd.f32 %v768_v23, %v554_v18 }
  0xd0   : > { %2978 = vperm.xlu1 %4100, %v2916_v13   ;;  %3010 = vperm.xlu0 %4099, %v2948_v14  }
  0xd1   : > { %v808_v27 = vfloor.f32 %v792_v24  ;;  %v800_v30 = vfloor.f32 %v784_v26 }
  0xd2   : > { %v682_v20 = vpop.permute.xlu1 %681  ;;  %v661_v19 = vpop.permute.xlu0 %660 }
  0xd3   : > { %v824_v32 = vsub.f32 %v792_v24, %v808_v27  ;;  %v816_v36 = vsub.f32 %v784_v26, %v800_v30  ;;  %v770_v45 = vmul.f32 %v682_v20, %v4529_v10  ;;  %v767_v28 = vmul.f32 %v661_v19, %v4529_v10 }
  0xd5   : > { %v4539_v2 = vmul.f32 6.2831855, %v824_v32  ;;  %v4543_v41 = vmul.f32 6.2831855, %v816_v36 }
  0xd6   : > { %v738_v21 = vpop.permute.xlu1 %737  ;;  %v717_v25 = vpop.permute.xlu0 %716 }
  0xd7   : > { %7547 = vst [vmem:[#allocation11_spill] sm:$0xff] %v4539_v2  ;;  %7548 = vst [vmem:[#allocation12_spill] sm:$0xff] %v4543_v41  ;;  %v1786_v43 = vand.u32 2139095040, %v4539_v2  ;;  %v954_v47 = vand.u32 2139095040, %v4543_v41  ;;  %v778_v1 = vmul.f32 %v738_v21, %v4529_v10  ;;  %v775_v7 = vmul.f32 %v717_v25, %v4529_v10 }
  0xd8   : > { %v7383_v24 = vand.u32 2147483647, %v4543_v41 }
  0xd9   : > { %v1787_v51 = vshrl.u32 %v1786_v43, 23  ;;  %v955_v54 = vshrl.u32 %v954_v47, 23 }
  0xda   : > { %v617_v29 = vpop.permute.xlu1 %616  ;;  %v561_v31 = vpop.permute.xlu0 %560  ;;  %v4573_v32 = vand.u32 8388607, %v7383_v24 }
  0xdb   : > { %v793_v34 = vadd.f32 %v777_v35, %v617_v29  ;;  %v785_v38 = vadd.f32 %v769_v33, %v561_v31  ;;  %v3952_v57 = vadd.s32 4294967169, %v1787_v51  ;;  %v3920_v60 = vadd.s32 4294967169, %v955_v54 }
  0xdd   : > { %v809_v40 = vfloor.f32 %v793_v34  ;;  %v801_v42 = vfloor.f32 %v785_v38  ;;  %v1793_v63 = vadd.s32 1, %v3952_v57  ;;  %v961_v5 = vadd.s32 1, %v3920_v60 }
  0xde   : > { %v4537_v37 = vpop.permute.xlu1 %744  ;;  %v4541_v39 = vpop.permute.xlu0 %688  ;;  %v7390_v57 = vmov 2102212464  }
  0xdf   : > { %v825_v46 = vsub.f32 %v793_v34, %v809_v40  ;;  %v817_v49 = vsub.f32 %v785_v38, %v801_v42  ;;  %vm1794_vm0 = vcmp.gt.s32.totalorder %v1793_v63, 0  ;;  %vm962_vm1 = vcmp.gt.s32.totalorder %v961_v5, 0 }
  0xe0   : > { %v1795_v14 = vsel %vm1794_vm0, %v1793_v63, 0  ;;  %v963_v18 = vsel %vm962_vm1, %v961_v5, 0 }
  0xe1   : > { %v4549_v52 = vmul.f32 6.2831855, %v825_v46  ;;  %v4551_v55 = vmul.f32 6.2831855, %v817_v49  ;;  %v4563_v23 = vand.u32 31, %v1795_v14  ;;  %v4566_v29 = vand.u32 31, %v963_v18 }
  0xe2   : > { %v568_v44 = vpop.permute.xlu1 %567  ;;  %v547_v48 = vpop.permute.xlu0 %546  ;;  %v7384_v49 = vmov 1326507024  }
  0xe3   : > { %v786_v50 = vadd.f32 %v770_v45, %v568_v44  ;;  %7549 = vst [vmem:[#allocation13_spill] sm:$0xff] %v4549_v52  ;;  %v783_v53 = vadd.f32 %v767_v28, %v547_v48  ;;  %7550 = vst [vmem:[#allocation14_spill] sm:$0xff] %v4551_v55  ;;  %v1890_v58 = vand.u32 2139095040, %v4549_v52  ;;  %v1058_v61 = vand.u32 2139095040, %v4551_v55 }
  0xe4   : > { %7553 = vst [vmem:[#allocation17_spill] sm:$0xff] %v4563_v23  ;;  %v4569_v35 = vsub.s32 32, %v4563_v23  ;;  %v4580_v38 = vsub.s32 32, %v4566_v29  ;;  %v7394_v45 = vmov 920167782   ;;  %v779_v48 = vmul.f32 %v4537_v37, %v4529_v10 }
  0xe5   : > { %v802_v56 = vfloor.f32 %v786_v50  ;;  %v799_v59 = vfloor.f32 %v783_v53  ;;  %v1891_v3 = vshrl.u32 %v1890_v58, 23  ;;  %v1059_v8 = vshrl.u32 %v1058_v61, 23 }
  0xe6   : > { %v624_v0 = vpop.permute.xlu1 %623  ;;  %v603_v6 = vpop.permute.xlu0 %602  ;;  %7554 = vst [vmem:[#allocation18_spill] sm:$0xff] %v4569_v35  ;;  %v1810_v46 = vshrl.u32 %v7394_v45, %v4569_v35  ;;  %v1809_v58 = vshll.u32 %v7390_v57, %v4563_v23  ;;  %v978_v37 = vshrl.u32 %v7394_v45, %v4580_v38  ;;  %v1812_v60 = vshll.u32 %v7394_v45, %v4563_v23 }
  0xe7   : > { %v818_v62 = vsub.f32 %v786_v50, %v802_v56  ;;  %v815_v4 = vsub.f32 %v783_v53, %v799_v59  ;;  %v794_v22 = vadd.f32 %v778_v1, %v624_v0  ;;  %v3956_v11 = vadd.s32 4294967169, %v1891_v3 }
  0xe8   : > { %v791_v13 = vadd.f32 %v775_v7, %v603_v6  ;;  %v3924_v15 = vadd.s32 4294967169, %v1059_v8  ;;  %v1813_v50 = vshrl.u32 %v7384_v49, %v4569_v35  ;;  %v4596_v56 = vshrl.u32 %v1795_v14, 5 }
  0xe9   : > { %v4557_v9 = vmul.f32 6.2831855, %v818_v62  ;;  %v4559_v12 = vmul.f32 6.2831855, %v815_v4  ;;  %v810_v17 = vfloor.f32 %v794_v22  ;;  %v1897_v20 = vadd.s32 1, %v3956_v11 }
  0xea   : > { %v807_v21 = vfloor.f32 %v791_v13  ;;  %v1065_v25 = vadd.s32 1, %v3924_v15  ;;  %v4577_v36 = vpop.permute.xlu1 %751  ;;  %v4584_v44 = vpop.permute.xlu0 %695  ;;  %7558 = vst [vmem:[#allocation22_spill] sm:$0xff] %v4596_v56  ;;  %v771_v59 = vmul.f32 %v4541_v39, %v4529_v10  ;;  %v4609_v1 = vor.u32 %v1810_v46, %v1809_v58 }
  0xeb   : > { %7551 = vst [vmem:[#allocation15_spill] sm:$0xff] %v4557_v9  ;;  %7552 = vst [vmem:[#allocation16_spill] sm:$0xff] %v4559_v12  ;;  %v1162_v16 = vand.u32 2139095040, %v4557_v9  ;;  %v850_v19 = vand.u32 2139095040, %v4559_v12  ;;  %v826_v27 = vsub.f32 %v794_v22, %v810_v17  ;;  %vm1898_vm2 = vcmp.gt.s32.totalorder %v1897_v20, 0 }
  0xec   : > { %v823_v31 = vsub.f32 %v791_v13, %v807_v21  ;;  %vm1066_vm3 = vcmp.gt.s32.totalorder %v1065_v25, 0  ;;  %v1899_v40 = vsel %vm1898_vm2, %v1897_v20, 0  ;;  %7559 = vst [vmem:[#allocation23_spill] sm:$0xff] %v4609_v1  ;;  %v4611_v3 = vshrl.u32 %v963_v18, 5 }
  0xed   : > { %v1163_v26 = vshrl.u32 %v1162_v16, 23  ;;  %v851_v30 = vshrl.u32 %v850_v19, 23  ;;  %v4575_v34 = vmul.f32 6.2831855, %v826_v27  ;;  %v1067_v47 = vsel %vm1066_vm3, %v1065_v25, 0 }
  0xee   : > { %v4582_v43 = vmul.f32 6.2831855, %v823_v31  ;;  %v4593_v51 = vand.u32 31, %v1899_v40  ;;  %v4606_v61 = vand.u32 31, %v1067_v47  ;;  %v631_v0 = vpop.permute.xlu1 %630  ;;  %v977_v4 = vshll.u32 %v7390_v57, %v4566_v29  ;;  %v575_v8 = vpop.permute.xlu0 %574 }
  0xef   : > { %v3928_v33 = vadd.s32 4294967169, %v1163_v26  ;;  %7555 = vst [vmem:[#allocation19_spill] sm:$0xff] %v4575_v34  ;;  %v3916_v42 = vadd.s32 4294967169, %v851_v30  ;;  %v1994_v54 = vand.u32 2139095040, %v4575_v34  ;;  %v981_v5 = vshrl.u32 %v7384_v49, %v4580_v38 }
  0xf0   : > { %7556 = vst [vmem:[#allocation20_spill] sm:$0xff] %v4582_v43  ;;  %7557 = vst [vmem:[#allocation21_spill] sm:$0xff] %v4593_v51  ;;  %v1682_v63 = vand.u32 2139095040, %v4582_v43  ;;  %v1814_v39 = vor.u32 %v1813_v50, %v1812_v60  ;;  %v4618_v6 = vsub.s32 32, %v4593_v51  ;;  %v4620_v22 = vor.u32 %v978_v37, %v977_v4 }
  0xf1   : > { %v1169_v53 = vadd.s32 1, %v3928_v33  ;;  %v857_v62 = vadd.s32 1, %v3916_v42  ;;  %v1995_v7 = vshrl.u32 %v1994_v54, 23  ;;  %v980_v11 = vshll.u32 %v7394_v45, %v4566_v29 }
  0xf2   : > { %7560 = vst [vmem:[#allocation24_spill] sm:$0xff] %v4618_v6  ;;  %v795_v13 = vadd.f32 %v779_v48, %v631_v0  ;;  %vm1818_vm5 = vcmp.lt.s32.totalorder %v4596_v56, 4  ;;  %v4627_v15 = vsub.s32 32, %v4606_v61  ;;  %v1683_v16 = vshrl.u32 %v1682_v63, 23 }
  0xf3   : > { %vm1170_vm4 = vcmp.gt.s32.totalorder %v1169_v53, 0  ;;  %vm858_vm6 = vcmp.gt.s32.totalorder %v857_v62, 0  ;;  %v982_v17 = vor.u32 %v981_v5, %v980_v11  ;;  %vm986_vm7 = vcmp.lt.s32.totalorder %v4611_v3, 4 }
  0xf4   : > { %v1171_v18 = vsel %vm1170_vm4, %v1169_v53, 0  ;;  %v787_v20 = vadd.f32 %v771_v59, %v575_v8  ;;  %v4633_v19 = vsel %vm1818_vm5, %v4609_v1, 920167782  ;;  %v4637_v21 = vsel %vm1818_vm5, %v1814_v39, 1326507024 }
  0xf5   : > { %7561 = vst [vmem:[#allocation25_spill] sm:$0xff] %v4633_v19  ;;  %7562 = vst [vmem:[#allocation26_spill] sm:$0xff] %v4637_v21  ;;  %v1914_v25 = vshrl.u32 %v7394_v45, %v4618_v6  ;;  %v3960_v26 = vadd.s32 4294967169, %v1995_v7  ;;  %v4644_v27 = vsel %vm986_vm7, %v4620_v22, 920167782  ;;  %v1917_v30 = vshrl.u32 %v7384_v49, %v4618_v6 }
  0xf6   : > { %v859_v31 = vsel %vm858_vm6, %v857_v62, 0  ;;  %v811_v33 = vfloor.f32 %v795_v13  ;;  %v1913_v42 = vshll.u32 %v7390_v57, %v4593_v51  ;;  %v1082_v46 = vshrl.u32 %v7394_v45, %v4627_v15 }
  0xf7   : > { %v4652_v48 = vand.u32 31, %v1171_v18  ;;  %v3948_v50 = vadd.s32 4294967169, %v1683_v16  ;;  %v4654_v53 = vshrl.u32 %v1899_v40, 5  ;;  %v1916_v54 = vshll.u32 %v7394_v45, %v4593_v51 }
  0xf8   : > { %v1085_v58 = vshrl.u32 %v7384_v49, %v4627_v15  ;;  %v803_v37 = vfloor.f32 %v787_v20  ;;  %v4660_v59 = vor.u32 %v1914_v25, %v1913_v42  ;;  %v1081_v60 = vshll.u32 %v7390_v57, %v4606_v61  ;;  %v4703_v42 = vpop.permute.xlu0 %702 }
  0xf9   : > { %7563 = vst [vmem:[#allocation27_spill] sm:$0xff] %v4654_v53  ;;  %v4664_v62 = vand.u32 31, %v859_v31  ;;  %v2001_v63 = vadd.s32 1, %v3960_v26  ;;  %v1918_v0 = vor.u32 %v1917_v30, %v1916_v54  ;;  %v4666_v4 = vshrl.u32 %v1067_v47, 5 }
  0xfa   : > { %7564 = vst [vmem:[#allocation28_spill] sm:$0xff] %v4660_v59  ;;  %v1084_v40 = vshll.u32 %v7394_v45, %v4606_v61  ;;  %v827_v5 = vsub.f32 %v795_v13, %v811_v33  ;;  %v4672_v39 = vsel %vm986_vm7, %v982_v17, 1326507024  ;;  %v4674_v7 = vor.u32 %v1082_v46, %v1081_v60  ;;  %v4701_v33 = vpop.permute.xlu1 %758 }
  0xfb   : > { %v4677_v8 = vsub.s32 32, %v4652_v48  ;;  %v1689_v11 = vadd.s32 1, %v3948_v50  ;;  %vm1922_vm8 = vcmp.lt.s32.totalorder %v4654_v53, 4  ;;  %v780_v47 = vmul.f32 %v4577_v36, %v4529_v10 }
  0xfc   : > { %v1086_v16 = vor.u32 %v1085_v58, %v1084_v40  ;;  %v819_v25 = vsub.f32 %v787_v20, %v803_v37  ;;  %v4685_v13 = vsel %vm1922_vm8, %v4660_v59, 920167782  ;;  %v4688_v17 = vsub.s32 32, %v4664_v62  ;;  %v582_v34 = vpop.permute.xlu0 %581 }
  0xfd   : > { %7565 = vst [vmem:[#allocation29_spill] sm:$0xff] %v4685_v13  ;;  %vm2002_vm9 = vcmp.gt.s32.totalorder %v2001_v63, 0  ;;  %v772_v26 = vmul.f32 %v4584_v44, %v4529_v10  ;;  %v4694_v30 = vsel %vm1922_vm8, %v1918_v0, 1326507024  ;;  %vm1090_vm10 = vcmp.lt.s32.totalorder %v4666_v4, 4 }
  0xfe   : > { %7566 = vst [vmem:[#allocation30_spill] sm:$0xff] %v4694_v30  ;;  %v4697_v36 = vshrl.u32 %v1171_v18, 5  ;;  %v4699_v20 = vmul.f32 6.2831855, %v827_v5  ;;  %v4708_v46 = vsel %vm1090_vm10, %v4674_v7, 920167782  ;;  %v1186_v44 = vshrl.u32 %v7394_v45, %v4677_v8 }
  0xff   : > { %v4712_v50 = vshrl.u32 %v859_v31, 5  ;;  %vm1690_vm11 = vcmp.gt.s32.totalorder %v1689_v11, 0  ;;  %v4716_v18 = vsel %vm1090_vm10, %v1086_v16, 1326507024  ;;  %v1185_v54 = vshll.u32 %v7390_v57, %v4652_v48 }
 0x100   : > { %7567 = vst [vmem:[#allocation31_spill] sm:$0xff] %v4699_v20  ;;  %v2003_v58 = vsel %vm2002_vm9, %v2001_v63, 0  ;;  %v4720_v37 = vmul.f32 6.2831855, %v819_v25  ;;  %v1188_v60 = vshll.u32 %v7394_v45, %v4652_v48  ;;  %v1189_v0 = vshrl.u32 %v7384_v49, %v4677_v8 }
 0x101   : > { %v874_v31 = vshrl.u32 %v7394_v45, %v4688_v17  ;;  %v877_v40 = vshrl.u32 %v7384_v49, %v4688_v17  ;;  %vm1194_vm12 = vcmp.lt.s32.totalorder %v4697_v36, 4  ;;  %v873_v5 = vshll.u32 %v7390_v57, %v4664_v62  ;;  %v638_v49 = vpop.permute.xlu1 %637 }
 0x102   : > { %7568 = vst [vmem:[#allocation32_spill] sm:$0xff] %v4720_v37  ;;  %v1691_v63 = vsel %vm1690_vm11, %v1689_v11, 0  ;;  %v2098_v16 = vand.u32 2139095040, %v4699_v20  ;;  %v4734_v25 = vor.u32 %v1186_v44, %v1185_v54  ;;  %v876_v24 = vshll.u32 %v7394_v45, %v4664_v62 }
 0x103   : > { %vm882_vm13 = vcmp.lt.s32.totalorder %v4712_v50, 4  ;;  %v4739_v14 = vand.u32 31, %v2003_v58  ;;  %v1266_v28 = vand.u32 2139095040, %v4720_v37  ;;  %v7409_v43 = vmov 2475754826  }
 0x104   : > { %7569 = vst [vmem:[#allocation33_spill] sm:$0xff] %v4734_v25  ;;  %v969_v57 = vshrl.u32 %v7409_v43, %v4580_v38  ;;  %v7411_v11 = vmov 2131351028   ;;  %v7571_v54 = vmov 2102212464   ;;  %v1190_v45 = vor.u32 %v1189_v0, %v1188_v60 }
 0x105   : > { %7570 = vst [vmem:[#allocation34_spill] sm:$0xff] %v4739_v14  ;;  %v972_v44 = vshrl.u32 %v7411_v11, %v4580_v38  ;;  %v975_v20 = vshrl.u32 %v7571_v54, %v4580_v38  ;;  %v4748_v13 = vor.u32 %v874_v31, %v873_v5  ;;  %v878_v59 = vor.u32 %v877_v40, %v876_v24 }
 0x106   : > { %v4750_v30 = vand.u32 31, %v1691_v63  ;;  %v2099_v53 = vshrl.u32 %v2098_v16, 23  ;;  %v7407_v51 = vmov 683565275   ;;  %v971_v52 = vshll.u32 %v7409_v43, %v4566_v29 }
 0x107   : > { %v968_v6 = vshll.u32 %v7407_v51, %v4566_v29  ;;  %v974_v41 = vshll.u32 %v7411_v11, %v4566_v29  ;;  %v4761_v60 = vsel %vm1194_vm12, %v4734_v25, 920167782  ;;  %v4764_v24 = vsub.s32 32, %v4739_v14 }
 0x108   : > { %7572 = vst [vmem:[#allocation35_spill] sm:$0xff] %v4750_v30  ;;  %7573 = vst [vmem:[#allocation36_spill] sm:$0xff] %v4761_v60  ;;  %v796_v0 = vadd.f32 %v780_v47, %v638_v49  ;;  %v788_v31 = vadd.f32 %v772_v26, %v582_v34  ;;  %v1267_v40 = vshrl.u32 %v1266_v28, 23  ;;  %v4768_v16 = vor.u32 %v972_v44, %v971_v52 }
 0x109   : > { %7574 = vst [vmem:[#allocation37_spill] sm:$0xff] %v4764_v24  ;;  %v4766_v5 = vor.u32 %v969_v57, %v968_v6  ;;  %v976_v51 = vor.u32 %v975_v20, %v974_v41  ;;  %v4772_v43 = vsel %vm1194_vm12, %v1190_v45, 1326507024  ;;  %v4777_v29 = vsel %vm882_vm13, %v4748_v13, 920167782  ;;  %v766_v57 = vpop.permute.xlu1 %765  ;;  %v710_v6 = vpop.permute.xlu0 %709 }
 0x10a   : > { %v4780_v11 = vsub.s32 32, %v4750_v30  ;;  %v7576_v34 = vor.u32 8388608, %v4573_v32  ;;  %v4788_v52 = vsel %vm882_vm13, %v878_v59, 1326507024  ;;  %v4790_v41 = vshrl.u32 %v2003_v58, 5 }
 0x10b   : > { %v4792_v45 = vshrl.u32 %v1691_v63, 5  ;;  %v3964_v49 = vadd.s32 4294967169, %v2099_v53  ;;  %v7579_v47 = vmov 920167782   ;;  %v812_v20 = vfloor.f32 %v796_v0 }
 0x10c   : > { %7575 = vst [vmem:[#allocation38_spill] sm:$0xff] %v4780_v11  ;;  %v4784_v28 = vshll.u32 %v7576_v34, 8  ;;  %7577 = vst [vmem:[#allocation39_spill] sm:$0xff] %v4790_v41  ;;  %v2018_v26 = vshrl.u32 %v7579_v47, %v4764_v24  ;;  %vm983_vm14 = vcmp.lt.s32.totalorder %v4611_v3, 1  ;;  %vm985_vm15 = vcmp.lt.s32.totalorder %v4611_v3, 3 }
 0x10d   : > { %7578 = vst [vmem:[#allocation40_spill] sm:$0xff] %v4792_v45  ;;  %v3932_v32 = vadd.s32 4294967169, %v1267_v40  ;;  %v804_v44 = vfloor.f32 %v788_v31  ;;  %v991_v59 = vsel %vm983_vm14, %v4766_v5, %v4768_v16  ;;  %v993_v53 = vsel %vm985_vm15, %v976_v51, %v4644_v27  ;;  %v645_v2 = vpop.permute.xlu1 %644 }
 0x10e   : > { %v7580_v58 = vmov 1326507024   ;;  %v1706_v34 = vshrl.u32 %v7579_v47, %v4780_v11  ;;  %v995_v40 = vsel %vm983_vm14, %v4768_v16, %v976_v51  ;;  %v997_v1 = vsel %vm985_vm15, %v4620_v22, %v4672_v39 }
 0x10f   : > { %v2021_v63 = vshrl.u32 %v7580_v58, %v4764_v24  ;;  %v2017_v21 = vshll.u32 %v7571_v54, %v4739_v14  ;;  %v1709_v27 = vshrl.u32 %v7580_v58, %v4780_v11  ;;  %v2105_v19 = vadd.s32 1, %v3964_v49  ;;  %v589_v11 = vpop.permute.xlu0 %588 }
 0x110   : > { %vm984_vm0 = vcmp.lt.s32.totalorder %v4611_v3, 2  ;;  %v2020_v24 = vshll.u32 %v7579_v47, %v4739_v14  ;;  %v1705_v56 = vshll.u32 %v7571_v54, %v4750_v30  ;;  %v828_v37 = vsub.f32 %v796_v0, %v812_v20 }
 0x111   : > { %v994_v35 = vsel %vm984_vm0, %v991_v59, %v993_v53  ;;  %v1708_v22 = vshll.u32 %v7579_v47, %v4750_v30  ;;  %v1273_v39 = vadd.s32 1, %v3932_v32  ;;  %v820_v23 = vsub.f32 %v788_v31, %v804_v44 }
 0x112   : > { %v998_v49 = vsel %vm984_vm0, %v995_v40, %v997_v1  ;;  %v4831_v60 = vor.u32 %v2018_v26, %v2017_v21  ;;  %v2022_v14 = vor.u32 %v2021_v63, %v2020_v24  ;;  %v4833_v25 = vor.u32 %v1706_v34, %v1705_v56  ;;  %v652_v63 = vpop.permute.xlu1 %651 }
 0x113   : > { %v781_v0 = vmul.f32 %v4701_v33, %v4529_v10  ;;  %v1710_v20 = vor.u32 %v1709_v27, %v1708_v22  ;;  %vm2106_vm1 = vcmp.gt.s32.totalorder %v2105_v19, 0  ;;  %v773_v31 = vmul.f32 %v4703_v42, %v4529_v10 }
 0x114   : > { %7581 = vst [vmem:[#allocation41_spill] sm:$0xff] %v4831_v60  ;;  %7582 = vst [vmem:[#allocation42_spill] sm:$0xff] %v4833_v25  ;;  %v4838_v59 = vmul.u32.u64.low %v4784_v28, %v994_v35  ;;  %v4839_v53 = vmul.u32.u64.high %v4784_v28, %v994_v35, %v4838_v59  ;;  %v4844_v32 = vmul.f32 6.2831855, %v828_v37  ;;  %vm2026_vm2 = vcmp.lt.s32.totalorder %v4790_v41, 4 }
 0x115   : > { %v4847_v1 = vmul.u32.u64.low %v4784_v28, %v998_v49  ;;  %v4848_v21 = vmul.u32.u64.high %v4784_v28, %v998_v49, %v4847_v1  ;;  %vm1274_vm3 = vcmp.gt.s32.totalorder %v1273_v39, 0  ;;  %v4851_v56 = vmul.f32 6.2831855, %v820_v23 }
 0x116   : > { %7583 = vst [vmem:[#allocation43_spill] sm:$0xff] %v4844_v32  ;;  %v988_v33 = vsel %vm986_vm7, %v976_v51, 2102212464  ;;  %v4858_v35 = vsel %vm2026_vm2, %v4831_v60, 920167782  ;;  %vm1714_vm4 = vcmp.lt.s32.totalorder %v4792_v45, 4  ;;  %v782_v44 = vmul.f32 %v766_v57, %v4529_v10 }
 0x117   : > { %7584 = vst [vmem:[#allocation44_spill] sm:$0xff] %v4851_v56  ;;  %7585 = vst [vmem:[#allocation45_spill] sm:$0xff] %v4858_v35  ;;  %v2107_v42 = vsel %vm2106_vm1, %v2105_v19, 0  ;;  %v7586_v37 = vmov 683565275   ;;  %v596_v19 = vpop.permute.xlu0 %595  ;;  %v1275_v34 = vsel %vm1274_vm3, %v1273_v39, 0  ;;  %v989_v40 = vsel %vm985_vm15, %v4768_v16, %v988_v33 }
 0x118   : > { %v967_v24 = vshrl.u32 %v7586_v37, %v4580_v38  ;;  %v4865_v26 = vsel %vm2026_vm2, %v2022_v14, 1326507024  ;;  %v4870_v23 = vsel %vm1714_vm4, %v4833_v25, 920167782  ;;  %v4874_v51 = vsel %vm1714_vm4, %v1710_v20, 1326507024 }
 0x119   : > { %7587 = vst [vmem:[#allocation46_spill] sm:$0xff] %v4865_v26  ;;  %7588 = vst [vmem:[#allocation47_spill] sm:$0xff] %v4870_v23  ;;  %v774_v38 = vmul.f32 %v710_v6, %v4529_v10  ;;  %v4884_v27 = vand.u32 31, %v2107_v42  ;;  %v2202_v22 = vand.u32 2139095040, %v4844_v32  ;;  %v1370_v49 = vand.u32 2139095040, %v4851_v56 }
 0x11a   : > { %7589 = vst [vmem:[#allocation48_spill] sm:$0xff] %v4874_v51  ;;  %v987_v14 = vsel %vm983_vm14, %v967_v24, %v4766_v5  ;;  %v797_v57 = vadd.f32 %v781_v0, %v645_v2  ;;  %v4888_v20 = vshrl.u32 %v2107_v42, 5  ;;  %v789_v39 = vadd.f32 %v773_v31, %v589_v11 }
 0x11b   : > { %7590 = vst [vmem:[#allocation49_spill] sm:$0xff] %v4884_v27  ;;  %v4890_v1 = vadd.f32 %v782_v44, %v652_v63  ;;  %v4892_v10 = vadd.f32 %v774_v38, %v596_v19  ;;  %v4894_v6 = vand.u32 31, %v1275_v34  ;;  %v990_v5 = vsel %vm984_vm0, %v987_v14, %v989_v40 }
 0x11c   : > { %7591 = vst [vmem:[#allocation50_spill] sm:$0xff] %v4888_v20  ;;  %v1009_v16 = vadd.s32 1, %v4839_v53  ;;  %vm1008_vm6 = vc.u32 %v4848_v21, %v4838_v59  ;;  %v7592_v2 = vmov 2475754826   ;;  %v7593_v11 = vmov 2131351028  }
 0x11d   : > { %v865_v0 = vshrl.u32 %v7592_v2, %v4688_v17  ;;  %v868_v31 = vshrl.u32 %v7593_v11, %v4688_v17  ;;  %v871_v42 = vshrl.u32 %v7571_v54, %v4688_v17  ;;  %v4909_v24 = vsub.s32 32, %v4884_v27 }
 0x11e   : > { %v4911_v3 = vshrl.u32 %v1275_v34, 5  ;;  %v2203_v44 = vshrl.u32 %v2202_v22, 23  ;;  %v1371_v63 = vshrl.u32 %v1370_v49, 23  ;;  %v813_v19 = vfloor.f32 %v797_v57 }
 0x11f   : > { %7594 = vst [vmem:[#allocation51_spill] sm:$0xff] %v4909_v24  ;;  %v864_v38 = vshll.u32 %v7586_v37, %v4664_v62  ;;  %v867_v14 = vshll.u32 %v7592_v2, %v4664_v62  ;;  %v870_v40 = vshll.u32 %v7593_v11, %v4664_v62  ;;  %v4920_v33 = vsub.s32 32, %v4894_v6 }
 0x120   : > { %v805_v32 = vfloor.f32 %v789_v39  ;;  %v1006_v56 = vmul.u32 %v4784_v28, %v990_v5  ;;  %v1010_v34 = vsel %vm1008_vm6, %v1009_v16, %v4839_v53  ;;  %v7595_v22 = vand.u32 2147483647, %v4559_v12  ;;  %v7636_v12 = vld [vmem:[#allocation32_spill] sm:$0xff] }
 0x121   : > { %v4926_v60 = vor.u32 %v865_v0, %v864_v38  ;;  %v4928_v26 = vor.u32 %v868_v31, %v867_v14  ;;  %v872_v35 = vor.u32 %v871_v42, %v870_v40  ;;  %v2121_v41 = vshll.u32 %v7571_v54, %v4884_v27 }
 0x122   : > { %v854_v49 = vand.u32 8388607, %v7595_v22  ;;  %v2122_v62 = vshrl.u32 %v7579_v47, %v4909_v24  ;;  %v2124_v25 = vshll.u32 %v7579_v47, %v4884_v27  ;;  %v3968_v28 = vadd.s32 4294967169, %v2203_v44 }
 0x123   : > { %v2125_v53 = vshrl.u32 %v7580_v58, %v4909_v24  ;;  %v1289_v5 = vshll.u32 %v7571_v54, %v4894_v6  ;;  %v4942_v16 = vshll.u32 %v7579_v47, %v4894_v6  ;;  %v1011_v0 = vadd.s32 %v1010_v34, %v1006_v56 }
 0x124   : > { %v1290_v31 = vshrl.u32 %v7579_v47, %v4920_v33  ;;  %v3936_v42 = vadd.s32 4294967169, %v1371_v63  ;;  %vm879_vm7 = vcmp.lt.s32.totalorder %v4712_v50, 1  ;;  %vm881_vm9 = vcmp.lt.s32.totalorder %v4712_v50, 3 }
 0x125   : > { %v4950_v44 = vshrl.u32 %v7580_v58, %v4920_v33  ;;  %v855_v38 = vor.u32 8388608, %v854_v49  ;;  %v887_v14 = vsel %vm879_vm7, %v4926_v60, %v4928_v26  ;;  %v889_v56 = vsel %vm881_vm9, %v872_v35, %v4777_v29 }
 0x126   : > { %v4959_v40 = vor.u32 %v2122_v62, %v2121_v41  ;;  %v2209_v63 = vadd.s32 1, %v3968_v28  ;;  %v829_v34 = vsub.f32 %v797_v57, %v813_v19  ;;  %v821_v22 = vsub.f32 %v789_v39, %v805_v32 }
 0x127   : > { %v1012_v27 = vadd.s32 536870912, %v1011_v0  ;;  %vm880_vm11 = vcmp.lt.s32.totalorder %v4712_v50, 2  ;;  %v891_v49 = vsel %vm879_vm7, %v4928_v26, %v872_v35  ;;  %v893_v24 = vsel %vm881_vm9, %v4748_v13, %v4788_v52 }
 0x128   : > { %7596 = vst [vmem:[#allocation52_spill] sm:$0xff] %v4959_v40  ;;  %v2126_v51 = vor.u32 %v2125_v53, %v2124_v25  ;;  %vm2130_vm14 = vcmp.lt.s32.totalorder %v4888_v20, 4  ;;  %vm1298_vm15 = vcmp.lt.s32.totalorder %v4911_v3, 4  ;;  %v890_v29 = vsel %vm880_vm11, %v887_v14, %v889_v56 }
 0x129   : > { %v4973_v41 = vor.u32 %v1290_v31, %v1289_v5  ;;  %v1294_v32 = vor.u32 %v4950_v44, %v4942_v16  ;;  %v1377_v57 = vadd.s32 1, %v3936_v42  ;;  %v4977_v39 = vshll.u32 %v855_v38, 8 }
 0x12a   : > { %vm2210_vm0 = vcmp.gt.s32.totalorder %v2209_v63, 0  ;;  %v4979_v19 = vmul.f32 6.2831855, %v829_v34  ;;  %v4981_v13 = vmul.f32 6.2831855, %v821_v22  ;;  %v894_v25 = vsel %vm880_vm11, %v891_v49, %v893_v24 }
 0x12b   : > { %v4988_v52 = vsel %vm2130_vm14, %v4959_v40, 920167782  ;;  %v4990_v62 = vshrl.u32 %v1012_v27, 30  ;;  %v4993_v28 = vmul.u32.u64.low %v4977_v39, %v890_v29  ;;  %v4994_v53 = vmul.u32.u64.high %v4977_v39, %v890_v29, %v4993_v28 }
 0x12c   : > { %7597 = vst [vmem:[#allocation53_spill] sm:$0xff] %v4979_v19  ;;  %7598 = vst [vmem:[#allocation54_spill] sm:$0xff] %v4981_v13  ;;  %v7446_v5 = vand.u32 2147483647, %v4551_v55  ;;  %v1073_v16 = vshrl.u32 %v7592_v2, %v4627_v15  ;;  %v1076_v24 = vshrl.u32 %v7593_v11, %v4627_v15  ;;  %v1079_v31 = vshrl.u32 %v7571_v54, %v4627_v15 }
 0x12d   : > { %7599 = vst [vmem:[#allocation55_spill] sm:$0xff] %v4988_v52  ;;  %7600 = vst [vmem:[#allocation56_spill] sm:$0xff] %v4990_v62  ;;  %v2211_v42 = vsel %vm2210_vm0, %v2209_v63, 0  ;;  %vm1378_vm1 = vcmp.gt.s32.totalorder %v1377_v57, 0  ;;  %v5005_v27 = vmul.u32.u64.low %v4977_v39, %v894_v25  ;;  %v5006_v44 = vmul.u32.u64.high %v4977_v39, %v894_v25, %v5005_v27 }
 0x12e   : > { %7601 = vst [vmem:[#allocation57_spill] sm:$0xff] %v4993_v28  ;;  %v2306_v38 = vand.u32 2139095040, %v4979_v19  ;;  %v1072_v14 = vshll.u32 %v7586_v37, %v4606_v61  ;;  %v1075_v56 = vshll.u32 %v7592_v2, %v4606_v61  ;;  %v1078_v34 = vshll.u32 %v7593_v11, %v4606_v61 }
 0x12f   : > { %v5017_v22 = vsel %vm2130_vm14, %v2126_v51, 1326507024  ;;  %v1014_v63 = vshll.u32 %v4990_v62, 30  ;;  %v863_v49 = vshrl.u32 %v7586_v37, %v4688_v17  ;;  %v884_v29 = vsel %vm882_vm13, %v872_v35, 2102212464 }
 0x130   : > { %7602 = vst [vmem:[#allocation58_spill] sm:$0xff] %v5017_v22  ;;  %v1062_v25 = vand.u32 8388607, %v7446_v5  ;;  %v5026_v27 = vor.u32 %v1073_v16, %v1072_v14  ;;  %v5028_v19 = vor.u32 %v1076_v24, %v1075_v56  ;;  %v1080_v61 = vor.u32 %v1079_v31, %v1078_v34 }
 0x131   : > { %v5033_v51 = vsel %vm1298_vm15, %v4973_v41, 920167782  ;;  %v5035_v40 = vand.u32 31, %v2211_v42  ;;  %v1379_v17 = vsel %vm1378_vm1, %v1377_v57, 0  ;;  %v1474_v22 = vand.u32 2139095040, %v4981_v13 }
 0x132   : > { %v2307_v35 = vshrl.u32 %v2306_v38, 23  ;;  %v814_v52 = vfloor.f32 %v4890_v1  ;;  %v806_v16 = vfloor.f32 %v4892_v10  ;;  %v883_v24 = vsel %vm879_vm7, %v863_v49, %v4926_v60 }
 0x133   : > { %7603 = vst [vmem:[#allocation59_spill] sm:$0xff] %v5035_v40  ;;  %v5044_v31 = vsub.s32 %v1011_v0, %v1014_v63  ;;  %v885_v14 = vsel %vm881_vm9, %v4928_v26, %v884_v29  ;;  %vm1087_vm13 = vcmp.lt.s32.totalorder %v4666_v4, 1  ;;  %vm1089_vm3 = vcmp.lt.s32.totalorder %v4666_v4, 3 }
 0x134   : > { %v905_v57 = vadd.s32 1, %v4994_v53  ;;  %v1063_v38 = vor.u32 8388608, %v1062_v25  ;;  %v1095_v56 = vsel %vm1087_vm13, %v5026_v27, %v5028_v19  ;;  %v1097_v60 = vsel %vm1089_vm3, %v1080_v61, %v4708_v46 }
 0x135   : > { %v1475_v0 = vshrl.u32 %v1474_v22, 23  ;;  %vm904_vm6 = vc.u32 %v5006_v44, %v4993_v28  ;;  %v1099_v26 = vsel %vm1087_vm13, %v5028_v19, %v1080_v61  ;;  %v1101_v34 = vsel %vm1089_vm3, %v4674_v7, %v4716_v18 }
 0x136   : > { %v5070_v63 = vsel %vm1298_vm15, %v1294_v32, 1326507024  ;;  %v5072_v49 = vand.u32 31, %v1379_v17  ;;  %v886_v46 = vsel %vm880_vm11, %v883_v24, %v885_v14  ;;  %vm1088_vm7 = vcmp.lt.s32.totalorder %v4666_v4, 2 }
 0x137   : > { %v5078_v22 = vsub.s32 32, %v5035_v40  ;;  %v3972_v29 = vadd.s32 4294967169, %v2307_v35  ;;  %v830_v25 = vsub.f32 %v4890_v1, %v814_v52  ;;  %v1098_v7 = vsel %vm1088_vm7, %v1095_v56, %v1097_v60 }
 0x138   : > { %7604 = vst [vmem:[#allocation60_spill] sm:$0xff] %v5072_v49  ;;  %v1017_v18 = vsub.s32 0, %v5044_v31  ;;  %v906_v32 = vsel %vm904_vm6, %v905_v57, %v4994_v53  ;;  %v1102_v5 = vsel %vm1088_vm7, %v1099_v26, %v1101_v34  ;;  %v5087_v50 = vshll.u32 %v1063_v38, 8 }
 0x139   : > { %7605 = vst [vmem:[#allocation61_spill] sm:$0xff] %v5078_v22  ;;  %v5089_v24 = vshrl.u32 %v2211_v42, 5  ;;  %v3940_v14 = vadd.s32 4294967169, %v1475_v0  ;;  %v822_v13 = vsub.f32 %v4892_v10, %v806_v16  ;;  %v902_v35 = vmul.u32 %v4977_v39, %v886_v46 }
 0x13a   : > { %v5093_v1 = vshrl.u32 %v1379_v17, 5  ;;  %v5096_v52 = vsub.s32 32, %v5072_v49  ;;  %v5099_v56 = vmul.u32.u64.low %v5087_v50, %v1098_v7  ;;  %v5100_v53 = vmul.u32.u64.high %v5087_v50, %v1098_v7, %v5099_v56 }
 0x13b   : > { %7606 = vst [vmem:[#allocation62_spill] sm:$0xff] %v5089_v24  ;;  %v2313_v57 = vadd.s32 1, %v3972_v29  ;;  %v5103_v38 = vadd.s32 %v906_v32, %v902_v35  ;;  %v5106_v42 = vmul.u32.u64.low %v5087_v50, %v1102_v5  ;;  %v5107_v60 = vmul.u32.u64.high %v5087_v50, %v1102_v5, %v5106_v42 }
 0x13c   : > { %7607 = vst [vmem:[#allocation63_spill] sm:$0xff] %v5093_v1  ;;  %7608 = vst [vmem:[#allocation64_spill] sm:$0xff] %v5096_v52  ;;  %v2226_v10 = vshrl.u32 %v7579_v47, %v5078_v22  ;;  %v2229_v39 = vshrl.u32 %v7580_v58, %v5078_v22  ;;  %v5113_v17 = vmul.f32 6.2831855, %v830_v25  ;;  %v3921_v16 = vmin.u32 %v1017_v18, %v5044_v31 }
 0x13d   : > { %7609 = vst [vmem:[#allocation65_spill] sm:$0xff] %v5099_v56  ;;  %7610 = vst [vmem:[#allocation66_spill] sm:$0xff] %v5107_v60  ;;  %v2225_v0 = vshll.u32 %v7571_v54, %v5035_v40  ;;  %v2228_v26 = vshll.u32 %v7579_v47, %v5035_v40  ;;  %v1481_v34 = vadd.s32 1, %v3940_v14  ;;  %v5120_v46 = vmul.f32 6.2831855, %v822_v13 }
 0x13e   : > { %7611 = vst [vmem:[#allocation67_spill] sm:$0xff] %v5113_v17  ;;  %v1393_v5 = vshll.u32 %v7571_v54, %v5072_v49  ;;  %v1394_v29 = vshrl.u32 %v7579_v47, %v5096_v52  ;;  %v1397_v25 = vshrl.u32 %v7580_v58, %v5096_v52  ;;  %v1092_v7 = vsel %vm1090_vm10, %v1080_v61, 2102212464 }
 0x13f   : > { %7612 = vst [vmem:[#allocation68_spill] sm:$0xff] %v5120_v46  ;;  %v1396_v18 = vshll.u32 %v7579_v47, %v5072_v49  ;;  %vm2314_vm9 = vcmp.gt.s32.totalorder %v2313_v57, 0  ;;  %v908_v32 = vadd.s32 536870912, %v5103_v38  ;;  %v1071_v13 = vshrl.u32 %v7586_v37, %v4627_v15 }
 0x140   : > { %v5135_v14 = vor.u32 %v2226_v10, %v2225_v0  ;;  %v2230_v35 = vor.u32 %v2229_v39, %v2228_v26  ;;  %v2410_v42 = vand.u32 2139095040, %v5113_v17  ;;  %v1019_v40 = vclz %v3921_v16 }
 0x141   : > { %vm1482_vm11 = vcmp.gt.s32.totalorder %v1481_v34, 0  ;;  %v1578_v22 = vand.u32 2139095040, %v5120_v46  ;;  %v1091_v61 = vsel %vm1087_vm13, %v1071_v13, %v5026_v27  ;;  %v1093_v49 = vsel %vm1089_vm3, %v5028_v19, %v1092_v7 }
 0x142   : > { %7613 = vst [vmem:[#allocation69_spill] sm:$0xff] %v5135_v14  ;;  %v5145_v52 = vor.u32 %v1394_v29, %v1393_v5  ;;  %v1398_v15 = vor.u32 %v1397_v25, %v1396_v18  ;;  %v2315_v10 = vsel %vm2314_vm9, %v2313_v57, 0  ;;  %v1113_v39 = vadd.s32 1, %v5100_v53 }
 0x143   : > { %vm7500_vm10 = vcmp.lt.s32.totalorder %v5089_v24, 4  ;;  %vm7519_vm0 = vcmp.lt.s32.totalorder %v5093_v1, 4  ;;  %v5150_v16 = vshrl.u32 %v908_v32, 30  ;;  %vm1112_vm1 = vc.u32 %v5107_v60, %v5099_v56 }
 0x144   : > { %7614 = vst [vmem:[#allocation70_spill] sm:$0xff] %v5145_v52  ;;  %v5157_v27 = vsel %vm7500_vm10, %v5135_v14, 920167782  ;;  %v1483_v19 = vsel %vm1482_vm11, %v1481_v34, 0  ;;  %v3922_v0 = vadd.s32 4294967294, %v1019_v40  ;;  %v1094_v57 = vsel %vm1088_vm7, %v1091_v61, %v1093_v49 }
 0x145   : > { %7615 = vst [vmem:[#allocation71_spill] sm:$0xff] %v5150_v16  ;;  %7616 = vst [vmem:[#allocation72_spill] sm:$0xff] %v5157_v27  ;;  %v5163_v26 = vsel %vm7500_vm10, %v2230_v35, 1326507024  ;;  %v5165_v5 = vand.u32 31, %v2315_v10  ;;  %v2411_v29 = vshrl.u32 %v2410_v42, 23  ;;  %v1114_v4 = vsel %vm1112_vm1, %v1113_v39, %v5100_v53 }
 0x146   : > { %7617 = vst [vmem:[#allocation73_spill] sm:$0xff] %v5163_v26  ;;  %v1579_v25 = vshrl.u32 %v1578_v22, 23  ;;  %v5170_v7 = vsel %vm7519_vm0, %v5145_v52, 920167782  ;;  %v5174_v34 = vsel %vm7519_vm0, %v1398_v15, 1326507024  ;;  %v1110_v22 = vmul.u32 %v5087_v50, %v1094_v57 }
 0x147   : > { %7618 = vst [vmem:[#allocation74_spill] sm:$0xff] %v5165_v5  ;;  %7619 = vst [vmem:[#allocation75_spill] sm:$0xff] %v5170_v7  ;;  %v5176_v40 = vshrl.u32 %v2315_v10, 5  ;;  %v5179_v49 = vshrl.u32 %v1483_v19, 5  ;;  %v5181_v18 = vand.u32 31, %v1483_v19  ;;  %v910_v32 = vshll.u32 %v5150_v16, 30 }
 0x148   : > { %7620 = vst [vmem:[#allocation76_spill] sm:$0xff] %v5174_v34  ;;  %vm3923_vm13 = vcmp.lt.s32.totalorder %v3922_v0, 0  ;;  %v1180_v35 = vshrl.u32 %v7593_v11, %v4677_v8  ;;  %v1183_v42 = vshrl.u32 %v7571_v54, %v4677_v8  ;;  %v5191_v61 = vsub.s32 32, %v5165_v5  ;;  %v7632_v7 = vld [vmem:[#allocation11_spill] sm:$0xff] }
 0x149   : > { %7621 = vst [vmem:[#allocation77_spill] sm:$0xff] %v5176_v40  ;;  %7622 = vst [vmem:[#allocation78_spill] sm:$0xff] %v5179_v49  ;;  %v3976_v53 = vadd.s32 4294967169, %v2411_v29  ;;  %v3944_v15 = vadd.s32 4294967169, %v1579_v25  ;;  %v1115_v10 = vadd.s32 %v1114_v4, %v1110_v22  ;;  %v2329_v39 = vshll.u32 %v7571_v54, %v5165_v5 }
 0x14a   : > { %7623 = vst [vmem:[#allocation79_spill] sm:$0xff] %v5181_v18  ;;  %7624 = vst [vmem:[#allocation80_spill] sm:$0xff] %v5191_v61  ;;  %v1177_v50 = vshrl.u32 %v7592_v2, %v4677_v8  ;;  %v1179_v19 = vshll.u32 %v7592_v2, %v4652_v48  ;;  %v1182_v57 = vshll.u32 %v7593_v11, %v4652_v48  ;;  %v5206_v29 = vsub.s32 32, %v5181_v18 }
 0x14b   : > { %v5203_v13 = vshll.u32 %v7579_v47, %v5165_v5  ;;  %v5208_v25 = vsel %vm3923_vm13, 0, %v3922_v0  ;;  %v5211_v4 = vsub.s32 %v5103_v38, %v910_v32  ;;  %v7627_v22 = vand.u32 2147483647, %v4557_v9 }
 0x14c   : > { %7625 = vst [vmem:[#allocation81_spill] sm:$0xff] %v5206_v29  ;;  %v1176_v46 = vshll.u32 %v7586_v37, %v4652_v48  ;;  %v5217_v14 = vor.u32 %v1180_v35, %v1179_v19  ;;  %v1184_v26 = vor.u32 %v1183_v42, %v1182_v57  ;;  %v2330_v5 = vshrl.u32 %v7579_v47, %v5191_v61 }
 0x14d   : > { %7626 = vst [vmem:[#allocation82_spill] sm:$0xff] %v5211_v4  ;;  %v1166_v17 = vand.u32 8388607, %v7627_v22  ;;  %v5223_v27 = vshrl.u32 %v7580_v58, %v5191_v61  ;;  %v5227_v38 = vshll.u32 %v7571_v54, %v5181_v18  ;;  %v1116_v0 = vadd.s32 536870912, %v1115_v10 }
 0x14e   : > { %v5231_v32 = vshll.u32 %v7579_v47, %v5181_v18  ;;  %v5233_v48 = vadd.s32 1, %v3976_v53  ;;  %v5235_v35 = vadd.s32 1, %v3944_v15  ;;  %v5237_v42 = vor.u32 %v1177_v50, %v1176_v46  ;;  %v7628_v46 = vld [vmem:[#allocation33_spill] sm:$0xff] }
 0x14f   : > { %v5241_v19 = vshrl.u32 %v7579_v47, %v5206_v29  ;;  %v1027_v57 = vsub.s32 4294967266, %v5208_v25  ;;  %vm1191_vm3 = vcmp.lt.s32.totalorder %v4697_v36, 1  ;;  %vm1193_vm6 = vcmp.lt.s32.totalorder %v4697_v36, 3 }
 0x150   : > { %v913_v22 = vsub.s32 0, %v5211_v4  ;;  %v1167_v61 = vor.u32 8388608, %v1166_v17  ;;  %v1203_v53 = vsel %vm1191_vm3, %v5217_v14, %v1184_v26  ;;  %v1205_v15 = vsel %vm1193_vm6, %v7628_v46, %v4772_v43 }
 0x151   : > { %v5254_v50 = vor.u32 %v2330_v5, %v2329_v39  ;;  %v5260_v24 = vshrl.u32 %v7580_v58, %v5206_v29  ;;  %v5262_v52 = vshrl.u32 %v1116_v0, 30  ;;  %v1007_v17 = vadd.s32 %v4838_v59, %v4848_v21  ;;  %v7631_v5 = vld [vmem:[#allocation36_spill] sm:$0xff]  ;;  %v7634_v0 = vld [vmem:[#allocation17_spill] sm:$0xff] }
 0x152   : > { %vm1192_vm7 = vcmp.lt.s32.totalorder %v4697_v36, 2  ;;  %v1199_v43 = vsel %vm1191_vm3, %v5237_v42, %v5217_v14  ;;  %v1201_v39 = vsel %vm1193_vm6, %v1184_v26, %v7631_v5  ;;  %v1023_v46 = vsub.s32 32, %v5208_v25 }
 0x153   : > { %7629 = vst [vmem:[#allocation33_spill] sm:$0xff] %v5254_v50  ;;  %7630 = vst [vmem:[#allocation83_spill] sm:$0xff] %v5262_v52  ;;  %v5277_v18 = vadd.s32 127, %v1027_v57  ;;  %v1206_v59 = vsel %vm1192_vm7, %v1203_v53, %v1205_v15  ;;  %v5282_v21 = vmin.u32 %v913_v22, %v5211_v4  ;;  %v1175_v29 = vshrl.u32 %v7586_v37, %v4677_v8  ;;  %v7635_v53 = vld [vmem:[#allocation18_spill] sm:$0xff] }
 0x154   : > { %v5286_v34 = vshll.u32 %v1167_v61, 8  ;;  %v7633_v5 = vand.u32 2147483647, %v7632_v7  ;;  %v1118_v20 = vshll.u32 %v5262_v52, 30  ;;  %v1202_v57 = vsel %vm1192_vm7, %v1199_v43, %v1201_v39 }
 0x155   : > { %v1800_v23 = vshll.u32 %v7586_v37, %v7634_v0  ;;  %v1801_v22 = vshrl.u32 %v7592_v2, %v7635_v53  ;;  %v1803_v8 = vshll.u32 %v7592_v2, %v7634_v0  ;;  %v1804_v61 = vshrl.u32 %v7593_v11, %v7635_v53 }
 0x156   : > { %v1790_v1 = vand.u32 8388607, %v7633_v5  ;;  %v5298_v15 = vmul.u32.u64.low %v5286_v34, %v1206_v59  ;;  %v5299_v45 = vmul.u32.u64.high %v5286_v34, %v1206_v59, %v5298_v15  ;;  %v1196_v5 = vsel %vm1194_vm12, %v1184_v26, 2102212464  ;;  %v7637_v26 = vld [vmem:[#allocation22_spill] sm:$0xff] }
 0x157   : > { %v1802_v43 = vor.u32 %v1801_v22, %v1800_v23  ;;  %v1806_v39 = vshll.u32 %v7593_v11, %v7634_v0  ;;  %v1807_v7 = vshrl.u32 %v7571_v54, %v7635_v53  ;;  %v1805_v9 = vor.u32 %v1804_v61, %v1803_v8  ;;  %v7639_v61 = vld [vmem:[#allocation26_spill] sm:$0xff] }
 0x158   : > { %v5312_v30 = vmul.u32.u64.low %v5286_v34, %v1202_v57  ;;  %v5313_v59 = vmul.u32.u64.high %v5286_v34, %v1202_v57, %v5312_v30  ;;  %v1791_v15 = vor.u32 8388608, %v1790_v1  ;;  %v5316_v55 = vsub.s32 %v1115_v10, %v1118_v20  ;;  %v7638_v10 = vld [vmem:[#allocation25_spill] sm:$0xff] }
 0x159   : > { %v1808_v16 = vor.u32 %v1807_v7, %v1806_v39  ;;  %vm1815_vm12 = vcmp.lt.s32.totalorder %v7637_v26, 1  ;;  %v1280_v23 = vshll.u32 %v7586_v37, %v4894_v6  ;;  %v1281_v0 = vshrl.u32 %v7592_v2, %v4920_v33  ;;  %v7640_v39 = vld [vmem:[#allocation23_spill] sm:$0xff] }
 0x15a   : > { %vm1817_vm9 = vcmp.lt.s32.totalorder %v7637_v26, 3  ;;  %v1823_v57 = vsel %vm1815_vm12, %v1802_v43, %v1805_v9  ;;  %v1283_v20 = vshll.u32 %v7592_v2, %v4894_v6  ;;  %v1284_v1 = vshrl.u32 %v7593_v11, %v4920_v33 }
 0x15b   : > { %v1287_v7 = vshrl.u32 %v7571_v54, %v4920_v33  ;;  %v1825_v22 = vsel %vm1817_vm9, %v1808_v16, %v7638_v10  ;;  %vm1816_vm11 = vcmp.lt.s32.totalorder %v7637_v26, 2  ;;  %v1827_v8 = vsel %vm1815_vm12, %v1805_v9, %v1808_v16 }
 0x15c   : > { %v1829_v52 = vsel %vm1817_vm9, %v7640_v39, %v7639_v61  ;;  %v1831_v2 = vshll.u32 %v1791_v15, 8  ;;  %v1286_v56 = vshll.u32 %v7593_v11, %v4894_v6  ;;  %v1820_v60 = vsel %vm1818_vm5, %v1808_v16, 2102212464 }
 0x15d   : > { %v1826_v10 = vsel %vm1816_vm11, %v1823_v57, %v1825_v22  ;;  %v1830_v4 = vsel %vm1816_vm11, %v1827_v8, %v1829_v52  ;;  %v1121_v58 = vsub.s32 0, %v5316_v55  ;;  %v1799_v62 = vshrl.u32 %v7586_v37, %v7635_v53 }
 0x15e   : > { %v5354_v28 = vmul.u32.u64.low %v1831_v2, %v1830_v4  ;;  %v5355_v61 = vmul.u32.u64.high %v1831_v2, %v1830_v4, %v5354_v28  ;;  %v7641_v15 = vand.u32 2147483647, %v7636_v12  ;;  %v5359_v39 = vor.u32 %v1281_v0, %v1280_v23 }
 0x15f   : > { %v5361_v16 = vor.u32 %v1284_v1, %v1283_v20  ;;  %v1288_v11 = vor.u32 %v1287_v7, %v1286_v56  ;;  %v1819_v57 = vsel %vm1815_vm12, %v1799_v62, %v1802_v43  ;;  %v1821_v52 = vsel %vm1817_vm9, %v1805_v9, %v1820_v60 }
 0x160   : > { %v1270_v6 = vand.u32 8388607, %v7641_v15  ;;  %v5367_v22 = vmul.u32.u64.low %v1831_v2, %v1826_v10  ;;  %v5368_v8 = vmul.u32.u64.high %v1831_v2, %v1826_v10, %v5367_v22  ;;  %v1025_v4 = vshrl.u32 %v1007_v17, %v1023_v46 }
 0x161   : > { %v1029_v28 = vshll.u32 %v5277_v18, 23  ;;  %v915_v53 = vclz %v5282_v21  ;;  %v1195_v23 = vsel %vm1191_vm3, %v1175_v29, %v5237_v42  ;;  %v3925_v56 = vmin.u32 %v1121_v58, %v5316_v55 }
 0x162   : > { %v1197_v62 = vsel %vm1193_vm6, %v5217_v14, %v1196_v5  ;;  %vm1295_vm5 = vcmp.lt.s32.totalorder %v4911_v3, 1  ;;  %vm1297_vm1 = vcmp.lt.s32.totalorder %v4911_v3, 3  ;;  %v1271_v9 = vor.u32 8388608, %v1270_v6 }
 0x163   : > { %v1303_v60 = vsel %vm1295_vm5, %v5359_v39, %v5361_v16  ;;  %v1305_v18 = vsel %vm1297_vm1, %v1288_v11, %v5033_v51  ;;  %v1822_v58 = vsel %vm1816_vm11, %v1819_v57, %v1821_v52  ;;  %vm7517_vm13 = vcmp.lt.s32.totalorder %v5176_v40, 4 }
 0x164   : > { %v1307_v14 = vsel %vm1295_vm5, %v5361_v16, %v1288_v11  ;;  %v1309_v29 = vsel %vm1297_vm1, %v4973_v41, %v5070_v63  ;;  %vm1840_vm3 = vc.u32 %v5355_v61, %v5367_v22  ;;  %v1841_v42 = vadd.s32 1, %v5368_v8 }
 0x165   : > { %v1030_v51 = vor.u32 4788187, %v1029_v28  ;;  %v3918_v17 = vadd.s32 4294967294, %v915_v53  ;;  %v1217_v46 = vadd.s32 1, %v5313_v59  ;;  %vm1296_vm6 = vcmp.lt.s32.totalorder %v4911_v3, 2  ;;  %v7659_v3 = vld [vmem:[#allocation57_spill] sm:$0xff] }
 0x166   : > { %vm7518_vm12 = vcmp.lt.s32.totalorder %v5179_v49, 4  ;;  %vm1216_vm9 = vc.u32 %v5299_v45, %v5312_v30  ;;  %v1306_v21 = vsel %vm1296_vm6, %v1303_v60, %v1305_v18  ;;  %v1838_v41 = vmul.u32 %v1831_v2, %v1822_v58  ;;  %v7677_v58 = vld [vmem:[#allocation83_spill] sm:$0xff] }
 0x167   : > { %v1842_v63 = vsel %vm1840_vm3, %v1841_v42, %v5368_v8  ;;  %v1123_v5 = vclz %v3925_v56  ;;  %v1198_v43 = vsel %vm1192_vm7, %v1195_v23, %v1197_v62  ;;  %v1310_v26 = vsel %vm1296_vm6, %v1307_v14, %v1309_v29 }
 0x168   : > { %v5414_v0 = vshll.u32 %v1271_v9, 8  ;;  %vm2418_vm11 = vcmp.gt.s32.totalorder %v5233_v48, 0  ;;  %vm1586_vm10 = vcmp.gt.s32.totalorder %v5235_v35, 0  ;;  %v7642_v20 = vshll.u32 %v5044_v31, %v5208_v25 }
 0x169   : > { %v1843_v2 = vadd.s32 %v1842_v63, %v1838_v41  ;;  %v1031_v7 = vand.u32 2147483647, %v1030_v51  ;;  %v1218_v10 = vsel %vm1216_vm9, %v1217_v46, %v5313_v59  ;;  %v1214_v6 = vmul.u32 %v5286_v34, %v1198_v43 }
 0x16a   : > { %v1026_v1 = vor.u32 %v1025_v4, %v7642_v20  ;;  %v5423_v36 = vmul.u32.u64.low %v5414_v0, %v1306_v21  ;;  %v5424_v15 = vmul.u32.u64.high %v5414_v0, %v1306_v21, %v5423_v36  ;;  %v5434_v31 = vor.u32 %v5241_v19, %v5227_v38  ;;  %v7647_v19 = vld [vmem:[#allocation12_spill] sm:$0xff] }
 0x16b   : > { %v5429_v57 = vmul.u32.u64.low %v5414_v0, %v1310_v26  ;;  %v5430_v52 = vmul.u32.u64.high %v5414_v0, %v1310_v26, %v5429_v57  ;;  %v1844_v8 = vadd.s32 536870912, %v1843_v2  ;;  %v2419_v25 = vsel %vm2418_vm11, %v5233_v48, 0 }
 0x16c   : > { %7643 = vst [vmem:[#allocation36_spill] sm:$0xff] %v5434_v31  ;;  %vm3919_vm7 = vcmp.lt.s32.totalorder %v3918_v17, 0  ;;  %v3926_v59 = vadd.s32 4294967294, %v1123_v5  ;;  %v1587_v4 = vsel %vm1586_vm10, %v5235_v35, 0  ;;  %v1033_v28 = vcvt.s32.f32 %v1026_v1 }
 0x16d   : > { %v5438_v53 = vadd.s32 %v1218_v10, %v1214_v6  ;;  %v5440_v23 = vshrl.u32 %v1844_v8, 30  ;;  %v5445_v34 = vsel %vm7517_vm13, %v5254_v50, 920167782  ;;  %v7645_v38 = vor.u32 %v5223_v27, %v5203_v13 }
 0x16e   : > { %7644 = vst [vmem:[#allocation17_spill] sm:$0xff] %v5445_v34  ;;  %v1502_v35 = vor.u32 %v5260_v24, %v5231_v32  ;;  %vm953_vm10 = vcmp.lt.s32.totalorder %v7647_v19, 0  ;;  %v1300_v56 = vsel %vm1298_vm15, %v1288_v11, 2102212464  ;;  %v1034_v62 = vmul.f32 %v1033_v28, %v1031_v7 }
 0x16f   : > { %v5452_v48 = vsel %vm7517_vm13, %v7645_v38, 1326507024  ;;  %v918_v9 = vsel %vm3919_vm7, 0, %v3918_v17  ;;  %v1279_v60 = vshrl.u32 %v7586_v37, %v4920_v33  ;;  %v1846_v18 = vshll.u32 %v5440_v23, 30  ;;  %v7660_v38 = vld [vmem:[#allocation56_spill] sm:$0xff] }
 0x170   : > { %7646 = vst [vmem:[#allocation18_spill] sm:$0xff] %v5452_v48  ;;  %v5465_v27 = vsel %vm7518_vm12, %v5434_v31, 920167782  ;;  %v5467_v13 = vshrl.u32 %v2419_v25, 5  ;;  %v5469_v24 = vand.u32 31, %v2419_v25  ;;  %vm3927_vm3 = vcmp.lt.s32.totalorder %v3926_v59, 0 }
 0x171   : > { %7648 = vst [vmem:[#allocation32_spill] sm:$0xff] %v5465_v27  ;;  %v5471_v32 = vand.u32 31, %v1587_v4  ;;  %v7652_v11 = vand.u32 2147483647, %v7647_v19  ;;  %v1220_v33 = vadd.s32 536870912, %v5438_v53  ;;  %v1299_v14 = vsel %vm1295_vm5, %v1279_v60, %v5359_v39  ;;  %v7661_v60 = vld [vmem:[#allocation13_spill] sm:$0xff] }
 0x172   : > { %7649 = vst [vmem:[#allocation22_spill] sm:$0xff] %v5467_v13  ;;  %7650 = vst [vmem:[#allocation25_spill] sm:$0xff] %v5469_v24  ;;  %v1301_v29 = vsel %vm1297_vm1, %v5361_v16, %v1300_v56  ;;  %v5488_v42 = vsel %vm7518_vm12, %v1502_v35, 1326507024  ;;  %v5490_v51 = vshrl.u32 %v1587_v4, 5  ;;  %v923_v17 = vsub.s32 4294967266, %v918_v9 }
 0x173   : > { %7651 = vst [vmem:[#allocation26_spill] sm:$0xff] %v5471_v32  ;;  %vm5475_vm15 = vcmp.le.f32.partialorder %v7652_v11, 0.7853982  ;;  %7655 = vst [vmem:[#allocation23_spill] sm:$0xff] %v5488_v42  ;;  %v1321_v46 = vadd.s32 1, %v5424_v15  ;;  %v1035_v21 = vxor.u32 2147483648, %v1034_v62  ;;  %vm1320_vm9 = vc.u32 %v5430_v52, %v5423_v36 }
 0x174   : > { %7656 = vst [vmem:[#allocation12_spill] sm:$0xff] %v5490_v51  ;;  %v1126_v41 = vsel %vm3927_vm3, 0, %v3926_v59  ;;  %v5495_v63 = vsub.s32 %v1843_v2, %v1846_v18  ;;  %v5498_v39 = vsub.s32 32, %v5469_v24  ;;  %v5502_v16 = vshll.u32 %v7571_v54, %v5469_v24 }
 0x175   : > { %v919_v5 = vsub.s32 32, %v918_v9  ;;  %v1302_v43 = vsel %vm1296_vm6, %v1299_v14, %v1301_v29  ;;  %v5508_v26 = vshll.u32 %v7579_v47, %v5469_v24  ;;  %v5511_v20 = vsub.s32 32, %v5471_v32  ;;  %v7663_v29 = vld [vmem:[#allocation82_spill] sm:$0xff] }
 0x176   : > { %7657 = vst [vmem:[#allocation84_spill] sm:$0xff] %v5498_v39  ;;  %v5515_v1 = vshll.u32 %v7571_v54, %v5471_v32  ;;  %v5517_v2 = vshrl.u32 %v1220_v33, 30  ;;  %v5521_v7 = vshll.u32 %v7579_v47, %v5471_v32  ;;  %v903_v10 = vadd.s32 %v7659_v3, %v5006_v44  ;;  %v7666_v44 = vld [vmem:[#allocation24_spill] sm:$0xff] }
 0x177   : > { %7658 = vst [vmem:[#allocation85_spill] sm:$0xff] %v5511_v20  ;;  %v1131_v6 = vsub.s32 4294967266, %v1126_v41  ;;  %v1322_v57 = vsel %vm1320_vm9, %v1321_v46, %v5424_v15  ;;  %v1036_v8 = vsel %vm953_vm10, %v1035_v21, %v1034_v62  ;;  %v924_v25 = vadd.s32 127, %v923_v17 }
 0x178   : > { %v1318_v59 = vmul.u32 %v5414_v0, %v1302_v43  ;;  %v1849_v4 = vsub.s32 0, %v5495_v63  ;;  %v5532_v28 = vshrl.u32 %v7579_v47, %v5498_v39  ;;  %v1037_v35 = vsub.s32 4, %v7660_v38  ;;  %v7665_v43 = vld [vmem:[#allocation65_spill] sm:$0xff] }
 0x179   : > { %v921_v56 = vshrl.u32 %v903_v10, %v919_v5  ;;  %v7662_v18 = vmov 1326507024   ;;  %v1127_v11 = vsub.s32 32, %v1126_v41  ;;  %v1222_v62 = vshll.u32 %v5517_v2, 30  ;;  %v7664_v5 = vld [vmem:[#allocation66_spill] sm:$0xff] }
 0x17a   : > { %v5538_v15 = vshrl.u32 %v7662_v18, %v5498_v39  ;;  %v5541_v33 = vadd.s32 %v1322_v57, %v1318_v59  ;;  %v5545_v0 = vshrl.u32 %v7579_v47, %v5511_v20  ;;  %v1039_v14 = vsel %vm5475_vm15, %v7647_v19, %v1036_v8 }
 0x17b   : > { %v920_v17 = vshll.u32 %v7663_v29, %v918_v9  ;;  %v1132_v46 = vadd.s32 127, %v1131_v6  ;;  %v925_v21 = vshll.u32 %v924_v25, 23  ;;  %v1111_v3 = vadd.s32 %v7665_v43, %v7664_v5  ;;  %v7669_v9 = vld [vmem:[#allocation21_spill] sm:$0xff] }
 0x17c   : > { %v3953_v10 = vmin.u32 %v1849_v4, %v5495_v63  ;;  %v7667_v57 = vmov 2475754826   ;;  %v5559_v47 = vsel %vm953_vm10, %v1037_v35, %v7660_v38  ;;  %v7668_v8 = vand.u32 2147483647, %v7661_v60 }
 0x17d   : > { %v1905_v59 = vshrl.u32 %v7667_v57, %v7666_v44  ;;  %v922_v24 = vor.u32 %v921_v56, %v920_v17  ;;  %v1904_v6 = vshll.u32 %v7586_v37, %v7669_v9  ;;  %4103 = vcosq.f32 %v1039_v14 }
 0x17e   : > { %v1894_v39 = vand.u32 8388607, %v7668_v8  ;;  %v1129_v25 = vshrl.u32 %v1111_v3, %v1127_v11  ;;  %v5566_v29 = vsub.s32 %v5438_v53, %v1222_v62  ;;  %v1324_v4 = vadd.s32 536870912, %v5541_v33 }
 0x17f   : > { %v1133_v5 = vshll.u32 %v1132_v46, 23  ;;  %v1906_v43 = vor.u32 %v1905_v59, %v1904_v6  ;;  %v1907_v38 = vshll.u32 %v7667_v57, %v7669_v9  ;;  %v7670_v35 = vmov 2131351028   ;;  %v7671_v6 = vld [vmem:[#allocation27_spill] sm:$0xff] }
 0x180   : > { %v1908_v56 = vshrl.u32 %v7670_v35, %v7666_v44  ;;  %4105 = vsinq.f32 %v1039_v14  ;;  %v926_v17 = vor.u32 4788187, %v925_v21  ;;  %v1128_v8 = vshll.u32 %v5316_v55, %v1126_v41 }
 0x181   : > { %v1851_v32 = vclz %v3953_v10  ;;  %v1895_v34 = vor.u32 8388608, %v1894_v39  ;;  %v1910_v53 = vshll.u32 %v7670_v35, %v7669_v9  ;;  %v1911_v62 = vshrl.u32 %v7571_v54, %v7666_v44  ;;  %v7672_v10 = vld [vmem:[#allocation30_spill] sm:$0xff]  ;;  %v7673_v9 = vld [vmem:[#allocation28_spill] sm:$0xff] }
 0x182   : > { %v1909_v11 = vor.u32 %v1908_v56, %v1907_v38  ;;  %v1130_v46 = vor.u32 %v1129_v25, %v1128_v8  ;;  %v1225_v3 = vsub.s32 0, %v5566_v29  ;;  %v5579_v59 = vshrl.u32 %v1324_v4, 30  ;;  %v7674_v38 = vld [vmem:[#allocation29_spill] sm:$0xff] }
 0x183   : > { %vm1919_vm5 = vcmp.lt.s32.totalorder %v7671_v6, 1  ;;  %v1134_v14 = vor.u32 4788187, %v1133_v5  ;;  %v1912_v21 = vor.u32 %v1911_v62, %v1910_v53  ;;  %vm1921_vm1 = vcmp.lt.s32.totalorder %v7671_v6, 3 }
 0x184   : > { %v1927_v55 = vsel %vm1919_vm5, %v1906_v43, %v1909_v11  ;;  %v3954_v41 = vadd.s32 4294967294, %v1851_v32  ;;  %v1903_v39 = vshrl.u32 %v7586_v37, %v7666_v44  ;;  %vm1920_vm6 = vcmp.lt.s32.totalorder %v7671_v6, 2 }
 0x185   : > { %v1933_v25 = vsel %vm1921_vm1, %v7673_v9, %v7672_v10  ;;  %v1924_v4 = vsel %vm1922_vm8, %v1912_v21, 2102212464  ;;  %v1929_v5 = vsel %vm1921_vm1, %v1912_v21, %v7674_v38  ;;  %v1931_v56 = vsel %vm1919_vm5, %v1909_v11, %v1912_v21 }
 0x186   : > { %v1935_v8 = vshll.u32 %v1895_v34, 8  ;;  %v3929_v53 = vmin.u32 %v1225_v3, %v5566_v29  ;;  %v1326_v32 = vshll.u32 %v5579_v59, 30  ;;  %v1930_v44 = vsel %vm1920_vm6, %v1927_v55, %v1929_v5 }
 0x187   : > { %v1934_v62 = vsel %vm1920_vm6, %v1931_v56, %v1933_v25  ;;  %v1923_v10 = vsel %vm1919_vm5, %v1903_v39, %v1906_v43  ;;  %v1925_v9 = vsel %vm1921_vm1, %v1909_v11, %v1924_v4  ;;  %vm7515_vm8 = vcmp.lt.s32.totalorder %v5467_v13, 4  ;;  %v7676_v4 = vld [vmem:[#allocation71_spill] sm:$0xff]  ;;  %v7690_v13 = vld [vmem:[#allocation38_spill] sm:$0xff] }
 0x188   : > { %v5603_v50 = vmul.u32.u64.low %v1935_v8, %v1934_v62  ;;  %v5604_v38 = vmul.u32.u64.high %v1935_v8, %v1934_v62, %v5603_v50  ;;  %v927_v34 = vand.u32 2147483647, %v926_v17  ;;  %v1135_v21 = vand.u32 2147483647, %v1134_v14 }
 0x189   : > { %v5607_v3 = vmul.u32.u64.low %v1935_v8, %v1930_v44  ;;  %v5608_v48 = vmul.u32.u64.high %v1935_v8, %v1930_v44, %v5607_v3  ;;  %v5613_v55 = vshrl.u32 %v7662_v18, %v5511_v20  ;;  %v1040_v43 = vsel %vm5475_vm15, 0, %v5559_v47 }
 0x18a   : > { %v929_v11 = vcvt.s32.f32 %v922_v24  ;;  %vm3955_vm11 = vcmp.lt.s32.totalorder %v3954_v41, 0  ;;  %v1137_v39 = vcvt.s32.f32 %v1130_v46  ;;  %v1227_v50 = vclz %v3929_v53  ;;  %v5623_v14 = vpop.eup %4103 }
 0x18b   : > { %v5619_v25 = vsub.s32 %v5541_v33, %v1326_v32  ;;  %v1926_v17 = vsel %vm1920_vm6, %v1923_v10, %v1925_v9  ;;  %v5627_v18 = vor.u32 %v5532_v28, %v5502_v16  ;;  %v933_v5 = vsub.s32 4, %v7676_v4  ;;  %v7679_v9 = vld [vmem:[#allocation16_spill] sm:$0xff] }
 0x18c   : > { %v1141_v47 = vsub.s32 4, %v7677_v58  ;;  %vm1944_vm7 = vc.u32 %v5604_v38, %v5607_v3  ;;  %v930_v24 = vmul.f32 %v929_v11, %v927_v34  ;;  %v1138_v46 = vmul.f32 %v1137_v39, %v1135_v21  ;;  %v7680_v34 = vld [vmem:[#allocation14_spill] sm:$0xff] }
 0x18d   : > { %7675 = vst [vmem:[#allocation57_spill] sm:$0xff] %v5627_v18  ;;  %v5633_v33 = vsel %vm3955_vm11, 0, %v3954_v41  ;;  %v1945_v6 = vadd.s32 1, %v5608_v48  ;;  %v4106_v56 = vpop.eup %4105  ;;  %v2438_v53 = vor.u32 %v5538_v15, %v5508_v26  ;;  %v5640_v16 = vor.u32 %v5545_v0, %v5515_v1 }
 0x18e   : > { %v1044_v28 = vadd.s32 3, %v1040_v43  ;;  %v1942_v32 = vmul.u32 %v1935_v8, %v1926_v17  ;;  %v3930_v62 = vadd.s32 4294967294, %v1227_v50  ;;  %v1329_v10 = vsub.s32 0, %v5619_v25 }
 0x18f   : > { %7678 = vst [vmem:[#allocation56_spill] sm:$0xff] %v5640_v16  ;;  %v1946_v41 = vsel %vm1944_vm7, %v1945_v6, %v5608_v48  ;;  %vm849_vm10 = vcmp.lt.s32.totalorder %v7679_v9, 0  ;;  %vm1057_vm3 = vcmp.lt.s32.totalorder %v7680_v34, 0  ;;  %v1859_v26 = vsub.s32 4294967266, %v5633_v33 }
 0x190   : > { %v1947_v15 = vadd.s32 %v1946_v41, %v1942_v32  ;;  %v931_v21 = vxor.u32 2147483648, %v930_v24  ;;  %v934_v1 = vsel %vm849_vm10, %v933_v5, %v7676_v4  ;;  %v1139_v0 = vxor.u32 2147483648, %v1138_v46 }
 0x191   : > { %v1142_v8 = vsel %vm1057_vm3, %v1141_v47, %v7677_v58  ;;  %v5658_v48 = vsel %vm7515_vm8, %v5627_v18, 920167782  ;;  %v5662_v43 = vsel %vm7515_vm8, %v2438_v53, 1326507024  ;;  %v1045_v11 = vand.u32 3, %v1044_v28 }
 0x192   : > { %7681 = vst [vmem:[#allocation13_spill] sm:$0xff] %v5658_v48  ;;  %7682 = vst [vmem:[#allocation82_spill] sm:$0xff] %v5662_v43  ;;  %v1948_v39 = vadd.s32 536870912, %v1947_v15  ;;  %v7683_v50 = vand.u32 2147483647, %v7679_v9  ;;  %vm3931_vm5 = vcmp.lt.s32.totalorder %v3930_v62, 0  ;;  %v3933_v58 = vmin.u32 %v1329_v10, %v5619_v25 }
 0x193   : > { %v7686_v4 = vand.u32 2147483647, %v7680_v34  ;;  %v1860_v53 = vadd.s32 127, %v1859_v26  ;;  %v1051_v32 = vxor.u32 2147483648, %v5623_v14  ;;  %v932_v41 = vsel %vm849_vm10, %v931_v21, %v930_v24 }
 0x194   : > { %vm5666_vm15 = vcmp.le.f32.partialorder %v7683_v50, 0.7853982  ;;  %v5681_v28 = vshrl.u32 %v1948_v39, 30  ;;  %v1140_v50 = vsel %vm1057_vm3, %v1139_v0, %v1138_v46  ;;  %vm1047_vm1 = vcmp.eq.s32.totalorder %v1045_v11, 0 }
 0x195   : > { %vm5672_vm9 = vcmp.le.f32.partialorder %v7686_v4, 0.7853982  ;;  %v936_v47 = vsel %vm5666_vm15, 0, %v934_v1  ;;  %v1855_v4 = vsub.s32 32, %v5633_v33  ;;  %vm1050_vm6 = vcmp.eq.s32.totalorder %v1045_v11, 2 }
 0x196   : > { %v1144_v6 = vsel %vm5672_vm9, 0, %v1142_v8  ;;  %v5689_v10 = vsel %vm3931_vm5, 0, %v3930_v62  ;;  %v1950_v1 = vshll.u32 %v5681_v28, 30  ;;  %vm1046_vm11 = vcmp.lt.s32.totalorder %v1045_v11, 2 }
 0x197   : > { %v1048_v26 = vxor.u32 2147483648, %v4106_v56  ;;  %v5692_v8 = vadd.s32 3, %v936_v47  ;;  %v1331_v39 = vclz %v3933_v58  ;;  %v1839_v44 = vadd.s32 %v5367_v22, %v5355_v61  ;;  %v7689_v58 = vld [vmem:[#allocation20_spill] sm:$0xff] }
 0x198   : > { %v935_v24 = vsel %vm5666_vm15, %v7679_v9, %v932_v41  ;;  %v1143_v46 = vsel %vm5672_vm9, %v7680_v34, %v1140_v50  ;;  %v1148_v62 = vadd.s32 3, %v1144_v6  ;;  %v1861_v21 = vshll.u32 %v1860_v53, 23  ;;  %v5718_v6 = vpop.permute.xlu1 %2778 }
 0x199   : > { %v1052_v0 = vsel %vm1050_vm6, %v1051_v32, %v4106_v56  ;;  %v1235_v18 = vsub.s32 4294967266, %v5689_v10  ;;  %v1857_v43 = vshrl.u32 %v1839_v44, %v1855_v4  ;;  %v5703_v47 = vsub.s32 %v1947_v15, %v1950_v1  ;;  %v7691_v44 = vld [vmem:[#allocation15_spill] sm:$0xff] }
 0x19a   : > { %v7513_v48 = vand.u32 2147483647, %v7689_v58  ;;  %v1697_v61 = vshrl.u32 %v7667_v57, %v7690_v13  ;;  %v1700_v22 = vshrl.u32 %v7670_v35, %v7690_v13  ;;  %v1703_v17 = vshrl.u32 %v7571_v54, %v7690_v13  ;;  %v7692_v32 = vld [vmem:[#allocation35_spill] sm:$0xff] }
 0x19b   : > { %vm1043_vm7 = vweird.f32 %v7647_v19  ;;  %v1049_v56 = vsel %vm1047_vm1, %v5623_v14, %v1048_v26  ;;  %4107 = vcosq.f32 %v1143_v46  ;;  %vm1161_vm10 = vcmp.lt.s32.totalorder %v7691_v44, 0 }
 0x19c   : > { %v3934_v15 = vadd.s32 4294967294, %v1331_v39  ;;  %v1856_v5 = vshll.u32 %v5495_v63, %v5633_v33  ;;  %v1862_v53 = vor.u32 4788187, %v1861_v21  ;;  %v1696_v41 = vshll.u32 %v7586_v37, %v7692_v32 }
 0x19d   : > { %v1699_v50 = vshll.u32 %v7667_v57, %v7692_v32  ;;  %v1702_v4 = vshll.u32 %v7670_v35, %v7692_v32  ;;  %4109 = vsinq.f32 %v1143_v46  ;;  %v1236_v14 = vadd.s32 127, %v1235_v18 }
 0x19e   : > { %v1858_v1 = vor.u32 %v1857_v43, %v1856_v5  ;;  %v1953_v26 = vsub.s32 0, %v5703_v47  ;;  %vm7516_vm3 = vcmp.lt.s32.totalorder %v5490_v51, 4  ;;  %v1686_v63 = vand.u32 8388607, %v7513_v48 }
 0x19f   : > { %v5730_v33 = vor.u32 %v1697_v61, %v1696_v41  ;;  %v5732_v39 = vor.u32 %v1700_v22, %v1699_v50  ;;  %v1704_v21 = vor.u32 %v1703_v17, %v1702_v4  ;;  %4111 = vcosq.f32 %v935_v24  ;;  %v7693_v22 = vld [vmem:[#allocation40_spill] sm:$0xff]  ;;  %v7696_v4 = vld [vmem:[#allocation42_spill] sm:$0xff] }
 0x1a0   : > { %v5734_v20 = vand.u32 3, %v1148_v62  ;;  %v1215_v46 = vadd.s32 %v5312_v30, %v5299_v45  ;;  %v1231_v18 = vsub.s32 32, %v5689_v10  ;;  %v1053_v43 = vsel %vm1046_vm11, %v1049_v56, %v1052_v0  ;;  %v5744_v62 = vpop.permute.xlu1 %2782  ;;  %v7694_v45 = vld [vmem:[#allocation47_spill] sm:$0xff]  ;;  %v7695_v50 = vld [vmem:[#allocation48_spill] sm:$0xff] }
 0x1a1   : > { %v1245_v5 = vsub.s32 4, %v5517_v2  ;;  %vm3935_vm15 = vcmp.lt.s32.totalorder %v3934_v15, 0  ;;  %v1863_v32 = vand.u32 2147483647, %v1862_v53  ;;  %v1237_v48 = vshll.u32 %v1236_v14, 23 }
 0x1a2   : > { %v3957_v61 = vmin.u32 %v1953_v26, %v5703_v47  ;;  %vm1711_vm9 = vcmp.lt.s32.totalorder %v7693_v22, 1  ;;  %vm1713_vm5 = vcmp.lt.s32.totalorder %v7693_v22, 3  ;;  %v1865_v17 = vcvt.s32.f32 %v1858_v1 }
 0x1a3   : > { %v1687_v41 = vor.u32 8388608, %v1686_v63  ;;  %v1719_v30 = vsel %vm1711_vm9, %v5730_v33, %v5732_v39  ;;  %v1721_v11 = vsel %vm1713_vm5, %v1704_v21, %v7694_v45  ;;  %v1233_v0 = vshrl.u32 %v1215_v46, %v1231_v18 }
 0x1a4   : > { %v5753_v56 = vsel %vm3935_vm15, 0, %v3934_v15  ;;  %v1723_v53 = vsel %vm1711_vm9, %v5732_v39, %v1704_v21  ;;  %v1725_v14 = vsel %vm1713_vm5, %v7696_v4, %v7695_v50  ;;  %v1054_v1 = vsel %vm1043_vm7, nan, %v1053_v43 }
 0x1a5   : > { %v1246_v26 = vsel %vm1161_vm10, %v1245_v5, %v5517_v2  ;;  %v1866_v63 = vmul.f32 %v1865_v17, %v1863_v32  ;;  %vm1712_vm1 = vcmp.lt.s32.totalorder %v7693_v22, 2  ;;  %v1232_v15 = vshll.u32 %v5566_v29, %v5689_v10 }
 0x1a6   : > { %v1238_v46 = vor.u32 4788187, %v1237_v48  ;;  %v1955_v18 = vclz %v3957_v61  ;;  %v1722_v45 = vsel %vm1712_vm1, %v1719_v30, %v1721_v11  ;;  %4113 = vsinq.f32 %v935_v24  ;;  %v5792_v61 = vpop.permute.xlu1 %2790  ;;  %v5799_v11 = vpop.permute.xlu0 %2774 }
 0x1a7   : > { %v1339_v50 = vsub.s32 4294967266, %v5753_v56  ;;  %v1726_v19 = vsel %vm1712_vm1, %v1723_v53, %v1725_v14  ;;  %v5775_v43 = vshll.u32 %v1687_v41, 8  ;;  %v5780_v2 = vsel %vm7516_vm3, %v5640_v16, 920167782 }
 0x1a8   : > { %7697 = vst [vmem:[#allocation66_spill] sm:$0xff] %v5780_v2  ;;  %v2512_v5 = vmul.f32 0.1, %v1054_v1  ;;  %v7698_v29 = vand.u32 2147483647, %v7691_v44  ;;  %v1234_v10 = vor.u32 %v1233_v0, %v1232_v15  ;;  %v5788_v24 = vpop.eup %4107  ;;  %v1867_v17 = vxor.u32 2147483648, %v1866_v63 }
 0x1a9   : > { %v5795_v41 = vmul.u32.u64.low %v5775_v43, %v1722_v45  ;;  %v5796_v30 = vmul.u32.u64.high %v5775_v43, %v1722_v45, %v5795_v41  ;;  %v1239_v53 = vand.u32 2147483647, %v1238_v46  ;;  %v3958_v0 = vadd.s32 4294967294, %v1955_v18 }
 0x1aa   : > { %vm5784_vm6 = vcmp.le.f32.partialorder %v7698_v29, 0.7853982  ;;  %v5804_v4 = vmul.u32.u64.low %v5775_v43, %v1726_v19  ;;  %v5805_v14 = vmul.u32.u64.high %v5775_v43, %v1726_v19, %v5804_v4  ;;  %v4110_v1 = vpop.eup %4109  ;;  %v5815_v45 = vand.u32 3, %v5692_v8  ;;  %v7703_v29 = vld [vmem:[#allocation11_spill] sm:$0xff]  ;;  %v2854_v8 = vld [vmem:[%s4397_s14 + $0x8] sm:$0xff] }
 0x1ab   : > { %v1248_v32 = vsel %vm5784_vm6, 0, %v1246_v26  ;;  %v7701_v26 = vor.u32 %v5613_v55, %v5521_v7  ;;  %vm1151_vm11 = vcmp.eq.s32.totalorder %v5734_v20, 0  ;;  %v1340_v46 = vadd.s32 127, %v1339_v50 }
 0x1ac   : > { %v2838_v18 = vmul.f32 %v5718_v6, %v2512_v5  ;;  %vm1154_vm7 = vcmp.eq.s32.totalorder %v5734_v20, 2  ;;  %v1241_v19 = vcvt.s32.f32 %v1234_v10  ;;  %vm1785_vm15 = vcmp.lt.s32.totalorder %v7703_v29, 0  ;;  %v5821_v4 = vpop.eup %4111 }
 0x1ad   : > { %v5812_v15 = vsel %vm7516_vm3, %v7701_v26, 1326507024  ;;  %v1252_v7 = vadd.s32 3, %v1248_v32  ;;  %v1335_v55 = vsub.s32 32, %v5753_v56  ;;  %v1868_v26 = vsel %vm1785_vm15, %v1867_v17, %v1866_v63 }
 0x1ae   : > { %7702 = vst [vmem:[#allocation65_spill] sm:$0xff] %v5812_v15  ;;  %v1716_v16 = vsel %vm1714_vm4, %v1704_v21, 2102212464  ;;  %vm1150_vm8 = vcmp.lt.s32.totalorder %v5734_v20, 2  ;;  %v1242_v6 = vmul.f32 %v1241_v19, %v1239_v53  ;;  %v7704_v50 = vand.u32 2147483647, %v7703_v29  ;;  %v2955_v15 = vpop.permute.xlu1 %2954  ;;  %v5841_v53 = vpop.permute.xlu0 %2786 }
 0x1af   : > { %vm3959_vm13 = vcmp.lt.s32.totalorder %v3958_v0, 0  ;;  %v1695_v10 = vshrl.u32 %v7586_v37, %v7690_v13  ;;  %v1152_v32 = vxor.u32 2147483648, %v4110_v1  ;;  %v1155_v63 = vxor.u32 2147483648, %v5788_v24 }
 0x1b0   : > { %vm5832_vm3 = vcmp.le.f32.partialorder %v7704_v50, 0.7853982  ;;  %v1319_v17 = vadd.s32 %v5423_v36, %v5430_v52  ;;  %v1341_v21 = vshll.u32 %v1340_v46, 23  ;;  %vm1265_vm4 = vcmp.lt.s32.totalorder %v7636_v12, 0 }
 0x1b1   : > { %v1871_v19 = vsel %vm5832_vm3, %v7703_v29, %v1868_v26  ;;  %v3014_v13 = vmul.f32 %v2955_v15, %v2854_v8  ;;  %v1715_v50 = vsel %vm1711_vm9, %v1695_v10, %v5730_v33  ;;  %v1717_v36 = vsel %vm1713_vm5, %v5732_v39, %v1716_v16 }
 0x1b2   : > { %vm1147_vm12 = vweird.f32 %v7680_v34  ;;  %v1337_v52 = vshrl.u32 %v1319_v17, %v1335_v55  ;;  %v1869_v46 = vsub.s32 4, %v5440_v23  ;;  %v5860_v26 = vsel %vm3959_vm13, 0, %v3958_v0 }
 0x1b3   : > { %v1737_v15 = vadd.s32 1, %v5796_v30  ;;  %v1243_v8 = vxor.u32 2147483648, %v1242_v6  ;;  %v5864_v2 = vstv %s5801_s23  ;;  %v5868_v33 = vadd.f32 %v3014_v13, %v2838_v18  ;;  %v4114_v55 = vpop.eup %4113 }
 0x1b4   : > { %vm1736_vm9 = vc.u32 %v5805_v14, %v5795_v41  ;;  %v1336_v16 = vshll.u32 %v5619_v25, %v5753_v56  ;;  %v1342_v39 = vor.u32 4788187, %v1341_v21  ;;  %4115 = vcosq.f32 %v1871_v19 }
 0x1b5   : > { %v1718_v0 = vsel %vm1712_vm1, %v1715_v50, %v1717_v36  ;;  %vm943_vm13 = vcmp.eq.s32.totalorder %v5815_v45, 0  ;;  %vm946_vm5 = vcmp.eq.s32.totalorder %v5815_v45, 2  ;;  %v1153_v18 = vsel %vm1151_vm11, %v5788_v24, %v1152_v32 }
 0x1b6   : > { %v1156_v10 = vsel %vm1154_vm7, %v1155_v63, %v4110_v1  ;;  %v7707_v25 = vand.u32 2147483647, %v7636_v12  ;;  %4117 = vsinq.f32 %v1871_v19  ;;  %v1963_v22 = vsub.s32 4294967266, %v5860_v26  ;;  %v5903_v19 = vpop.permute.xlu0 %2810 }
 0x1b7   : > { %v1338_v17 = vor.u32 %v1337_v52, %v1336_v16  ;;  %v1349_v21 = vsub.s32 4, %v5579_v59  ;;  %v1870_v24 = vsel %vm1785_vm15, %v1869_v46, %v5440_v23  ;;  %v1738_v1 = vsel %vm1736_vm9, %v1737_v15, %v5796_v30 }
 0x1b8   : > { %vm5887_vm0 = vcmp.le.f32.partialorder %v7707_v25, 0.7853982  ;;  %v947_v32 = vxor.u32 2147483648, %v5821_v4  ;;  %v1244_v63 = vsel %vm1161_vm10, %v1243_v8, %v1242_v6  ;;  %v3066_v13 = vmul.f32 %v5864_v2, %v5868_v33 }
 0x1b9   : > { %v1734_v50 = vmul.u32 %v5775_v43, %v1718_v0  ;;  %v944_v23 = vxor.u32 2147483648, %v4114_v55  ;;  %v1157_v36 = vsel %vm1150_vm8, %v1153_v18, %v1156_v10  ;;  %v5910_v52 = vand.u32 3, %v1252_v7 }
 0x1ba   : > { %v1343_v30 = vand.u32 2147483647, %v1342_v39  ;;  %vm942_vm10 = vcmp.lt.s32.totalorder %v5815_v45, 2  ;;  %v1872_v6 = vsel %vm5832_vm3, 0, %v1870_v24  ;;  %v5918_v46 = vstv %s5847_s8 }
 0x1bb   : > { %v1964_v15 = vadd.s32 127, %v1963_v22  ;;  %v5920_v43 = vadd.s32 %v1738_v1, %v1734_v50  ;;  %v1247_v20 = vsel %vm5784_vm6, %v7691_v44, %v1244_v63  ;;  %v1345_v7 = vcvt.s32.f32 %v1338_v17  ;;  %v5944_v17 = vpop.permute.xlu0 %2986 }
 0x1bc   : > { %v1350_v8 = vsel %vm1265_vm4, %v1349_v21, %v5579_v59  ;;  %v5929_v16 = vstv %s5857_s15  ;;  %v1158_v5 = vsel %vm1147_vm12, nan, %v1157_v36  ;;  %v5934_v39 = vstv %s5866_s16 }
 0x1bd   : > { %v3098_v0 = vrot.slane %v3066_v13, 1  ;;  %v1959_v18 = vsub.s32 32, %v5860_v26  ;;  %v1346_v10 = vmul.f32 %v1345_v7, %v1343_v30  ;;  %v1876_v25 = vadd.s32 3, %v1872_v6 }
 0x1be   : > { %v5938_v22 = vstv %s5874_s17  ;;  %v3048_v48 = vmul.f32 %v5918_v46, %v5868_v33  ;;  %v3148_v59 = vmul.f32 %v5929_v16, %v5868_v33  ;;  %v1943_v34 = vadd.s32 %v5607_v3, %v5604_v38 }
 0x1bf   : > { %v1965_v21 = vshll.u32 %v1964_v15, 23  ;;  %v1740_v24 = vadd.s32 536870912, %v5920_v43  ;;  %v945_v1 = vsel %vm943_vm13, %v5821_v4, %v944_v23  ;;  %v948_v63 = vsel %vm946_vm5, %v947_v32, %v4114_v55 }
 0x1c0   : > { %v2513_v13 = vmul.f32 0.1, %v1158_v5  ;;  %v1352_v50 = vsel %vm5887_vm0, 0, %v1350_v8  ;;  %v3130_v36 = vadd.f32 %v3098_v0, %v3048_v48  ;;  %v3230_v30 = vmul.f32 %v5934_v39, %v5868_v33  ;;  %v2855_v8 = vld [vmem:[%s4397_s14 + $0x10] sm:$0xff] }
 0x1c1   : > { %v3312_v38 = vmul.f32 %v5938_v22, %v5868_v33  ;;  %v1961_v3 = vshrl.u32 %v1943_v34, %v1959_v18  ;;  %4119 = vcosq.f32 %v1247_v20  ;;  %v1347_v6 = vxor.u32 2147483648, %v1346_v10  ;;  %v4116_v23 = vpop.eup %4115 }
 0x1c2   : > { %v1877_v15 = vand.u32 3, %v1876_v25  ;;  %v5961_v4 = vstv %s5912_s18  ;;  %v3180_v7 = vrot.slane %v3148_v59, 2  ;;  %v1960_v55 = vshll.u32 %v5703_v47, %v5860_v26 }
 0x1c3   : > { %v1966_v32 = vor.u32 4788187, %v1965_v21  ;;  %v5966_v5 = vshrl.u32 %v1740_v24, 30  ;;  %v4118_v0 = vpop.eup %4117  ;;  %v5970_v48 = vsel %vm942_vm10, %v945_v1, %v948_v63  ;;  %v2839_v18 = vmul.f32 %v5744_v62, %v2513_v13  ;;  %v2959_v21 = vpop.permute.xlu0 %2958 }
 0x1c4   : > { %4121 = vsinq.f32 %v1247_v20  ;;  %v5973_v25 = vadd.s32 3, %v1352_v50  ;;  %v3212_v59 = vadd.f32 %v3180_v7, %v3130_v36  ;;  %v3262_v47 = vrot.slane %v3230_v30, 3  ;;  %v7710_v50 = vld [vmem:[#allocation19_spill] sm:$0xff]  ;;  %v7711_v30 = vld [vmem:[#allocation37_spill] sm:$0xff] }
 0x1c5   : > { %v3344_v26 = vrot.slane %v3312_v38, 4  ;;  %v1962_v34 = vor.u32 %v1961_v3, %v1960_v55  ;;  %v1348_v24 = vsel %vm1265_vm4, %v1347_v6, %v1346_v10  ;;  %vm1879_vm12 = vcmp.eq.s32.totalorder %v1877_v15, 0 }
 0x1c6   : > { %v3394_v45 = vmul.f32 %v5961_v4, %v5868_v33  ;;  %v3015_v62 = vmul.f32 %v2959_v21, %v2855_v8  ;;  %v1880_v20 = vxor.u32 2147483648, %v4118_v0  ;;  %v1883_v1 = vxor.u32 2147483648, %v4116_v23  ;;  %v7712_v8 = vld [vmem:[#allocation34_spill] sm:$0xff] }
 0x1c7   : > { %v1967_v63 = vand.u32 2147483647, %v1966_v32  ;;  %v1742_v13 = vshll.u32 %v5966_v5, 30  ;;  %vm1875_vm8 = vweird.f32 %v7703_v29  ;;  %v2009_v38 = vshrl.u32 %v7667_v57, %v7711_v30 }
 0x1c8   : > { %v2012_v10 = vshrl.u32 %v7670_v35, %v7711_v30  ;;  %v2015_v3 = vshrl.u32 %v7571_v54, %v7711_v30  ;;  %v1351_v6 = vsel %vm5887_vm0, %v7636_v12, %v1348_v24  ;;  %vm1882_vm3 = vcmp.eq.s32.totalorder %v1877_v15, 2 }
 0x1c9   : > { %v3294_v7 = vadd.f32 %v3262_v47, %v3212_v59  ;;  %v1969_v55 = vcvt.s32.f32 %v1962_v34  ;;  %v5995_v32 = vadd.f32 %v3015_v62, %v2839_v18  ;;  %v2008_v21 = vshll.u32 %v7586_v37, %v7712_v8 }
 0x1ca   : > { %v2011_v36 = vshll.u32 %v7667_v57, %v7712_v8  ;;  %v2014_v51 = vshll.u32 %v7670_v35, %v7712_v8  ;;  %v1881_v40 = vsel %vm1879_vm12, %v4116_v23, %v1880_v20  ;;  %v1884_v56 = vsel %vm1882_vm3, %v1883_v1, %v4118_v0 }
 0x1cb   : > { %v1970_v24 = vmul.f32 %v1969_v55, %v1967_v63  ;;  %v6005_v59 = vsub.s32 %v5920_v43, %v1742_v13  ;;  %v7713_v47 = vand.u32 2147483647, %v7710_v50  ;;  %v6009_v34 = vor.u32 %v2009_v38, %v2008_v21  ;;  %v7714_v13 = vld [vmem:[#allocation39_spill] sm:$0xff] }
 0x1cc   : > { %v6011_v62 = vor.u32 %v2012_v10, %v2011_v36  ;;  %v6013_v31 = vor.u32 %v2015_v3, %v2014_v51  ;;  %4123 = vcosq.f32 %v1351_v6  ;;  %vm1878_vm0 = vcmp.lt.s32.totalorder %v1877_v15, 2 }
 0x1cd   : > { %v1998_v18 = vand.u32 8388607, %v7713_v47  ;;  %v6016_v42 = vstv %s5975_s19  ;;  %v6019_v8 = vstv %s5977_s20  ;;  %4125 = vsinq.f32 %v1351_v6  ;;  %v7716_v6 = vld [vmem:[#allocation46_spill] sm:$0xff] }
 0x1ce   : > { %v1885_v23 = vsel %vm1878_vm0, %v1881_v40, %v1884_v56  ;;  %v3376_v0 = vadd.f32 %v3344_v26, %v3294_v7  ;;  %v3426_v43 = vrot.slane %v3394_v45, 5  ;;  %v4120_v20 = vpop.eup %4119  ;;  %vm1258_vm1 = vcmp.eq.s32.totalorder %v5910_v52, 2  ;;  %v7715_v26 = vld [vmem:[#allocation45_spill] sm:$0xff] }
 0x1cf   : > { %v1971_v1 = vxor.u32 2147483648, %v1970_v24  ;;  %v1745_v63 = vsub.s32 0, %v6005_v59  ;;  %vm2023_vm6 = vcmp.lt.s32.totalorder %v7714_v13, 1  ;;  %vm2025_vm11 = vcmp.lt.s32.totalorder %v7714_v13, 3  ;;  %v7717_v7 = vld [vmem:[#allocation41_spill] sm:$0xff] }
 0x1d0   : > { %vm1255_vm7 = vcmp.eq.s32.totalorder %v5910_v52, 0  ;;  %v3067_v51 = vmul.f32 %v5864_v2, %v5995_v32  ;;  %v1999_v15 = vor.u32 8388608, %v1998_v18  ;;  %v2031_v40 = vsel %vm2023_vm6, %v6009_v34, %v6011_v62 }
 0x1d1   : > { %v2033_v45 = vsel %vm2025_vm11, %v6013_v31, %v7715_v26  ;;  %v4122_v36 = vpop.eup %4121  ;;  %v1886_v38 = vsel %vm1875_vm8, nan, %v1885_v23  ;;  %v3476_v10 = vmul.f32 %v6016_v42, %v5868_v33  ;;  %v2035_v3 = vsel %vm2023_vm6, %v6011_v62, %v6013_v31 }
 0x1d2   : > { %v2037_v55 = vsel %vm2025_vm11, %v7717_v7, %v7716_v6  ;;  %v1259_v21 = vxor.u32 2147483648, %v4120_v20  ;;  %v7718_v56 = vand.u32 2147483647, %v7661_v60  ;;  %vm1889_vm4 = vcmp.lt.s32.totalorder %v7661_v60, 0 }
 0x1d3   : > { %vm2024_vm9 = vcmp.lt.s32.totalorder %v7714_v13, 2  ;;  %vm939_vm13 = vweird.f32 %v7679_v9  ;;  %v3458_v29 = vadd.f32 %v3426_v43, %v3376_v0  ;;  %v1972_v18 = vsel %vm1889_vm4, %v1971_v1, %v1970_v24  ;;  %v2862_v24 = vld [vmem:[%s4397_s14 + $0x48] sm:$0xff] }
 0x1d4   : > { %vm6050_vm15 = vcmp.le.f32.partialorder %v7718_v56, 0.7853982  ;;  %v3949_v23 = vmin.u32 %v1745_v63, %v6005_v59  ;;  %v2034_v26 = vsel %vm2024_vm9, %v2031_v40, %v2033_v45  ;;  %v2520_v6 = vmul.f32 0.1, %v1886_v38 }
 0x1d5   : > { %v3099_v7 = vrot.slane %v3067_v51, 1  ;;  %v2038_v56 = vsel %vm2024_vm9, %v2035_v3, %v2037_v55  ;;  %v6066_v27 = vshll.u32 %v1999_v15, 8  ;;  %v1256_v49 = vxor.u32 2147483648, %v4122_v36 }
 0x1d6   : > { %v3508_v50 = vrot.slane %v3476_v10, 6  ;;  %v3558_v0 = vmul.f32 %v6019_v8, %v5868_v33  ;;  %v3149_v43 = vmul.f32 %v5929_v16, %v5995_v32  ;;  %v1975_v1 = vsel %vm6050_vm15, %v7661_v60, %v1972_v18 }
 0x1d7   : > { %v3049_v63 = vmul.f32 %v5918_v46, %v5995_v32  ;;  %v6079_v51 = vmul.u32.u64.low %v6066_v27, %v2034_v26  ;;  %v6080_v15 = vmul.u32.u64.high %v6066_v27, %v2034_v26, %v6079_v51  ;;  %v1747_v45 = vclz %v3949_v23 }
 0x1d8   : > { %v3540_v40 = vadd.f32 %v3508_v50, %v3458_v29  ;;  %v6084_v33 = vmul.u32.u64.low %v6066_v27, %v2038_v56  ;;  %v6085_v38 = vmul.u32.u64.high %v6066_v27, %v2038_v56, %v6084_v33  ;;  %v1260_v10 = vsel %vm1258_vm1, %v1259_v21, %v4122_v36 }
 0x1d9   : > { %v2846_v3 = vmul.f32 %v5903_v19, %v2520_v6  ;;  %v3022_v55 = vmul.f32 %v5944_v17, %v2862_v24  ;;  %v3131_v18 = vadd.f32 %v3099_v7, %v3049_v63  ;;  %v1257_v54 = vsel %vm1255_vm7, %v4120_v20, %v1256_v49  ;;  %v4124_v29 = vpop.eup %4123  ;;  %v6125_v63 = vpop.permute.xlu0 %2806 }
 0x1da   : > { %v3590_v26 = vrot.slane %v3558_v0, 7  ;;  %4127 = vcosq.f32 %v1975_v1  ;;  %v3181_v50 = vrot.slane %v3149_v43, 2  ;;  %vm1251_vm5 = vweird.f32 %v7691_v44  ;;  %v4126_v17 = vpop.eup %4125 }
 0x1db   : > { %v1973_v23 = vsub.s32 4, %v5681_v28  ;;  %4129 = vsinq.f32 %v1975_v1  ;;  %v3231_v36 = vmul.f32 %v5934_v39, %v5995_v32  ;;  %v2028_v19 = vsel %vm2026_vm2, %v6013_v31, 2102212464 }
 0x1dc   : > { %vm1254_vm10 = vcmp.lt.s32.totalorder %v5910_v52, 2  ;;  %v3622_v49 = vadd.f32 %v3590_v26, %v3540_v40  ;;  %v3950_v20 = vadd.s32 4294967294, %v1747_v45  ;;  %v2007_v21 = vshrl.u32 %v7586_v37, %v7711_v30 }
 0x1dd   : > { %v950_v6 = vsel %vm939_vm13, nan, %v5970_v48  ;;  %v6107_v7 = vstv %s6062_s21  ;;  %v6109_v56 = vadd.f32 %v3022_v55, %v2846_v3  ;;  %v3213_v0 = vadd.f32 %v3181_v50, %v3131_v18  ;;  %v2951_v44 = vpop.permute.xlu0 %2950 }
 0x1de   : > { %v1261_v24 = vsel %vm1254_vm10, %v1257_v54, %v1260_v10  ;;  %v1357_v31 = vand.u32 3, %v5973_v25  ;;  %v2027_v52 = vsel %vm2023_vm6, %v2007_v21, %v6009_v34  ;;  %v2029_v30 = vsel %vm2025_vm11, %v6011_v62, %v2028_v19 }
 0x1df   : > { %v1974_v9 = vsel %vm1889_vm4, %v1973_v23, %v5681_v28  ;;  %v3263_v48 = vrot.slane %v3231_v36, 3  ;;  %v3313_v43 = vmul.f32 %v5938_v22, %v5995_v32  ;;  %v2049_v54 = vadd.s32 1, %v6080_v15 }
 0x1e0   : > { %v1363_v1 = vxor.u32 2147483648, %v4124_v29  ;;  %v3640_v25 = vadd.f32 %v6107_v7, %v3622_v49  ;;  %vm3951_vm2 = vcmp.lt.s32.totalorder %v3950_v20, 0  ;;  %vm2048_vm12 = vc.u32 %v6085_v38, %v6079_v51 }
 0x1e1   : > { %v1360_v34 = vxor.u32 2147483648, %v4126_v17  ;;  %v3074_v62 = vmul.f32 %v5864_v2, %v6109_v56  ;;  %v3295_v28 = vadd.f32 %v3263_v48, %v3213_v0  ;;  %v2030_v40 = vsel %vm2024_vm9, %v2027_v52, %v2029_v30 }
 0x1e2   : > { %v2511_v45 = vmul.f32 0.1, %v950_v6  ;;  %vm1359_vm8 = vcmp.eq.s32.totalorder %v1357_v31, 0  ;;  %vm1362_vm3 = vcmp.eq.s32.totalorder %v1357_v31, 2  ;;  %v1976_v33 = vsel %vm6050_vm15, 0, %v1974_v9 }
 0x1e3   : > { %v3345_v10 = vrot.slane %v3313_v43, 4  ;;  %v3395_v3 = vmul.f32 %v5961_v4, %v5995_v32  ;;  %v6137_v55 = vsel %vm3951_vm2, 0, %v3950_v20  ;;  %v2050_v18 = vsel %vm2048_vm12, %v2049_v54, %v6080_v15  ;;  %v2853_v15 = vld [vmem:[%s4397_s14] sm:$0xff] }
 0x1e4   : > { %v1262_v26 = vsel %vm1251_vm5, nan, %v1261_v24  ;;  %v1364_v13 = vsel %vm1362_vm3, %v1363_v1, %v4126_v17  ;;  %4131 = vtanh.f32 %v3640_v25  ;;  %v2046_v50 = vmul.u32 %v6066_v27, %v2030_v40  ;;  %v6154_v17 = vpop.permute.xlu1 %2814 }
 0x1e5   : > { %v1361_v23 = vsel %vm1359_vm8, %v4124_v29, %v1360_v34  ;;  %v3106_v36 = vrot.slane %v3074_v62, 1  ;;  %v1980_v47 = vadd.s32 3, %v1976_v33  ;;  %v3377_v19 = vadd.f32 %v3345_v10, %v3295_v28 }
 0x1e6   : > { %v2837_v49 = vmul.f32 %v5799_v11, %v2511_v45  ;;  %v3477_v21 = vmul.f32 %v6016_v42, %v5995_v32  ;;  %v1755_v20 = vsub.s32 4294967266, %v6137_v55  ;;  %v6147_v6 = vadd.s32 %v2050_v18, %v2046_v50  ;;  %v2863_v50 = vld [vmem:[%s4397_s14 + $0x50] sm:$0xff] }
 0x1e7   : > { %v4128_v0 = vpop.eup %4127  ;;  %vm1358_vm0 = vcmp.lt.s32.totalorder %v1357_v31, 2  ;;  %v3056_v27 = vmul.f32 %v5918_v46, %v6109_v56  ;;  %v3156_v29 = vmul.f32 %v5929_v16, %v6109_v56  ;;  %v3427_v11 = vrot.slane %v3395_v3, 5 }
 0x1e8   : > { %v4130_v24 = vpop.eup %4129  ;;  %v2514_v52 = vmul.f32 0.1, %v1262_v26  ;;  %vm1355_vm1 = vweird.f32 %v7636_v12  ;;  %v1365_v30 = vsel %vm1358_vm0, %v1361_v23, %v1364_v13  ;;  %v3559_v9 = vmul.f32 %v6019_v8, %v5995_v32  ;;  %v2991_v23 = vpop.permute.xlu1 %2990 }
 0x1e9   : > { %v3138_v48 = vadd.f32 %v3106_v36, %v3056_v27  ;;  %v1981_v43 = vand.u32 3, %v1980_v47  ;;  %v3459_v31 = vadd.f32 %v3427_v11, %v3377_v19  ;;  %v3013_v54 = vmul.f32 %v2951_v44, %v2853_v15 }
 0x1ea   : > { %v3238_v1 = vmul.f32 %v5934_v39, %v6109_v56  ;;  %v3509_v25 = vrot.slane %v3477_v21, 6  ;;  %v1756_v34 = vadd.s32 127, %v1755_v20  ;;  %v2052_v62 = vadd.s32 536870912, %v6147_v6 }
 0x1eb   : > { %v3188_v28 = vrot.slane %v3156_v29, 2  ;;  %v1984_v40 = vxor.u32 2147483648, %v4130_v24  ;;  %v1987_v45 = vxor.u32 2147483648, %v4128_v0  ;;  %v6162_v33 = vadd.f32 %v3013_v54, %v2837_v49 }
 0x1ec   : > { %v6165_v10 = vmul.f32 %v5841_v53, %v2514_v52  ;;  %v1366_v32 = vsel %vm1355_vm1, nan, %v1365_v30  ;;  %vm1979_vm6 = vweird.f32 %v7661_v60  ;;  %v1751_v3 = vsub.s32 32, %v6137_v55 }
 0x1ed   : > { %v3220_v18 = vadd.f32 %v3188_v28, %v3138_v48  ;;  %vm1983_vm11 = vcmp.eq.s32.totalorder %v1981_v43, 0  ;;  %v3541_v26 = vadd.f32 %v3509_v25, %v3459_v31  ;;  %v3591_v13 = vrot.slane %v3559_v9, 7  ;;  %v6193_v31 = vpop.permute.xlu1 %2818 }
 0x1ee   : > { %vm1986_vm7 = vcmp.eq.s32.totalorder %v1981_v43, 2  ;;  %v1735_v36 = vadd.s32 %v5795_v41, %v5805_v14  ;;  %v1757_v47 = vshll.u32 %v1756_v34, 23  ;;  %v6174_v53 = vshrl.u32 %v2052_v62, 30  ;;  %7721 = vst [vmem:[#allocation24_spill] sm:$0xff] %v6193_v31 }
 0x1ef   : > { %v3270_v19 = vrot.slane %v3238_v1, 3  ;;  %v1985_v12 = vsel %vm1983_vm11, %v4128_v0, %v1984_v40  ;;  %v1988_v49 = vsel %vm1986_vm7, %v1987_v45, %v4130_v24  ;;  %v3065_v21 = vmul.f32 %v5864_v2, %v6162_v33 }
 0x1f0   : > { %v3320_v20 = vmul.f32 %v5938_v22, %v6109_v56  ;;  %v6180_v15 = vmul.f32 %v2991_v23, %v2863_v50  ;;  %vm1681_vm15 = vcmp.lt.s32.totalorder %v7689_v58, 0  ;;  %v1753_v44 = vshrl.u32 %v1735_v36, %v1751_v3 }
 0x1f1   : > { %v6183_v27 = vpop.eup %4131  ;;  %v2515_v41 = vmul.f32 0.1, %v1366_v32  ;;  %v3302_v14 = vadd.f32 %v3270_v19, %v3220_v18  ;;  %vm1982_vm4 = vcmp.lt.s32.totalorder %v1981_v43, 2  ;;  %v3623_v29 = vadd.f32 %v3591_v13, %v3541_v26  ;;  %v2856_v19 = vld [vmem:[%s4397_s14 + $0x18] sm:$0xff] }
 0x1f2   : > { %v1989_v11 = vsel %vm1982_vm4, %v1985_v12, %v1988_v49  ;;  %v1752_v0 = vshll.u32 %v6005_v59, %v6137_v55  ;;  %v1758_v24 = vor.u32 4788187, %v1757_v47  ;;  %v2054_v52 = vshll.u32 %v6174_v53, 30  ;;  %v2963_v12 = vpop.permute.xlu1 %2962  ;;  %v7725_v49 = vld [vmem:[#allocation31_spill] sm:$0xff] }
 0x1f3   : > { %v3402_v30 = vmul.f32 %v5961_v4, %v6109_v56  ;;  %v3484_v9 = vmul.f32 %v6016_v42, %v6109_v56  ;;  %v1765_v48 = vsub.s32 4, %v5966_v5  ;;  %v3097_v54 = vrot.slane %v3065_v21, 1 }
 0x1f4   : > { %v3352_v43 = vrot.slane %v3320_v20, 4  ;;  %v7722_v1 = vand.u32 2147483647, %v7689_v58  ;;  %v1754_v59 = vor.u32 %v1753_v44, %v1752_v0  ;;  %v3147_v55 = vmul.f32 %v5929_v16, %v6162_v33  ;;  %v7726_v20 = vld [vmem:[#allocation51_spill] sm:$0xff] }
 0x1f5   : > { %v6204_v34 = vmul.f32 %v5792_v61, %v2515_v41  ;;  %v1990_v28 = vsel %vm1979_vm6, nan, %v1989_v11  ;;  %v3047_v40 = vmul.f32 %v5918_v46, %v6162_v33  ;;  %v3641_v32 = vadd.f32 %v6107_v7, %v3623_v29 }
 0x1f6   : > { %vm6197_vm9 = vcmp.le.f32.partialorder %v7722_v1, 0.7853982  ;;  %v3384_v45 = vadd.f32 %v3352_v43, %v3302_v14  ;;  %v1759_v3 = vand.u32 2147483647, %v1758_v24  ;;  %v6213_v18 = vsub.s32 %v6147_v6, %v2054_v52  ;;  %v7728_v52 = vld [vmem:[#allocation49_spill] sm:$0xff] }
 0x1f7   : > { %v3434_v26 = vrot.slane %v3402_v30, 5  ;;  %v3516_v13 = vrot.slane %v3484_v9, 6  ;;  %v1766_v61 = vsel %vm1681_vm15, %v1765_v48, %v5966_v5  ;;  %v3129_v50 = vadd.f32 %v3097_v54, %v3047_v40 }
 0x1f8   : > { %v2521_v23 = vmul.f32 0.1, %v1990_v28  ;;  %v1761_v60 = vcvt.s32.f32 %v1754_v59  ;;  %v3179_v36 = vrot.slane %v3147_v55, 2  ;;  %v3229_v47 = vmul.f32 %v5934_v39, %v6162_v33 }
 0x1f9   : > { %v7529_v21 = vand.u32 2147483647, %v7725_v49  ;;  %v2113_v6 = vshrl.u32 %v7667_v57, %v7726_v20  ;;  %v2116_v44 = vshrl.u32 %v7670_v35, %v7726_v20  ;;  %v7727_v41 = vmov 2102212464  }
 0x1fa   : > { %v2119_v5 = vshrl.u32 %v7727_v41, %v7726_v20  ;;  %v3466_v14 = vadd.f32 %v3434_v26, %v3384_v45  ;;  %v1762_v29 = vmul.f32 %v1761_v60, %v1759_v3  ;;  %v1768_v11 = vsel %vm6197_vm9, 0, %v1766_v61 }
 0x1fb   : > { %v2057_v0 = vsub.s32 0, %v6213_v18  ;;  %v3211_v24 = vadd.f32 %v3179_v36, %v3129_v50  ;;  %v2112_v30 = vshll.u32 %v7586_v37, %v7728_v52  ;;  %v2115_v9 = vshll.u32 %v7667_v57, %v7728_v52 }
 0x1fc   : > { %v2118_v48 = vshll.u32 %v7670_v35, %v7728_v52  ;;  %v2847_v54 = vmul.f32 %v6154_v17, %v2521_v23  ;;  %v3261_v43 = vrot.slane %v3229_v47, 3  ;;  %v3311_v1 = vmul.f32 %v5938_v22, %v6162_v33 }
 0x1fd   : > { %v3016_v59 = vmul.f32 %v2963_v12, %v2856_v19  ;;  %v2102_v55 = vand.u32 8388607, %v7529_v21  ;;  %v6242_v28 = vor.u32 %v2113_v6, %v2112_v30  ;;  %v6244_v40 = vor.u32 %v2116_v44, %v2115_v9  ;;  %v7729_v19 = vld [vmem:[#allocation50_spill] sm:$0xff]  ;;  %v7730_v12 = vld [vmem:[#allocation55_spill] sm:$0xff] }
 0x1fe   : > { %v2120_v45 = vor.u32 %v2119_v5, %v2118_v48  ;;  %v3566_v3 = vmul.f32 %v6019_v8, %v6109_v56  ;;  %4133 = vtanh.f32 %v3641_v32  ;;  %v1763_v26 = vxor.u32 2147483648, %v1762_v29  ;;  %v7731_v5 = vld [vmem:[#allocation58_spill] sm:$0xff] }
 0x1ff   : > { %v3961_v17 = vmin.u32 %v2057_v0, %v6213_v18  ;;  %v3548_v61 = vadd.f32 %v3516_v13, %v3466_v14  ;;  %v1772_v50 = vadd.s32 3, %v1768_v11  ;;  %v3293_v23 = vadd.f32 %v3261_v43, %v3211_v24  ;;  %v7732_v14 = vld [vmem:[#allocation52_spill] sm:$0xff] }
 0x200   : > { %v6250_v60 = vadd.f32 %v3016_v59, %v6165_v10  ;;  %v6253_v36 = vadd.f32 %v6180_v15, %v2847_v54  ;;  %v3393_v47 = vmul.f32 %v5961_v4, %v6162_v33  ;;  %vm2127_vm13 = vcmp.lt.s32.totalorder %v7729_v19, 1 }
 0x201   : > { %vm2129_vm5 = vcmp.lt.s32.totalorder %v7729_v19, 3  ;;  %v3343_v56 = vrot.slane %v3311_v1, 4  ;;  %v2103_v32 = vor.u32 8388608, %v2102_v55  ;;  %v2135_v13 = vsel %vm2127_vm13, %v6242_v28, %v6244_v40 }
 0x202   : > { %v2137_v10 = vsel %vm2129_vm5, %v2120_v45, %v7730_v12  ;;  %v1764_v15 = vsel %vm1681_vm15, %v1763_v26, %v1762_v29  ;;  %v2059_v6 = vclz %v3961_v17  ;;  %v2139_v44 = vsel %vm2127_vm13, %v6244_v40, %v2120_v45 }
 0x203   : > { %v2141_v11 = vsel %vm2129_vm5, %v7732_v14, %v7731_v5  ;;  %v3598_v0 = vrot.slane %v3566_v3, 7  ;;  %v3375_v24 = vadd.f32 %v3343_v56, %v3293_v23  ;;  %v3068_v52 = vmul.f32 %v5864_v2, %v6250_v60 }
 0x204   : > { %vm2128_vm10 = vcmp.lt.s32.totalorder %v7729_v19, 2  ;;  %v3075_v29 = vmul.f32 %v5864_v2, %v6253_v36  ;;  %v3425_v30 = vrot.slane %v3393_v47, 5  ;;  %v3475_v9 = vmul.f32 %v6016_v42, %v6162_v33 }
 0x205   : > { %v2138_v48 = vsel %vm2128_vm10, %v2135_v13, %v2137_v10  ;;  %v1767_v54 = vsel %vm6197_vm9, %v7689_v58, %v1764_v15  ;;  %v6289_v43 = vmul.f32 %v6019_v8, %v6162_v33  ;;  %v2142_v1 = vsel %vm2128_vm10, %v2139_v44, %v2141_v11 }
 0x206   : > { %v6293_v59 = vshll.u32 %v2103_v32, 8  ;;  %v6295_v55 = vadd.f32 %v3598_v0, %v3548_v61  ;;  %v6297_v3 = vand.u32 3, %v1772_v50  ;;  %v6301_v26 = vadd.s32 %v6079_v51, %v6085_v38 }
 0x207   : > { %v3962_v17 = vadd.s32 4294967294, %v2059_v6  ;;  %v3457_v25 = vadd.f32 %v3425_v30, %v3375_v24  ;;  %v3100_v23 = vrot.slane %v3068_v52, 1  ;;  %v3107_v56 = vrot.slane %v3075_v29, 1 }
 0x208   : > { %v6304_v47 = vmul.u32.u64.low %v6293_v59, %v2138_v48  ;;  %v6305_v33 = vmul.u32.u64.high %v6293_v59, %v2138_v48, %v6304_v47  ;;  %4135 = vcosq.f32 %v1767_v54  ;;  %v3507_v50 = vrot.slane %v3475_v9, 6 }
 0x209   : > { %v6309_v32 = vmul.u32.u64.low %v6293_v59, %v2142_v1  ;;  %v6310_v61 = vmul.u32.u64.high %v6293_v59, %v2142_v1, %v6309_v32  ;;  %4137 = vsinq.f32 %v1767_v54  ;;  %v3589_v13 = vrot.slane %v6289_v43, 7  ;;  %v7733_v43 = vld [vmem:[#allocation44_spill] sm:$0xff] }
 0x20a   : > { %v3050_v51 = vmul.f32 %v5918_v46, %v6250_v60  ;;  %v3057_v38 = vmul.f32 %v5918_v46, %v6253_v36  ;;  %v3157_v12 = vmul.f32 %v5929_v16, %v6253_v36  ;;  %vm3963_vm2 = vcmp.lt.s32.totalorder %v3962_v17, 0 }
 0x20b   : > { %v6320_v15 = vpop.eup %4133  ;;  %v3539_v6 = vadd.f32 %v3507_v50, %v3457_v25  ;;  %v3150_v5 = vmul.f32 %v5929_v16, %v6250_v60  ;;  %v2132_v14 = vsel %vm2130_vm14, %v2120_v45, 2102212464  ;;  %v3239_v0 = vmul.f32 %v5934_v39, %v6253_v36 }
 0x20c   : > { %v3132_v44 = vadd.f32 %v3100_v23, %v3050_v51  ;;  %v3139_v11 = vadd.f32 %v3107_v56, %v3057_v38  ;;  %v3232_v24 = vmul.f32 %v5934_v39, %v6250_v60  ;;  %v2111_v52 = vshrl.u32 %v7586_v37, %v7726_v20  ;;  %v7734_v23 = vld [vmem:[#allocation64_spill] sm:$0xff] }
 0x20d   : > { %v3321_v29 = vmul.f32 %v5938_v22, %v6253_v36  ;;  %v6336_v30 = vmul.f32 %v5961_v4, %v6253_v36  ;;  %v6340_v45 = vmul.f32 %v6016_v42, %v6253_v36  ;;  %v6343_v9 = vsel %vm3963_vm2, 0, %v3962_v17  ;;  %v7735_v38 = vld [vmem:[#allocation60_spill] sm:$0xff] }
 0x20e   : > { %v3189_v48 = vrot.slane %v3157_v12, 2  ;;  %v2131_v54 = vsel %vm2127_vm13, %v2111_v52, %v6242_v28  ;;  %v2133_v20 = vsel %vm2129_vm5, %v6244_v40, %v2132_v14  ;;  %v7530_v1 = vand.u32 2147483647, %v7733_v43 }
 0x20f   : > { %v2153_v25 = vadd.s32 1, %v6305_v33  ;;  %v1385_v56 = vshrl.u32 %v7667_v57, %v7734_v23  ;;  %v1388_v17 = vshrl.u32 %v7670_v35, %v7734_v23  ;;  %v1391_v32 = vshrl.u32 %v7727_v41, %v7734_v23 }
 0x210   : > { %v3221_v50 = vadd.f32 %v3189_v48, %v3139_v11  ;;  %v2067_v28 = vsub.s32 4294967266, %v6343_v9  ;;  %v3182_v51 = vrot.slane %v3150_v5, 2  ;;  %vm2152_vm14 = vc.u32 %v6310_v61, %v6304_v47 }
 0x211   : > { %v2134_v40 = vsel %vm2128_vm10, %v2131_v54, %v2133_v20  ;;  %v1384_v12 = vshll.u32 %v7586_v37, %v7735_v38  ;;  %v1387_v14 = vshll.u32 %v7667_v57, %v7735_v38  ;;  %v1390_v52 = vshll.u32 %v7670_v35, %v7735_v38 }
 0x212   : > { %v3271_v21 = vrot.slane %v3239_v0, 3  ;;  %v3353_v11 = vrot.slane %v3321_v29, 4  ;;  %v3214_v48 = vadd.f32 %v3182_v51, %v3132_v44  ;;  %v1374_v5 = vand.u32 8388607, %v7530_v1 }
 0x213   : > { %v2154_v62 = vsel %vm2152_vm14, %v2153_v25, %v6305_v33  ;;  %v6373_v10 = vor.u32 %v1385_v56, %v1384_v12  ;;  %v6375_v19 = vor.u32 %v1388_v17, %v1387_v14  ;;  %v1392_v54 = vor.u32 %v1391_v32, %v1390_v52  ;;  %v7736_v17 = vld [vmem:[#allocation63_spill] sm:$0xff]  ;;  %v7739_v12 = vld [vmem:[#allocation76_spill] sm:$0xff]  ;;  %v7740_v14 = vld [vmem:[#allocation70_spill] sm:$0xff] }
 0x214   : > { %v3303_v20 = vadd.f32 %v3271_v21, %v3221_v50  ;;  %v3435_v31 = vrot.slane %v6336_v30, 5  ;;  %vm1775_vm12 = vcmp.eq.s32.totalorder %v6297_v3, 0  ;;  %vm1778_vm8 = vcmp.eq.s32.totalorder %v6297_v3, 2 }
 0x215   : > { %v2068_v0 = vadd.s32 127, %v2067_v28  ;;  %v2150_v44 = vmul.u32 %v6293_v59, %v2134_v40  ;;  %v4136_v29 = vpop.eup %4135  ;;  %v3621_v51 = vadd.f32 %v3589_v13, %v3539_v6  ;;  %v3264_v38 = vrot.slane %v3232_v24, 3  ;;  %v7737_v24 = vld [vmem:[#allocation75_spill] sm:$0xff] }
 0x216   : > { %v3314_v33 = vmul.f32 %v5938_v22, %v6250_v60  ;;  %v3396_v25 = vmul.f32 %v5961_v4, %v6250_v60  ;;  %v4138_v56 = vpop.eup %4137  ;;  %v2063_v21 = vsub.s32 32, %v6343_v9  ;;  %vm1399_vm3 = vcmp.lt.s32.totalorder %v7736_v17, 1 }
 0x217   : > { %v6386_v30 = vadd.s32 %v2154_v62, %v2150_v44  ;;  %vm1401_vm0 = vcmp.lt.s32.totalorder %v7736_v17, 3  ;;  %vm1774_vm1 = vcmp.lt.s32.totalorder %v6297_v3, 2  ;;  %v3296_v59 = vadd.f32 %v3264_v38, %v3214_v48  ;;  %v7738_v62 = vld [vmem:[#allocation19_spill] sm:$0xff] }
 0x218   : > { %v1375_v13 = vor.u32 8388608, %v1374_v5  ;;  %v1407_v6 = vsel %vm1399_vm3, %v6373_v10, %v6375_v19  ;;  %v1409_v32 = vsel %vm1401_vm0, %v1392_v54, %v7737_v24  ;;  %v3385_v50 = vadd.f32 %v3353_v11, %v3303_v20 }
 0x219   : > { %vm1993_vm6 = vcmp.lt.s32.totalorder %v7738_v62, 0  ;;  %v2069_v28 = vshll.u32 %v2068_v0, 23  ;;  %v1411_v40 = vsel %vm1399_vm3, %v6375_v19, %v1392_v54  ;;  %v1413_v52 = vsel %vm1401_vm0, %v7740_v14, %v7739_v12 }
 0x21a   : > { %v1776_v48 = vxor.u32 2147483648, %v4138_v56  ;;  %v1779_v5 = vxor.u32 2147483648, %v4136_v29  ;;  %v3346_v44 = vrot.slane %v3314_v33, 4  ;;  %vm1400_vm11 = vcmp.lt.s32.totalorder %v7736_v17, 2 }
 0x21b   : > { %vm1771_vm7 = vweird.f32 %v7689_v58  ;;  %v2065_v11 = vshrl.u32 %v6301_v26, %v2063_v21  ;;  %v3639_v20 = vadd.f32 %v6107_v7, %v3621_v51  ;;  %v2156_v0 = vadd.s32 536870912, %v6386_v30 }
 0x21c   : > { %v1410_v38 = vsel %vm1400_vm11, %v1407_v6, %v1409_v32  ;;  %v3378_v24 = vadd.f32 %v3346_v44, %v3296_v59  ;;  %v3478_v12 = vmul.f32 %v6016_v42, %v6250_v60  ;;  %v1414_v33 = vsel %vm1400_vm11, %v1411_v40, %v1413_v52 }
 0x21d   : > { %v6417_v14 = vshll.u32 %v1375_v13, 8  ;;  %v3467_v1 = vadd.f32 %v3435_v31, %v3385_v50  ;;  %v2064_v26 = vshll.u32 %v6213_v18, %v6343_v9  ;;  %v2070_v21 = vor.u32 4788187, %v2069_v28 }
 0x21e   : > { %v3428_v51 = vrot.slane %v3396_v25, 5  ;;  %v1777_v43 = vsel %vm1775_vm12, %v4136_v29, %v1776_v48  ;;  %v1780_v59 = vsel %vm1778_vm8, %v1779_v5, %v4138_v56  ;;  %v6430_v13 = vshrl.u32 %v2156_v0, 30  ;;  %v2865_v29 = vld [vmem:[%s4397_s14 + $0x60] sm:$0xff] }
 0x21f   : > { %v6426_v6 = vmul.u32.u64.low %v6417_v14, %v1410_v38  ;;  %v6427_v32 = vmul.u32.u64.high %v6417_v14, %v1410_v38, %v6426_v6  ;;  %v2066_v40 = vor.u32 %v2065_v11, %v2064_v26  ;;  %v3567_v18 = vmul.f32 %v6019_v8, %v6253_v36 }
 0x220   : > { %v6433_v31 = vmul.u32.u64.low %v6417_v14, %v1414_v33  ;;  %v6434_v50 = vmul.u32.u64.high %v6417_v14, %v1414_v33, %v6433_v31  ;;  %v7741_v9 = vand.u32 2147483647, %v7738_v62  ;;  %4139 = vtanh.f32 %v3639_v20 }
 0x221   : > { %v3460_v25 = vadd.f32 %v3428_v51, %v3378_v24  ;;  %v3560_v56 = vmul.f32 %v6019_v8, %v6250_v60  ;;  %v3690_v28 = vrot.slane %v6320_v15, 6  ;;  %v3517_v52 = vrot.slane %v6340_v45, 6  ;;  %v7747_v51 = vld [vmem:[#allocation61_spill] sm:$0xff] }
 0x222   : > { %vm6440_vm15 = vcmp.le.f32.partialorder %v7741_v9, 0.7853982  ;;  %v1781_v48 = vsel %vm1774_vm1, %v1777_v43, %v1780_v59  ;;  %v2071_v5 = vand.u32 2147483647, %v2070_v21  ;;  %v6452_v36 = vadd.f32 %v6107_v7, %v6295_v55  ;;  %v2983_v21 = vpop.permute.xlu0 %2982  ;;  %v7748_v9 = vld [vmem:[#allocation59_spill] sm:$0xff] }
 0x223   : > { %v7744_v44 = vsub.s32 4, %v6174_v53  ;;  %v3510_v20 = vrot.slane %v3478_v12, 6  ;;  %vm7745_vm4 = vcmp.lt.s32.totalorder %v7736_v17, 4  ;;  %v3549_v0 = vadd.f32 %v3517_v52, %v3467_v1 }
 0x224   : > { %v1404_v60 = vsel %vm7745_vm4, %v1392_v54, 2102212464  ;;  %v2073_v45 = vcvt.s32.f32 %v2066_v40  ;;  %v2158_v3 = vshll.u32 %v6430_v13, 30  ;;  %v1383_v43 = vshrl.u32 %v7586_v37, %v7734_v23  ;;  %v7746_v54 = vld [vmem:[#allocation43_spill] sm:$0xff] }
 0x225   : > { %v2078_v11 = vsel %vm1993_vm6, %v7744_v44, %v6174_v53  ;;  %v3599_v38 = vrot.slane %v3567_v18, 7  ;;  %v1782_v55 = vsel %vm1771_vm7, nan, %v1781_v48  ;;  %v3542_v24 = vadd.f32 %v3510_v20, %v3460_v25  ;;  %v2861_v44 = vld [vmem:[%s4397_s14 + $0x40] sm:$0xff] }
 0x226   : > { %v3592_v33 = vrot.slane %v3560_v56, 7  ;;  %v2074_v26 = vmul.f32 %v2073_v45, %v2071_v5  ;;  %v1403_v53 = vsel %vm1399_vm3, %v1383_v43, %v6373_v10  ;;  %v1405_v1 = vsel %vm1401_vm0, %v6375_v19, %v1404_v60  ;;  %v2995_v43 = vpop.permute.xlu1 %2994 }
 0x227   : > { %v7532_v12 = vand.u32 2147483647, %v7746_v54  ;;  %v1425_v23 = vadd.s32 1, %v6427_v32  ;;  %v2217_v58 = vshrl.u32 %v7667_v57, %v7747_v51  ;;  %v2220_v59 = vshrl.u32 %v7670_v35, %v7747_v51 }
 0x228   : > { %v2223_v40 = vshrl.u32 %v7727_v41, %v7747_v51  ;;  %v3631_v10 = vadd.f32 %v3599_v38, %v3549_v0  ;;  %v2519_v31 = vmul.f32 0.1, %v1782_v55  ;;  %v6481_v18 = vsub.s32 %v6386_v30, %v2158_v3 }
 0x229   : > { %vm1424_vm9 = vc.u32 %v6434_v50, %v6426_v6  ;;  %v1406_v19 = vsel %vm1400_vm11, %v1403_v53, %v1405_v1  ;;  %v2216_v25 = vshll.u32 %v7586_v37, %v7748_v9  ;;  %v2219_v56 = vshll.u32 %v7667_v57, %v7748_v9 }
 0x22a   : > { %v2222_v52 = vshll.u32 %v7670_v35, %v7748_v9  ;;  %v2075_v48 = vxor.u32 2147483648, %v2074_v26  ;;  %v2080_v30 = vsel %vm6440_vm15, 0, %v2078_v11  ;;  %v3624_v5 = vadd.f32 %v3592_v33, %v3542_v24  ;;  %v7752_v9 = vld [vmem:[#allocation73_spill] sm:$0xff] }
 0x22b   : > { %v2206_v20 = vand.u32 8388607, %v7532_v12  ;;  %v1426_v17 = vsel %vm1424_vm9, %v1425_v23, %v6427_v32  ;;  %v6499_v60 = vor.u32 %v2217_v58, %v2216_v25  ;;  %v6501_v0 = vor.u32 %v2220_v59, %v2219_v56  ;;  %v6507_v32 = vpop.permute.xlu0 %2822  ;;  %v7751_v59 = vld [vmem:[#allocation72_spill] sm:$0xff]  ;;  %v7753_v25 = vld [vmem:[#allocation69_spill] sm:$0xff] }
 0x22c   : > { %v2224_v45 = vor.u32 %v2223_v40, %v2222_v52  ;;  %v2845_v3 = vmul.f32 %v6125_v63, %v2519_v31  ;;  %vm3688_vm13 = vcmask 1041409   ;;  %v2161_v38 = vsub.s32 0, %v6481_v18  ;;  %7749 = vst [vmem:[#allocation21_spill] sm:$0xff] %v6507_v32  ;;  %v7750_v63 = vld [vmem:[#allocation62_spill] sm:$0xff] }
 0x22d   : > { %v1422_v11 = vmul.u32 %v6417_v14, %v1406_v19  ;;  %v3649_v55 = vadd.f32 %v6107_v7, %v3631_v10  ;;  %v2084_v24 = vadd.s32 3, %v2080_v30  ;;  %vm3691_vm5 = vcmask 1042434   ;;  %v4140_v53 = vpop.eup %4139  ;;  %v2864_v10 = vld [vmem:[%s4397_s14 + $0x58] sm:$0xff] }
 0x22e   : > { %v3021_v33 = vmul.f32 %v2983_v21, %v2861_v44  ;;  %v2076_v1 = vsel %vm1993_vm6, %v2075_v48, %v2074_v26  ;;  %vm2231_vm10 = vcmp.lt.s32.totalorder %v7750_v63, 1  ;;  %vm2233_vm2 = vcmp.lt.s32.totalorder %v7750_v63, 3  ;;  %v2857_v44 = vld [vmem:[%s4397_s14 + $0x20] sm:$0xff] }
 0x22f   : > { %v6511_v23 = vadd.s32 %v1426_v17, %v1422_v11  ;;  %v3642_v14 = vadd.f32 %v6107_v7, %v3624_v5  ;;  %v2207_v58 = vor.u32 8388608, %v2206_v20  ;;  %v2239_v21 = vsel %vm2231_vm10, %v6499_v60, %v6501_v0  ;;  %v2967_v20 = vpop.permute.xlu1 %2966 }
 0x230   : > { %v2241_v40 = vsel %vm2233_vm2, %v2224_v45, %v7751_v59  ;;  %v3037_v26 = vadd.f32 %v3021_v33, %v2845_v3  ;;  %v3965_v31 = vmin.u32 %v2161_v38, %v6481_v18  ;;  %v2243_v19 = vsel %vm2231_vm10, %v6501_v0, %v2224_v45  ;;  %v2999_v38 = vpop.permute.xlu0 %2998 }
 0x231   : > { %v2245_v56 = vsel %vm2233_vm2, %v7753_v25, %v7752_v9  ;;  %4141 = vtanh.f32 %v6452_v36  ;;  %v2079_v52 = vsel %vm6440_vm15, %v7738_v62, %v2076_v1  ;;  %v7754_v48 = vrot.slane %v6183_v27, 7 }
 0x232   : > { %vm2232_vm14 = vcmp.lt.s32.totalorder %v7750_v63, 2  ;;  %4143 = vtanh.f32 %v3649_v55  ;;  %v6540_v5 = vand.u32 3, %v2084_v24  ;;  %v1428_v17 = vadd.s32 536870912, %v6511_v23 }
 0x233   : > { %v3689_v30 = vsel %vm3688_vm13, %v7754_v48, %v4140_v53  ;;  %v2242_v36 = vsel %vm2232_vm14, %v2239_v21, %v2241_v40  ;;  %4145 = vtanh.f32 %v3642_v14  ;;  %v6546_v3 = vmul.f32 %v2995_v43, %v2864_v10  ;;  %v7758_v10 = vld [vmem:[#allocation54_spill] sm:$0xff]  ;;  %v7760_v48 = vld [vmem:[#allocation81_spill] sm:$0xff] }
 0x234   : > { %v2246_v27 = vsel %vm2232_vm14, %v2243_v19, %v2245_v56  ;;  %v6551_v11 = vshll.u32 %v2207_v58, 8  ;;  %4147 = vcosq.f32 %v2079_v52  ;;  %v6556_v55 = vsel %vm3691_vm5, %v3690_v28, %v3689_v30 }
 0x235   : > { %7755 = vst [vmem:[#allocation27_spill] sm:$0xff] %v6556_v55  ;;  %v3073_v24 = vmul.f32 %v5864_v2, %v3037_v26  ;;  %v2163_v33 = vclz %v3965_v31  ;;  %4149 = vsinq.f32 %v2079_v52  ;;  %v3017_v53 = vmul.f32 %v2967_v20, %v2857_v44 }
 0x236   : > { %v6560_v43 = vmul.u32.u64.low %v6551_v11, %v2242_v36  ;;  %v6561_v1 = vmul.u32.u64.high %v6551_v11, %v2242_v36, %v6560_v43  ;;  %v6564_v14 = vmul.f32 %v2999_v38, %v2865_v29  ;;  %v6566_v58 = vshrl.u32 %v1428_v17, 30 }
 0x237   : > { %v6569_v21 = vmul.u32.u64.low %v6551_v11, %v2246_v27  ;;  %v6570_v15 = vmul.u32.u64.high %v6551_v11, %v2246_v27, %v6569_v21  ;;  %v3055_v28 = vmul.f32 %v5918_v46, %v3037_v26  ;;  %v3155_v59 = vmul.f32 %v5929_v16, %v3037_v26  ;;  %v7762_v27 = vld [vmem:[#allocation79_spill] sm:$0xff] }
 0x238   : > { %7756 = vst [vmem:[#allocation30_spill] sm:$0xff] %v6560_v43  ;;  %7757 = vst [vmem:[#allocation28_spill] sm:$0xff] %v6564_v14  ;;  %v6575_v40 = vmul.f32 %v5934_v39, %v3037_v26  ;;  %v7533_v31 = vand.u32 2147483647, %v7758_v10  ;;  %v3105_v19 = vrot.slane %v3073_v24, 1  ;;  %v6579_v9 = vmul.f32 %v5938_v22, %v3037_v26 }
 0x239   : > { %v6582_v25 = vmul.f32 %v5961_v4, %v3037_v26  ;;  %v3966_v56 = vadd.s32 4294967294, %v2163_v33  ;;  %vm7759_vm12 = vcmp.lt.s32.totalorder %v7750_v63, 4  ;;  %v1489_v30 = vshrl.u32 %v7667_v57, %v7760_v48 }
 0x23a   : > { %v2236_v52 = vsel %vm7759_vm12, %v2224_v45, 2102212464  ;;  %v1492_v44 = vshrl.u32 %v7670_v35, %v7760_v48  ;;  %v1495_v20 = vshrl.u32 %v7727_v41, %v7760_v48  ;;  %v6593_v17 = vmul.f32 %v6016_v42, %v3037_v26 }
 0x23b   : > { %v6596_v36 = vmul.f32 %v6019_v8, %v3037_v26  ;;  %v1430_v29 = vshll.u32 %v6566_v58, 30  ;;  %v2215_v45 = vshrl.u32 %v7586_v37, %v7747_v51  ;;  %v1478_v38 = vand.u32 8388607, %v7533_v31 }
 0x23c   : > { %v1488_v24 = vshll.u32 %v7586_v37, %v7762_v27  ;;  %v1491_v33 = vshll.u32 %v7667_v57, %v7762_v27  ;;  %v1494_v21 = vshll.u32 %v7670_v35, %v7762_v27  ;;  %v3137_v12 = vadd.f32 %v3105_v19, %v3055_v28 }
 0x23d   : > { %7761 = vst [vmem:[#allocation29_spill] sm:$0xff] %v6596_v36  ;;  %vm3967_vm8 = vcmp.lt.s32.totalorder %v3966_v56, 0  ;;  %v2235_v26 = vsel %vm2231_vm10, %v2215_v45, %v6499_v60  ;;  %v2237_v51 = vsel %vm2233_vm2, %v6501_v0, %v2236_v52  ;;  %v2257_v31 = vadd.s32 1, %v6561_v1  ;;  %v7767_v45 = vld [vmem:[#allocation32_spill] sm:$0xff] }
 0x23e   : > { %v1490_v55 = vor.u32 %v1489_v30, %v1488_v24  ;;  %v1493_v14 = vor.u32 %v1492_v44, %v1491_v33  ;;  %v1496_v32 = vor.u32 %v1495_v20, %v1494_v21  ;;  %v6616_v54 = vpop.eup %4141  ;;  %v3187_v10 = vrot.slane %v3155_v59, 2 }
 0x23f   : > { %7763 = vst [vmem:[#allocation71_spill] sm:$0xff] %v6616_v54  ;;  %v3269_v27 = vrot.slane %v6575_v40, 3  ;;  %v6620_v28 = vsub.s32 %v6511_v23, %v1430_v29  ;;  %vm2256_vm3 = vc.u32 %v6570_v15, %v6560_v43  ;;  %v6624_v60 = vpop.eup %4143  ;;  %v6627_v19 = vsel %vm3967_vm8, 0, %v3966_v56  ;;  %v7766_v40 = vld [vmem:[#allocation78_spill] sm:$0xff] }
 0x240   : > { %7764 = vst [vmem:[#allocation83_spill] sm:$0xff] %v6624_v60  ;;  %v2238_v52 = vsel %vm2232_vm14, %v2235_v26, %v2237_v51  ;;  %v1479_v30 = vor.u32 8388608, %v1478_v38  ;;  %v6631_v44 = vpop.eup %4145  ;;  %vm2087_vm0 = vcmp.eq.s32.totalorder %v6540_v5, 0  ;;  %vm2090_vm1 = vcmp.eq.s32.totalorder %v6540_v5, 2 }
 0x241   : > { %7765 = vst [vmem:[#allocation16_spill] sm:$0xff] %v6631_v44  ;;  %v6637_v59 = vadd.f32 %v3017_v53, %v6204_v34  ;;  %vm1503_vm6 = vcmp.lt.s32.totalorder %v7766_v40, 1  ;;  %vm1505_vm11 = vcmp.lt.s32.totalorder %v7766_v40, 3  ;;  %v4148_v56 = vpop.eup %4147  ;;  %v3219_v20 = vadd.f32 %v3187_v10, %v3137_v12  ;;  %v7770_v10 = vld [vmem:[#allocation36_spill] sm:$0xff] }
 0x242   : > { %v2258_v63 = vsel %vm2256_vm3, %v2257_v31, %v6561_v1  ;;  %v1511_v29 = vsel %vm1503_vm6, %v1490_v55, %v1493_v14  ;;  %v1513_v38 = vsel %vm1505_vm11, %v1496_v32, %v7767_v45  ;;  %v4150_v24 = vpop.eup %4149  ;;  %v2171_v33 = vsub.s32 4294967266, %v6627_v19  ;;  %v7769_v1 = vld [vmem:[#allocation23_spill] sm:$0xff] }
 0x243   : > { %v1433_v34 = vsub.s32 0, %v6620_v28  ;;  %v2254_v53 = vmul.u32 %v6551_v11, %v2238_v52  ;;  %v1515_v21 = vsel %vm1503_vm6, %v1493_v14, %v1496_v32  ;;  %vm2086_vm7 = vcmp.lt.s32.totalorder %v6540_v5, 2 }
 0x244   : > { %vm1504_vm15 = vcmp.lt.s32.totalorder %v7766_v40, 2  ;;  %vm7768_vm4 = vcmp.lt.s32.totalorder %v7766_v40, 4  ;;  %v1517_v31 = vsel %vm1505_vm11, %v7770_v10, %v7769_v1  ;;  %v1519_v26 = vshll.u32 %v1479_v30, 8 }
 0x245   : > { %v1508_v12 = vsel %vm7768_vm4, %v1496_v32, 2102212464  ;;  %v6660_v51 = vadd.s32 %v2258_v63, %v2254_v53  ;;  %v1487_v11 = vshrl.u32 %v7586_v37, %v7760_v48  ;;  %v1514_v52 = vsel %vm1504_vm15, %v1511_v29, %v1513_v38 }
 0x246   : > { %v1518_v45 = vsel %vm1504_vm15, %v1515_v21, %v1517_v31  ;;  %v2088_v23 = vxor.u32 2147483648, %v4150_v24  ;;  %v2091_v0 = vxor.u32 2147483648, %v4148_v56  ;;  %v3937_v30 = vmin.u32 %v1433_v34, %v6620_v28 }
 0x247   : > { %v6668_v32 = vmul.u32.u64.low %v1519_v26, %v1518_v45  ;;  %v6669_v60 = vmul.u32.u64.high %v1519_v26, %v1518_v45, %v6668_v32  ;;  %v1507_v63 = vsel %vm1503_vm6, %v1487_v11, %v1490_v55  ;;  %v1509_v48 = vsel %vm1505_vm11, %v1493_v14, %v1508_v12 }
 0x248   : > { %v3069_v38 = vmul.f32 %v5864_v2, %v6637_v59  ;;  %v6680_v53 = vmul.u32.u64.low %v1519_v26, %v1514_v52  ;;  %v6681_v21 = vmul.u32.u64.high %v1519_v26, %v1514_v52, %v6680_v53  ;;  %vm2083_vm9 = vweird.f32 %v7738_v62 }
 0x249   : > { %v2151_v34 = vadd.s32 %v6304_v47, %v6310_v61  ;;  %v2172_v1 = vadd.s32 127, %v2171_v33  ;;  %v3051_v55 = vmul.f32 %v5918_v46, %v6637_v59  ;;  %v2260_v14 = vadd.s32 536870912, %v6660_v51  ;;  %v7771_v47 = vld [vmem:[#allocation53_spill] sm:$0xff] }
 0x24a   : > { %v2089_v12 = vsel %vm2087_vm0, %v4148_v56, %v2088_v23  ;;  %v2092_v10 = vsel %vm2090_vm1, %v2091_v0, %v4150_v24  ;;  %v3301_v31 = vadd.f32 %v3269_v27, %v3219_v20  ;;  %v1510_v11 = vsel %vm1504_vm15, %v1507_v63, %v1509_v48  ;;  %v7774_v48 = vld [vmem:[#allocation74_spill] sm:$0xff] }
 0x24b   : > { %v2167_v52 = vsub.s32 32, %v6627_v19  ;;  %v1435_v45 = vclz %v3937_v30  ;;  %vm1528_vm10 = vc.u32 %v6669_v60, %v6680_v53  ;;  %v3101_v33 = vrot.slane %v3069_v38, 1  ;;  %v7773_v30 = vld [vmem:[#allocation80_spill] sm:$0xff] }
 0x24c   : > { %v3151_v32 = vmul.f32 %v5929_v16, %v6637_v59  ;;  %v6704_v23 = vmul.f32 %v5934_v39, %v6637_v59  ;;  %v1529_v27 = vadd.s32 1, %v6681_v21  ;;  %v2093_v0 = vsel %vm2086_vm7, %v2089_v12, %v2092_v10 }
 0x24d   : > { %v2173_v40 = vshll.u32 %v2172_v1, 23  ;;  %v6709_v56 = vshrl.u32 %v2260_v14, 30  ;;  %v1526_v20 = vmul.u32 %v1519_v26, %v1510_v11  ;;  %v2321_v63 = vshrl.u32 %v7667_v57, %v7773_v30 }
 0x24e   : > { %v1530_v24 = vsel %vm1528_vm10, %v1529_v27, %v6681_v21  ;;  %v2323_v38 = vshll.u32 %v7667_v57, %v7774_v48  ;;  %v2324_v29 = vshrl.u32 %v7670_v35, %v7773_v30  ;;  %v2169_v54 = vshrl.u32 %v2151_v34, %v2167_v52 }
 0x24f   : > { %7772 = vst [vmem:[#allocation14_spill] sm:$0xff] %v6709_v56  ;;  %v3938_v61 = vadd.s32 4294967294, %v1435_v45  ;;  %v1531_v44 = vadd.s32 %v1530_v24, %v1526_v20  ;;  %v7775_v5 = vand.u32 2147483647, %v7771_v47  ;;  %v2320_v26 = vshll.u32 %v7586_v37, %v7774_v48 }
 0x250   : > { %v6722_v14 = vor.u32 %v2324_v29, %v2323_v38  ;;  %v2326_v21 = vshll.u32 %v7670_v35, %v7774_v48  ;;  %v2327_v12 = vshrl.u32 %v7727_v41, %v7773_v30  ;;  %v2168_v10 = vshll.u32 %v6481_v18, %v6627_v19  ;;  %v7777_v38 = vld [vmem:[#allocation77_spill] sm:$0xff]  ;;  %v7778_v19 = vld [vmem:[#allocation18_spill] sm:$0xff] }
 0x251   : > { %v2310_v1 = vand.u32 8388607, %v7775_v5  ;;  %v2174_v34 = vor.u32 4788187, %v2173_v40  ;;  %v2262_v11 = vshll.u32 %v6709_v56, 30  ;;  %v1532_v52 = vadd.s32 536870912, %v1531_v44 }
 0x252   : > { %v2094_v45 = vsel %vm2083_vm9, nan, %v2093_v0  ;;  %v6735_v29 = vmul.f32 %v5938_v22, %v6637_v59  ;;  %v2322_v27 = vor.u32 %v2321_v63, %v2320_v26  ;;  %v2328_v20 = vor.u32 %v2327_v12, %v2326_v21  ;;  %v7779_v0 = vld [vmem:[#allocation33_spill] sm:$0xff] }
 0x253   : > { %v2170_v24 = vor.u32 %v2169_v54, %v2168_v10  ;;  %v6737_v48 = vshrl.u32 %v1532_v52, 30  ;;  %vm2335_vm2 = vcmp.lt.s32.totalorder %v7777_v38, 1  ;;  %vm2337_vm14 = vcmp.lt.s32.totalorder %v7777_v38, 3  ;;  %v7780_v12 = vld [vmem:[#allocation17_spill] sm:$0xff] }
 0x254   : > { %vm3939_vm12 = vcmp.lt.s32.totalorder %v3938_v61, 0  ;;  %v2311_v18 = vor.u32 8388608, %v2310_v1  ;;  %v2347_v62 = vsel %vm2335_vm2, %v6722_v14, %v2328_v20  ;;  %v2349_v40 = vsel %vm2337_vm14, %v7779_v0, %v7778_v19 }
 0x255   : > { %7776 = vst [vmem:[#allocation20_spill] sm:$0xff] %v6737_v48  ;;  %v2175_v63 = vand.u32 2147483647, %v2174_v34  ;;  %v3133_v5 = vadd.f32 %v3101_v33, %v3051_v55  ;;  %v6749_v54 = vsub.s32 %v6660_v51, %v2262_v11  ;;  %v1534_v26 = vshll.u32 %v6737_v48, 30 }
 0x256   : > { %v2522_v21 = vmul.f32 0.1, %v2094_v45  ;;  %vm2336_vm8 = vcmp.lt.s32.totalorder %v7777_v38, 2  ;;  %v2343_v1 = vsel %vm2335_vm2, %v2322_v27, %v6722_v14  ;;  %v2345_v10 = vsel %vm2337_vm14, %v2328_v20, %v7780_v12 }
 0x257   : > { %vm2097_vm3 = vcmp.lt.s32.totalorder %v7725_v49, 0  ;;  %v2177_v34 = vcvt.s32.f32 %v2170_v24  ;;  %v6760_v55 = vsel %vm3939_vm12, 0, %v3938_v61  ;;  %v6762_v51 = vsub.s32 %v1531_v44, %v1534_v26 }
 0x258   : > { %v2350_v33 = vsel %vm2336_vm8, %v2347_v62, %v2349_v40  ;;  %v7781_v11 = vrot.slane %v6579_v9, 4  ;;  %v3183_v45 = vrot.slane %v3151_v32, 2  ;;  %v3397_v19 = vmul.f32 %v5961_v4, %v6637_v59  ;;  %v7785_v40 = vld [vmem:[#allocation24_spill] sm:$0xff] }
 0x259   : > { %v6770_v0 = vshll.u32 %v2311_v18, 8  ;;  %v2178_v12 = vmul.f32 %v2177_v34, %v2175_v63  ;;  %v2265_v36 = vsub.s32 0, %v6749_v54  ;;  %v1537_v61 = vsub.s32 0, %v6762_v51 }
 0x25a   : > { %v3383_v52 = vadd.f32 %v7781_v11, %v3301_v31  ;;  %v2346_v44 = vsel %vm2336_vm8, %v2343_v1, %v2345_v10  ;;  %v7782_v24 = vand.u32 2147483647, %v7725_v49  ;;  %v3215_v9 = vadd.f32 %v3183_v45, %v3133_v5 }
 0x25b   : > { %v1443_v31 = vsub.s32 4294967266, %v6760_v55  ;;  %v6784_v32 = vmul.u32.u64.low %v6770_v0, %v2350_v33  ;;  %v6785_v18 = vmul.u32.u64.high %v6770_v0, %v2350_v33, %v6784_v32  ;;  %v2848_v63 = vmul.f32 %v7785_v40, %v2522_v21 }
 0x25c   : > { %vm6778_vm0 = vcmp.le.f32.partialorder %v7782_v24, 0.7853982  ;;  %v3265_v26 = vrot.slane %v6704_v23, 3  ;;  %v6791_v1 = vmul.f32 %v6016_v42, %v6637_v59  ;;  %v3941_v10 = vmin.u32 %v1537_v61, %v6762_v51 }
 0x25d   : > { %v2181_v34 = vsub.s32 4, %v6430_v13  ;;  %v3347_v5 = vrot.slane %v6735_v29, 4  ;;  %v6797_v11 = vmul.u32.u64.low %v6770_v0, %v2346_v44  ;;  %v6798_v45 = vmul.u32.u64.high %v6770_v0, %v2346_v44, %v6797_v11 }
 0x25e   : > { %v2179_v33 = vxor.u32 2147483648, %v2178_v12  ;;  %v3969_v21 = vmin.u32 %v2265_v36, %v6749_v54  ;;  %v1539_v24 = vclz %v3941_v10  ;;  %vm7786_vm1 = vcmp.lt.s32.totalorder %v7777_v38, 4  ;;  %v7789_v10 = vld [vmem:[#allocation44_spill] sm:$0xff] }
 0x25f   : > { %v2340_v23 = vsel %vm7786_vm1, %v2328_v20, 2102212464  ;;  %v7787_v32 = vrot.slane %v6582_v25, 5  ;;  %v3297_v61 = vadd.f32 %v3265_v26, %v3215_v9  ;;  %v1444_v47 = vadd.s32 127, %v1443_v31 }
 0x260   : > { %v2319_v29 = vshrl.u32 %v7586_v37, %v7773_v30  ;;  %v6809_v56 = vadd.f32 %v6546_v3, %v2848_v63  ;;  %v3429_v44 = vrot.slane %v3397_v19, 5  ;;  %v1439_v48 = vsub.s32 32, %v6760_v55 }
 0x261   : > { %v3465_v40 = vadd.f32 %v7787_v32, %v3383_v52  ;;  %v3942_v43 = vadd.s32 4294967294, %v1539_v24  ;;  %v2182_v36 = vsel %vm2097_vm3, %v2181_v34, %v6430_v13  ;;  %v6817_v25 = vmul.f32 %v6019_v8, %v6637_v59 }
 0x262   : > { %v2339_v20 = vsel %vm2335_vm2, %v2319_v29, %v2322_v27  ;;  %v2341_v3 = vsel %vm2337_vm14, %v6722_v14, %v2340_v23  ;;  %v2180_v30 = vsel %vm2097_vm3, %v2179_v33, %v2178_v12  ;;  %v1423_v52 = vadd.s32 %v6426_v6, %v6434_v50 }
 0x263   : > { %v2267_v19 = vclz %v3969_v21  ;;  %v2361_v13 = vadd.s32 1, %v6798_v45  ;;  %v3379_v9 = vadd.f32 %v3347_v5, %v3297_v61  ;;  %v1445_v31 = vshll.u32 %v1444_v47, 23 }
 0x264   : > { %vm3943_vm6 = vcmp.lt.s32.totalorder %v3942_v43, 0  ;;  %vm2360_vm11 = vc.u32 %v6785_v18, %v6797_v11  ;;  %v3076_v59 = vmul.f32 %v5864_v2, %v6809_v56  ;;  %v2184_v14 = vsel %vm6778_vm0, 0, %v2182_v36 }
 0x265   : > { %v1441_v27 = vshrl.u32 %v1423_v52, %v1439_v48  ;;  %v2342_v12 = vsel %vm2336_vm8, %v2339_v20, %v2341_v3  ;;  %v7788_v6 = vrot.slane %v6593_v17, 6  ;;  %v2183_v47 = vsel %vm6778_vm0, %v7725_v49, %v2180_v30 }
 0x266   : > { %v3511_v63 = vrot.slane %v6791_v1, 6  ;;  %v3593_v26 = vrot.slane %v6817_v25, 7  ;;  %vm1369_vm7 = vcmp.lt.s32.totalorder %v7789_v10, 0  ;;  %v1440_v48 = vshll.u32 %v6620_v28, %v6760_v55 }
 0x267   : > { %v6839_v50 = vadd.f32 %v7788_v6, %v3465_v40  ;;  %v3970_v34 = vadd.s32 4294967294, %v2267_v19  ;;  %v1542_v38 = vsel %vm3943_vm6, 0, %v3942_v43  ;;  %v2362_v5 = vsel %vm2360_vm11, %v2361_v13, %v6798_v45 }
 0x268   : > { %v2188_v17 = vadd.s32 3, %v2184_v14  ;;  %v3461_v33 = vadd.f32 %v3429_v44, %v3379_v9  ;;  %v1446_v21 = vor.u32 4788187, %v1445_v31  ;;  %v2358_v24 = vmul.u32 %v6770_v0, %v2342_v12 }
 0x269   : > { %v3058_v62 = vmul.f32 %v5918_v46, %v6809_v56  ;;  %v3108_v1 = vrot.slane %v3076_v59, 1  ;;  %4151 = vcosq.f32 %v2183_v47  ;;  %v1442_v23 = vor.u32 %v1441_v27, %v1440_v48 }
 0x26a   : > { %v3158_v32 = vmul.f32 %v5929_v16, %v6809_v56  ;;  %v7790_v28 = vand.u32 2147483647, %v7789_v10  ;;  %v1543_v55 = vsub.s32 32, %v1542_v38  ;;  %v1547_v45 = vsub.s32 4294967266, %v1542_v38 }
 0x26b   : > { %v2363_v40 = vadd.s32 %v2362_v5, %v2358_v24  ;;  %v3240_v0 = vmul.f32 %v5934_v39, %v6809_v56  ;;  %v6865_v61 = vmul.f32 %v5938_v22, %v6809_v56  ;;  %v1453_v29 = vsub.s32 4, %v6566_v58  ;;  %v7793_v24 = vld [vmem:[#allocation68_spill] sm:$0xff] }
 0x26c   : > { %vm6857_vm15 = vcmp.le.f32.partialorder %v7790_v28, 0.7853982  ;;  %vm3971_vm4 = vcmp.lt.s32.totalorder %v3970_v34, 0  ;;  %v1447_v44 = vand.u32 2147483647, %v1446_v21  ;;  %v1527_v36 = vadd.s32 %v6680_v53, %v6669_v60 }
 0x26d   : > { %v1548_v25 = vadd.s32 127, %v1547_v45  ;;  %v2364_v20 = vadd.s32 536870912, %v2363_v40  ;;  %v3140_v3 = vadd.f32 %v3108_v1, %v3058_v62  ;;  %4153 = vsinq.f32 %v2183_v47 }
 0x26e   : > { %v3543_v30 = vadd.f32 %v3511_v63, %v3461_v33  ;;  %v1449_v52 = vcvt.s32.f32 %v1442_v23  ;;  %v6870_v19 = vsel %vm3971_vm4, 0, %v3970_v34  ;;  %v1545_v13 = vshrl.u32 %v1527_v36, %v1543_v55 }
 0x26f   : > { %v1549_v9 = vshll.u32 %v1548_v25, 23  ;;  %v6872_v31 = vshrl.u32 %v2364_v20, 30  ;;  %v3190_v59 = vrot.slane %v3158_v32, 2  ;;  %v6876_v14 = vmul.f32 %v5961_v4, %v6809_v56 }
 0x270   : > { %v6878_v27 = vand.u32 3, %v2188_v17  ;;  %v1454_v60 = vsel %vm1369_vm7, %v1453_v29, %v6566_v58  ;;  %v1450_v53 = vmul.f32 %v1449_v52, %v1447_v44  ;;  %v1544_v12 = vshll.u32 %v6762_v51, %v1542_v38  ;;  %v7794_v38 = vld [vmem:[#allocation85_spill] sm:$0xff]  ;;  %v7796_v52 = vld [vmem:[#allocation30_spill] sm:$0xff] }
 0x271   : > { %v1550_v6 = vor.u32 4788187, %v1549_v9  ;;  %v2366_v47 = vshll.u32 %v6872_v31, 30  ;;  %v3272_v63 = vrot.slane %v3240_v0, 3  ;;  %v3354_v48 = vrot.slane %v6865_v61, 4  ;;  %v7795_v0 = vld [vmem:[#allocation26_spill] sm:$0xff] }
 0x272   : > { %v6888_v34 = vmul.f32 %v6016_v42, %v6809_v56  ;;  %v2275_v5 = vsub.s32 4294967266, %v6870_v19  ;;  %v3222_v17 = vadd.f32 %v3190_v59, %v3140_v3  ;;  %v3625_v33 = vadd.f32 %v3593_v26, %v3543_v30 }
 0x273   : > { %v1546_v21 = vor.u32 %v1545_v13, %v1544_v12  ;;  %v7543_v58 = vand.u32 2147483647, %v7793_v24  ;;  %v1456_v51 = vsel %vm6857_vm15, 0, %v1454_v60  ;;  %v1593_v62 = vshrl.u32 %v7667_v57, %v7794_v38 }
 0x274   : > { %v1596_v1 = vshrl.u32 %v7670_v35, %v7794_v38  ;;  %v1599_v23 = vshrl.u32 %v7727_v41, %v7794_v38  ;;  %v1451_v32 = vxor.u32 2147483648, %v1450_v53  ;;  %v2271_v28 = vsub.s32 32, %v6870_v19 }
 0x275   : > { %v1551_v55 = vand.u32 2147483647, %v1550_v6  ;;  %v6901_v26 = vsub.s32 %v2363_v40, %v2366_v47  ;;  %v2276_v45 = vadd.s32 127, %v2275_v5  ;;  %v1592_v29 = vshll.u32 %v7586_v37, %v7795_v0  ;;  %v7797_v6 = vld [vmem:[#allocation54_spill] sm:$0xff] }
 0x276   : > { %v1595_v44 = vshll.u32 %v7667_v57, %v7795_v0  ;;  %v1598_v36 = vshll.u32 %v7670_v35, %v7795_v0  ;;  %v6909_v25 = vpop.eup %4151  ;;  %v6911_v20 = vadd.f32 %v3272_v63, %v3222_v17  ;;  %v6914_v3 = vadd.f32 %v6107_v7, %v3625_v33  ;;  %v7803_v0 = vld [vmem:[#allocation65_spill] sm:$0xff] }
 0x277   : > { %v1553_v30 = vcvt.s32.f32 %v1546_v21  ;;  %v1582_v40 = vand.u32 8388607, %v7543_v58  ;;  %v2255_v13 = vadd.s32 %v7796_v52, %v6570_v15  ;;  %v1594_v9 = vor.u32 %v1593_v62, %v1592_v29  ;;  %v7804_v29 = vld [vmem:[#allocation56_spill] sm:$0xff] }
 0x278   : > { %v1597_v59 = vor.u32 %v1596_v1, %v1595_v44  ;;  %v1600_v60 = vor.u32 %v1599_v23, %v1598_v36  ;;  %v6920_v12 = vadd.s32 3, %v1456_v51  ;;  %vm1473_vm9 = vcmp.lt.s32.totalorder %v7797_v6, 0 }
 0x279   : > { %v1554_v47 = vmul.f32 %v1553_v30, %v1551_v55  ;;  %v2369_v63 = vsub.s32 0, %v6901_v26  ;;  %vm2194_vm10 = vcmp.eq.s32.totalorder %v6878_v27, 2  ;;  %v2195_v5 = vxor.u32 2147483648, %v6909_v25  ;;  %v7801_v55 = vld [vmem:[#allocation12_spill] sm:$0xff] }
 0x27a   : > { %v1452_v17 = vsel %vm1369_vm7, %v1451_v32, %v1450_v53  ;;  %v2273_v33 = vshrl.u32 %v2255_v13, %v2271_v28  ;;  %v2277_v21 = vshll.u32 %v2276_v45, 23  ;;  %v4154_v15 = vpop.eup %4153  ;;  %v7798_v62 = vand.u32 2147483647, %v7797_v6  ;;  %v7802_v32 = vld [vmem:[#allocation66_spill] sm:$0xff] }
 0x27b   : > { %v3973_v1 = vmin.u32 %v2369_v63, %v6901_v26  ;;  %v1583_v23 = vor.u32 8388608, %v1582_v40  ;;  %vm1607_vm14 = vcmp.lt.s32.totalorder %v7801_v55, 1  ;;  %vm1609_vm12 = vcmp.lt.s32.totalorder %v7801_v55, 3 }
 0x27c   : > { %vm6930_vm2 = vcmp.le.f32.partialorder %v7798_v62, 0.7853982  ;;  %vm2191_vm8 = vcmp.eq.s32.totalorder %v6878_v27, 0  ;;  %v1615_v53 = vsel %vm1607_vm14, %v1594_v9, %v1597_v59  ;;  %v1617_v28 = vsel %vm1609_vm12, %v1600_v60, %v7802_v32 }
 0x27d   : > { %v1619_v45 = vsel %vm1607_vm14, %v1597_v59, %v1600_v60  ;;  %v1621_v44 = vsel %vm1609_vm12, %v7804_v29, %v7803_v0  ;;  %v1555_v36 = vxor.u32 2147483648, %v1554_v47  ;;  %v2371_v30 = vclz %v3973_v1 }
 0x27e   : > { %vm1608_vm3 = vcmp.lt.s32.totalorder %v7801_v55, 2  ;;  %vm7805_vm0 = vcmp.lt.s32.totalorder %v7801_v55, 4  ;;  %v2272_v52 = vshll.u32 %v6749_v54, %v6870_v19  ;;  %v2278_v13 = vor.u32 4788187, %v2277_v21 }
 0x27f   : > { %v1612_v40 = vsel %vm7805_vm0, %v1600_v60, 2102212464  ;;  %v1591_v63 = vshrl.u32 %v7586_v37, %v7794_v38  ;;  %v1622_v62 = vsel %vm1608_vm3, %v1619_v45, %v1621_v44  ;;  %v2192_v32 = vxor.u32 2147483648, %v4154_v15 }
 0x280   : > { %v3974_v58 = vadd.s32 4294967294, %v2371_v30  ;;  %v1618_v1 = vsel %vm1608_vm3, %v1615_v53, %v1617_v28  ;;  %v1623_v0 = vshll.u32 %v1583_v23, 8  ;;  %v1455_v60 = vsel %vm6857_vm15, %v7789_v10, %v1452_v17 }
 0x281   : > { %v2274_v29 = vor.u32 %v2273_v33, %v2272_v52  ;;  %v1611_v54 = vsel %vm1607_vm14, %v1591_v63, %v1594_v9  ;;  %v1613_v19 = vsel %vm1609_vm12, %v1597_v59, %v1612_v40  ;;  %v1556_v38 = vsel %vm1473_vm9, %v1555_v36, %v1554_v47  ;;  %v7806_v36 = vld [vmem:[#allocation67_spill] sm:$0xff]  ;;  %v7807_v52 = vld [vmem:[#allocation20_spill] sm:$0xff] }
 0x282   : > { %vm3975_vm1 = vcmp.lt.s32.totalorder %v3974_v58, 0  ;;  %v6969_v21 = vmul.u32.u64.low %v1623_v0, %v1622_v62  ;;  %v6970_v45 = vmul.u32.u64.high %v1623_v0, %v1622_v62, %v6969_v21  ;;  %vm2190_vm6 = vcmp.lt.s32.totalorder %v6878_v27, 2 }
 0x283   : > { %v2279_v23 = vand.u32 2147483647, %v2278_v13  ;;  %v2374_v53 = vsel %vm3975_vm1, 0, %v3974_v58  ;;  %v6973_v43 = vmul.u32.u64.low %v1623_v0, %v1618_v1  ;;  %v6974_v17 = vmul.u32.u64.high %v1623_v0, %v1618_v1, %v6973_v43 }
 0x284   : > { %v2196_v9 = vsel %vm2194_vm10, %v2195_v5, %v4154_v15  ;;  %4155 = vcosq.f32 %v1455_v60  ;;  %v2375_v59 = vsub.s32 32, %v2374_v53  ;;  %v2379_v33 = vsub.s32 4294967266, %v2374_v53 }
 0x285   : > { %4157 = vsinq.f32 %v1455_v60  ;;  %v2281_v47 = vcvt.s32.f32 %v2274_v29  ;;  %v1559_v28 = vsel %vm6930_vm2, %v7797_v6, %v1556_v38  ;;  %v1614_v44 = vsel %vm1608_vm3, %v1611_v54, %v1613_v19  ;;  %v7809_v38 = vld [vmem:[#allocation25_spill] sm:$0xff] }
 0x286   : > { %vm2187_vm11 = vweird.f32 %v7725_v49  ;;  %v2193_v58 = vsel %vm2191_vm8, %v6909_v25, %v2192_v32  ;;  %v2359_v5 = vadd.s32 %v6797_v11, %v6785_v18  ;;  %v2380_v15 = vadd.s32 127, %v2379_v33  ;;  %v7808_v32 = vld [vmem:[#allocation84_spill] sm:$0xff] }
 0x287   : > { %v2407_v30 = vand.u32 2147483647, %v7806_v36  ;;  %v2282_v40 = vmul.f32 %v2281_v47, %v2279_v23  ;;  %v1557_v13 = vsub.s32 4, %v7807_v52  ;;  %vm1632_vm7 = vc.u32 %v6970_v45, %v6973_v43  ;;  %v7810_v47 = vld [vmem:[#allocation43_spill] sm:$0xff] }
 0x288   : > { %v1633_v55 = vadd.s32 1, %v6974_v17  ;;  %4159 = vcosq.f32 %v1559_v28  ;;  %v2377_v63 = vshrl.u32 %v2359_v5, %v2375_v59  ;;  %v2381_v62 = vshll.u32 %v2380_v15, 23 }
 0x289   : > { %v1630_v1 = vmul.u32 %v1623_v0, %v1614_v44  ;;  %4161 = vsinq.f32 %v1559_v28  ;;  %v2425_v18 = vshrl.u32 %v7667_v57, %v7808_v32  ;;  %v2428_v11 = vshrl.u32 %v7670_v35, %v7808_v32 }
 0x28a   : > { %v1634_v25 = vsel %vm1632_vm7, %v1633_v55, %v6974_v17  ;;  %v2376_v60 = vshll.u32 %v6901_v26, %v2374_v53  ;;  %v2382_v29 = vor.u32 4788187, %v2381_v62  ;;  %v2414_v19 = vand.u32 8388607, %v2407_v30  ;;  %v7812_v62 = vld [vmem:[#allocation22_spill] sm:$0xff] }
 0x28b   : > { %v1635_v54 = vadd.s32 %v1634_v25, %v1630_v1  ;;  %v2424_v21 = vshll.u32 %v7586_v37, %v7809_v38  ;;  %v2427_v0 = vshll.u32 %v7667_v57, %v7809_v38  ;;  %v2430_v23 = vshll.u32 %v7670_v35, %v7809_v38  ;;  %v7813_v25 = vld [vmem:[#allocation13_spill] sm:$0xff] }
 0x28c   : > { %v2431_v17 = vshrl.u32 %v7727_v41, %v7808_v32  ;;  %v2197_v26 = vsel %vm2190_vm6, %v2193_v58, %v2196_v9  ;;  %v1558_v53 = vsel %vm1473_vm9, %v1557_v13, %v7807_v52  ;;  %v2378_v59 = vor.u32 %v2377_v63, %v2376_v60  ;;  %v7811_v9 = vld [vmem:[#allocation14_spill] sm:$0xff] }
 0x28d   : > { %v1636_v33 = vadd.s32 536870912, %v1635_v54  ;;  %vm2201_vm15 = vcmp.lt.s32.totalorder %v7810_v47, 0  ;;  %v2426_v28 = vor.u32 %v2425_v18, %v2424_v21  ;;  %v2429_v44 = vor.u32 %v2428_v11, %v2427_v0  ;;  %v7814_v18 = vld [vmem:[#allocation82_spill] sm:$0xff]  ;;  %v7815_v11 = vld [vmem:[#allocation57_spill] sm:$0xff] }
 0x28e   : > { %v2432_v57 = vor.u32 %v2431_v17, %v2430_v23  ;;  %v7018_v5 = vand.u32 3, %v6920_v12  ;;  %v2283_v35 = vxor.u32 2147483648, %v2282_v40  ;;  %v2383_v15 = vand.u32 2147483647, %v2382_v29 }
 0x28f   : > { %v7020_v41 = vshrl.u32 %v1636_v33, 30  ;;  %v2198_v27 = vsel %vm2187_vm11, nan, %v2197_v26  ;;  %v2285_v58 = vsub.s32 4, %v7811_v9  ;;  %v1560_v52 = vsel %vm6930_vm2, 0, %v1558_v53 }
 0x290   : > { %v2415_v13 = vor.u32 8388608, %v2414_v19  ;;  %v2385_v55 = vcvt.s32.f32 %v2378_v59  ;;  %vm2439_vm4 = vcmp.lt.s32.totalorder %v7812_v62, 1  ;;  %vm2441_vm9 = vcmp.lt.s32.totalorder %v7812_v62, 3 }
 0x291   : > { %v1638_v63 = vshll.u32 %v7020_v41, 30  ;;  %v4156_v12 = vpop.eup %4155  ;;  %v2447_v1 = vsel %vm2439_vm4, %v2426_v28, %v2429_v44  ;;  %v2449_v49 = vsel %vm2441_vm9, %v2432_v57, %v7813_v25  ;;  %v2451_v51 = vsel %vm2439_vm4, %v2429_v44, %v2432_v57 }
 0x292   : > { %v2453_v60 = vsel %vm2441_vm9, %v7815_v11, %v7814_v18  ;;  %v4158_v29 = vpop.eup %4157  ;;  %v2523_v19 = vmul.f32 0.1, %v2198_v27  ;;  %v2284_v38 = vsel %vm2201_vm15, %v2283_v35, %v2282_v40  ;;  %v2386_v21 = vmul.f32 %v2385_v55, %v2383_v15 }
 0x293   : > { %v7043_v0 = vsub.s32 %v1635_v54, %v1638_v63  ;;  %vm1463_vm10 = vcmp.eq.s32.totalorder %v7018_v5, 0  ;;  %vm1466_vm2 = vcmp.eq.s32.totalorder %v7018_v5, 2  ;;  %v7816_v23 = vand.u32 2147483647, %v7810_v47  ;;  %v7819_v63 = vld [vmem:[#allocation21_spill] sm:$0xff] }
 0x294   : > { %vm2440_vm12 = vcmp.lt.s32.totalorder %v7812_v62, 2  ;;  %v1564_v26 = vadd.s32 3, %v1560_v52  ;;  %v1464_v33 = vxor.u32 2147483648, %v4158_v29  ;;  %v1467_v35 = vxor.u32 2147483648, %v4156_v12 }
 0x295   : > { %vm7049_vm14 = vcmp.le.f32.partialorder %v7816_v23, 0.7853982  ;;  %v1641_v53 = vsub.s32 0, %v7043_v0  ;;  %v2450_v40 = vsel %vm2440_vm12, %v2447_v1, %v2449_v49  ;;  %v2454_v54 = vsel %vm2440_vm12, %v2451_v51, %v2453_v60  ;;  %v4160_v59 = vpop.eup %4159 }
 0x296   : > { %v2287_v15 = vsel %vm7049_vm14, %v7810_v47, %v2284_v38  ;;  %v2455_v27 = vshll.u32 %v2415_v13, 8  ;;  %v4162_v55 = vpop.eup %4161  ;;  %v2849_v25 = vmul.f32 %v7819_v63, %v2523_v19  ;;  %v7066_v52 = vsel %vm2201_vm15, %v2285_v58, %v7811_v9  ;;  %v7076_v38 = vpop.permute.xlu1 %2794  ;;  %v7821_v63 = vld [vmem:[#allocation53_spill] sm:$0xff] }
 0x297   : > { %v2387_v1 = vxor.u32 2147483648, %v2386_v21  ;;  %v3945_v49 = vmin.u32 %v1641_v53, %v7043_v0  ;;  %4163 = vcosq.f32 %v2287_v15  ;;  %v1565_v13 = vand.u32 3, %v1564_v26 }
 0x298   : > { %v7069_v51 = vmul.u32.u64.low %v2455_v27, %v2454_v54  ;;  %v7070_v18 = vmul.u32.u64.high %v2455_v27, %v2454_v54, %v7069_v51  ;;  %v7072_v11 = vmul.u32.u64.low %v2455_v27, %v2450_v40  ;;  %v7073_v60 = vmul.u32.u64.high %v2455_v27, %v2450_v40, %v7072_v11 }
 0x299   : > { %v1643_v19 = vclz %v3945_v49  ;;  %vm7820_vm8 = vcmp.lt.s32.totalorder %v7812_v62, 4  ;;  %v1465_v9 = vsel %vm1463_vm10, %v4156_v12, %v1464_v33  ;;  %v1468_v58 = vsel %vm1466_vm2, %v1467_v35, %v4158_v29  ;;  %v7822_v33 = vld [vmem:[#allocation28_spill] sm:$0xff] }
 0x29a   : > { %v2444_v23 = vsel %vm7820_vm8, %v2432_v57, 2102212464  ;;  %v1571_v53 = vxor.u32 2147483648, %v4160_v59  ;;  %v2423_v40 = vshrl.u32 %v7586_v37, %v7808_v32  ;;  %vm1459_vm3 = vweird.f32 %v7789_v10 }
 0x29b   : > { %4165 = vsinq.f32 %v2287_v15  ;;  %v1568_v54 = vxor.u32 2147483648, %v4162_v55  ;;  %vm2305_vm0 = vcmp.lt.s32.totalorder %v7821_v63, 0  ;;  %vm1462_vm1 = vcmp.lt.s32.totalorder %v7018_v5, 2 }
 0x29c   : > { %v2388_v57 = vsel %vm2305_vm0, %v2387_v1, %v2386_v21  ;;  %v2443_v12 = vsel %vm2439_vm4, %v2423_v40, %v2426_v28  ;;  %v2445_v29 = vsel %vm2441_vm9, %v2429_v44, %v2444_v23  ;;  %v1469_v26 = vsel %vm1462_vm1, %v1465_v9, %v1468_v58  ;;  %v2971_v28 = vpop.permute.xlu1 %2970 }
 0x29d   : > { %v2288_v37 = vsel %vm7049_vm14, 0, %v7066_v52  ;;  %vm1570_vm6 = vcmp.eq.s32.totalorder %v1565_v13, 2  ;;  %v3946_v32 = vadd.s32 4294967294, %v1643_v19  ;;  %v7099_v35 = vadd.f32 %v7822_v33, %v2849_v25  ;;  %v2866_v33 = vld [vmem:[%s4397_s14 + $0x68] sm:$0xff] }
 0x29e   : > { %vm1567_vm11 = vcmp.eq.s32.totalorder %v1565_v13, 0  ;;  %v1572_v5 = vsel %vm1570_vm6, %v1571_v53, %v4162_v55  ;;  %v7823_v21 = vand.u32 2147483647, %v7821_v63  ;;  %v2446_v52 = vsel %vm2440_vm12, %v2443_v12, %v2445_v29  ;;  %v7114_v55 = vpop.permute.xlu0 %2826 }
 0x29f   : > { %v1569_v44 = vsel %vm1567_vm11, %v4160_v59, %v1568_v54  ;;  %vm3947_vm15 = vcmp.lt.s32.totalorder %v3946_v32, 0  ;;  %v1470_v25 = vsel %vm1459_vm3, nan, %v1469_v26  ;;  %vm2464_vm4 = vc.u32 %v7070_v18, %v7072_v11  ;;  %v2858_v54 = vld [vmem:[%s4397_s14 + $0x28] sm:$0xff] }
 0x2a0   : > { %vm7103_vm7 = vcmp.le.f32.partialorder %v7823_v21, 0.7853982  ;;  %v1646_v1 = vsel %vm3947_vm15, 0, %v3946_v32  ;;  %v2465_v59 = vadd.s32 1, %v7073_v60  ;;  %vm1566_vm9 = vcmp.lt.s32.totalorder %v1565_v13, 2 }
 0x2a1   : > { %v2391_v17 = vsel %vm7103_vm7, %v7821_v63, %v2388_v57  ;;  %v1631_v49 = vadd.s32 %v6973_v43, %v6970_v45  ;;  %v1647_v51 = vsub.s32 32, %v1646_v1  ;;  %v1651_v19 = vsub.s32 4294967266, %v1646_v1  ;;  %v2799_v57 = vpop.permute.xlu1 %2798 }
 0x2a2   : > { %v1573_v62 = vsel %vm1566_vm9, %v1569_v44, %v1572_v5  ;;  %4167 = vcosq.f32 %v2391_v17  ;;  %v2462_v23 = vmul.u32 %v2455_v27, %v2446_v52  ;;  %v2466_v10 = vsel %vm2464_vm4, %v2465_v59, %v7073_v60 }
 0x2a3   : > { %4169 = vsinq.f32 %v2391_v17  ;;  %v1648_v9 = vshll.u32 %v7043_v0, %v1646_v1  ;;  %v1649_v58 = vshrl.u32 %v1631_v49, %v1647_v51  ;;  %v1652_v53 = vadd.s32 127, %v1651_v19 }
 0x2a4   : > { %v2516_v40 = vmul.f32 0.1, %v1470_v25  ;;  %vm1563_vm10 = vweird.f32 %v7797_v6  ;;  %v2389_v13 = vsub.s32 4, %v6872_v31  ;;  %v2467_v45 = vadd.s32 %v2466_v10, %v2462_v23  ;;  %v4164_v29 = vpop.eup %4163  ;;  %v3003_v6 = vpop.permute.xlu0 %3002 }
 0x2a5   : > { %v3077_v43 = vmul.f32 %v5864_v2, %v7099_v35  ;;  %v1574_v27 = vsel %vm1563_vm10, nan, %v1573_v62  ;;  %v1650_v12 = vor.u32 %v1649_v58, %v1648_v9  ;;  %v1653_v60 = vshll.u32 %v1652_v53, 23  ;;  %v2859_v62 = vld [vmem:[%s4397_s14 + $0x30] sm:$0xff]  ;;  %v2975_v23 = vpop.permute.xlu1 %2974 }
 0x2a6   : > { %v3436_v0 = vrot.slane %v6876_v14, 5  ;;  %v7131_v26 = vmul.f32 %v6019_v8, %v6809_v56  ;;  %v2292_v32 = vadd.s32 3, %v2288_v37  ;;  %v2468_v5 = vadd.s32 536870912, %v2467_v45 }
 0x2a7   : > { %v7137_v21 = vadd.f32 %v3354_v48, %v6911_v20  ;;  %4171 = vtanh.f32 %v6914_v3  ;;  %v3018_v44 = vmul.f32 %v2971_v28, %v2858_v54  ;;  %v1654_v17 = vor.u32 4788187, %v1653_v60 }
 0x2a8   : > { %v4166_v52 = vpop.eup %4165  ;;  %v2842_v25 = vmul.f32 %v7076_v38, %v2516_v40  ;;  %v2517_v1 = vmul.f32 0.1, %v1574_v27  ;;  %v2390_v56 = vsel %vm2305_vm0, %v2389_v13, %v6872_v31  ;;  %v7144_v37 = vshrl.u32 %v2468_v5, 30 }
 0x2a9   : > { %v3109_v59 = vrot.slane %v3077_v43, 1  ;;  %v7146_v49 = vmul.f32 %v3003_v6, %v2866_v33  ;;  %v1655_v61 = vand.u32 2147483647, %v1654_v17  ;;  %v1657_v48 = vcvt.s32.f32 %v1650_v12 }
 0x2aa   : > { %v3059_v20 = vmul.f32 %v5918_v46, %v7099_v35  ;;  %v3159_v3 = vmul.f32 %v5929_v16, %v7099_v35  ;;  %v2293_v28 = vand.u32 3, %v2292_v32  ;;  %v2470_v38 = vshll.u32 %v7144_v37, 30 }
 0x2ab   : > { %v2296_v51 = vxor.u32 2147483648, %v4166_v52  ;;  %v2299_v19 = vxor.u32 2147483648, %v4164_v29  ;;  %v2392_v31 = vsel %vm7103_vm7, 0, %v2390_v56  ;;  %v1658_v10 = vmul.f32 %v1657_v48, %v1655_v61 }
 0x2ac   : > { %v3241_v9 = vmul.f32 %v5934_v39, %v7099_v35  ;;  %v7158_v58 = vadd.f32 %v3018_v44, %v2842_v25  ;;  %v2843_v53 = vmul.f32 %v2799_v57, %v2517_v1  ;;  %v7160_v40 = vsub.s32 %v2467_v45, %v2470_v38 }
 0x2ad   : > { %v3141_v54 = vadd.f32 %v3109_v59, %v3059_v20  ;;  %v7164_v13 = vmul.f32 %v5938_v22, %v7099_v35  ;;  %v7168_v15 = vmul.f32 %v5961_v4, %v7099_v35  ;;  %vm2291_vm2 = vweird.f32 %v7810_v47 }
 0x2ae   : > { %v1659_v43 = vxor.u32 2147483648, %v1658_v10  ;;  %vm2295_vm14 = vcmp.eq.s32.totalorder %v2293_v28, 0  ;;  %vm2298_vm12 = vcmp.eq.s32.totalorder %v2293_v28, 2  ;;  %v2396_v27 = vadd.s32 3, %v2392_v31 }
 0x2af   : > { %v3019_v12 = vmul.f32 %v2975_v23, %v2859_v62  ;;  %v4168_v60 = vpop.eup %4167  ;;  %v3191_v57 = vrot.slane %v3159_v3, 2  ;;  %v2297_v45 = vsel %vm2295_vm14, %v4164_v29, %v2296_v51  ;;  %v2300_v32 = vsel %vm2298_vm12, %v2299_v19, %v4166_v52 }
 0x2b0   : > { %v2473_v33 = vsub.s32 0, %v7160_v40  ;;  %v4170_v6 = vpop.eup %4169  ;;  %v3070_v5 = vmul.f32 %v5864_v2, %v7158_v58  ;;  %vm1577_vm8 = vcmp.lt.s32.totalorder %v7793_v24, 0  ;;  %v1661_v17 = vsub.s32 4, %v7020_v41 }
 0x2b1   : > { %v7174_v44 = vadd.f32 %v3019_v12, %v2843_v53  ;;  %v3223_v25 = vadd.f32 %v3191_v57, %v3141_v54  ;;  %v3273_v1 = vrot.slane %v3241_v9, 3  ;;  %vm2294_vm3 = vcmp.lt.s32.totalorder %v2293_v28, 2 }
 0x2b2   : > { %v1660_v56 = vsel %vm1577_vm8, %v1659_v43, %v1658_v10  ;;  %v3355_v29 = vrot.slane %v7164_v13, 4  ;;  %v2301_v52 = vsel %vm2294_vm3, %v2297_v45, %v2300_v32  ;;  %v2397_v59 = vand.u32 3, %v2396_v27  ;;  %v2831_v13 = vpop.permute.xlu0 %2830 }
 0x2b3   : > { %v7826_v61 = vand.u32 2147483647, %v7793_v24  ;;  %v2400_v20 = vxor.u32 2147483648, %v4170_v6  ;;  %v2403_v3 = vxor.u32 2147483648, %v4168_v60  ;;  %v3977_v28 = vmin.u32 %v2473_v33, %v7160_v40 }
 0x2b4   : > { %v7191_v51 = vpop.eup %4171  ;;  %v3102_v19 = vrot.slane %v3070_v5, 1  ;;  %v3071_v31 = vmul.f32 %v5864_v2, %v7174_v44  ;;  %v1662_v62 = vsel %vm1577_vm8, %v1661_v17, %v7020_v41  ;;  %v3305_v23 = vadd.f32 %v3273_v1, %v3223_v25 }
 0x2b5   : > { %vm7183_vm0 = vcmp.le.f32.partialorder %v7826_v61, 0.7853982  ;;  %v3152_v10 = vmul.f32 %v5929_v16, %v7158_v58  ;;  %v2475_v9 = vclz %v3977_v28  ;;  %v2302_v53 = vsel %vm2291_vm2, nan, %v2301_v52 }
 0x2b6   : > { %v1663_v38 = vsel %vm7183_vm0, %v7793_v24, %v1660_v56  ;;  %v3052_v54 = vmul.f32 %v5918_v46, %v7158_v58  ;;  %vm2399_vm1 = vcmp.eq.s32.totalorder %v2397_v59, 0  ;;  %vm2402_vm6 = vcmp.eq.s32.totalorder %v2397_v59, 2  ;;  %v3007_v28 = vpop.permute.xlu0 %3006 }
 0x2b7   : > { %4173 = vcosq.f32 %v1663_v38  ;;  %v2401_v43 = vsel %vm2399_vm1, %v4168_v60, %v2400_v20  ;;  %v2404_v27 = vsel %vm2402_vm6, %v2403_v3, %v4170_v6  ;;  %v1664_v41 = vsel %vm7183_vm0, 0, %v1662_v62 }
 0x2b8   : > { %4175 = vsinq.f32 %v1663_v38  ;;  %v3978_v12 = vadd.s32 4294967294, %v2475_v9  ;;  %v3134_v57 = vadd.f32 %v3102_v19, %v3052_v54  ;;  %v3234_v45 = vmul.f32 %v5934_v39, %v7158_v58  ;;  %v2867_v38 = vld [vmem:[%s4397_s14 + $0x70] sm:$0xff] }
 0x2b9   : > { %vm2395_vm11 = vweird.f32 %v7821_v63  ;;  %v3103_v47 = vrot.slane %v3071_v31, 1  ;;  %v2524_v32 = vmul.f32 0.1, %v2302_v53  ;;  %v3184_v33 = vrot.slane %v3152_v10, 2 }
 0x2ba   : > { %vm2398_vm7 = vcmp.lt.s32.totalorder %v2397_v59, 2  ;;  %vm3979_vm15 = vcmp.lt.s32.totalorder %v3978_v12, 0  ;;  %v3053_v60 = vmul.f32 %v5918_v46, %v7174_v44  ;;  %v1668_v6 = vadd.s32 3, %v1664_v41 }
 0x2bb   : > { %v2405_v5 = vsel %vm2398_vm7, %v2401_v43, %v2404_v27  ;;  %v2478_v17 = vsel %vm3979_vm15, 0, %v3978_v12  ;;  %v3153_v25 = vmul.f32 %v5929_v16, %v7174_v44  ;;  %v2463_v1 = vadd.s32 %v7072_v11, %v7070_v18 }
 0x2bc   : > { %v2479_v56 = vsub.s32 32, %v2478_v17  ;;  %v2483_v52 = vsub.s32 4294967266, %v2478_v17  ;;  %v3216_v61 = vadd.f32 %v3184_v33, %v3134_v57  ;;  %v3316_v48 = vmul.f32 %v5938_v22, %v7158_v58  ;;  %v2803_v33 = vpop.permute.xlu1 %2802 }
 0x2bd   : > { %v3398_v59 = vmul.f32 %v5961_v4, %v7158_v58  ;;  %v3135_v20 = vadd.f32 %v3103_v47, %v3053_v60  ;;  %v2406_v3 = vsel %vm2395_vm11, nan, %v2405_v5  ;;  %v2480_v19 = vshll.u32 %v7160_v40, %v2478_v17 }
 0x2be   : > { %v2481_v31 = vshrl.u32 %v2463_v1, %v2479_v56  ;;  %v2484_v62 = vadd.s32 127, %v2483_v52  ;;  %v7223_v18 = vadd.f32 %v3355_v29, %v3305_v23  ;;  %v2850_v11 = vmul.f32 %v7114_v55, %v2524_v32 }
 0x2bf   : > { %v3266_v10 = vrot.slane %v3234_v45, 3  ;;  %v1669_v9 = vand.u32 3, %v1668_v6  ;;  %v3185_v53 = vrot.slane %v3153_v25, 2  ;;  %v3235_v54 = vmul.f32 %v5934_v39, %v7174_v44 }
 0x2c0   : > { %v2482_v43 = vor.u32 %v2481_v31, %v2480_v19  ;;  %v2485_v27 = vshll.u32 %v2484_v62, 23  ;;  %v3480_v41 = vmul.f32 %v6016_v42, %v7158_v58  ;;  %v2525_v12 = vmul.f32 0.1, %v2406_v3  ;;  %v2860_v62 = vld [vmem:[%s4397_s14 + $0x38] sm:$0xff] }
 0x2c1   : > { %v3298_v63 = vadd.f32 %v3266_v10, %v3216_v61  ;;  %v3027_v40 = vmul.f32 %v3007_v28, %v2867_v38  ;;  %v3348_v47 = vrot.slane %v3316_v48, 4  ;;  %v3430_v29 = vrot.slane %v3398_v59, 5 }
 0x2c2   : > { %v3217_v23 = vadd.f32 %v3185_v53, %v3135_v20  ;;  %v2486_v55 = vor.u32 4788187, %v2485_v27  ;;  %v7231_v32 = vadd.f32 %v7146_v49, %v2850_v11  ;;  %v3317_v5 = vmul.f32 %v5938_v22, %v7174_v44  ;;  %v2979_v11 = vpop.permute.xlu1 %2978 }
 0x2c3   : > { %vm1674_vm4 = vcmp.eq.s32.totalorder %v1669_v9, 2  ;;  %v3267_v6 = vrot.slane %v3235_v54, 3  ;;  %v2489_v1 = vcvt.s32.f32 %v2482_v43  ;;  %v3380_v56 = vadd.f32 %v3348_v47, %v3298_v63 }
 0x2c4   : > { %v4174_v57 = vpop.eup %4173  ;;  %v2487_v25 = vand.u32 2147483647, %v2486_v55  ;;  %v2851_v52 = vmul.f32 %v2831_v13, %v2525_v12  ;;  %vm1671_vm9 = vcmp.eq.s32.totalorder %v1669_v9, 0  ;;  %vm1670_vm10 = vcmp.lt.s32.totalorder %v1669_v9, 2 }
 0x2c5   : > { %v4176_v45 = vpop.eup %4175  ;;  %v1675_v60 = vxor.u32 2147483648, %v4174_v57  ;;  %v3299_v48 = vadd.f32 %v3267_v6, %v3217_v23  ;;  %v3078_v49 = vmul.f32 %v5864_v2, %v7231_v32  ;;  %v3399_v3 = vmul.f32 %v5961_v4, %v7174_v44 }
 0x2c6   : > { %v1672_v17 = vxor.u32 2147483648, %v4176_v45  ;;  %v2490_v20 = vmul.f32 %v2489_v1, %v2487_v25  ;;  %vm1667_vm2 = vweird.f32 %v7793_v24  ;;  %v3349_v28 = vrot.slane %v3317_v5, 4 }
 0x2c7   : > { %v1676_v61 = vsel %vm1674_vm4, %v1675_v60, %v4176_v45  ;;  %v2493_v13 = vsub.s32 4, %v7144_v37  ;;  %v3562_v10 = vmul.f32 %v6019_v8, %v7158_v58  ;;  %v7244_v9 = vadd.f32 %v3027_v40, %v2851_v52 }
 0x2c8   : > { %v1673_v59 = vsel %vm1671_vm9, %v4174_v57, %v1672_v17  ;;  %v2491_v31 = vxor.u32 2147483648, %v2490_v20  ;;  %vm2409_vm14 = vcmp.lt.s32.totalorder %v7806_v36, 0  ;;  %v3462_v54 = vadd.f32 %v3430_v29, %v3380_v56 }
 0x2c9   : > { %v1677_v38 = vsel %vm1670_vm10, %v1673_v59, %v1676_v61  ;;  %v3381_v43 = vadd.f32 %v3349_v28, %v3299_v48  ;;  %vm7249_vm12 = vcmp.le.f32.partialorder %v2407_v30, 0.7853982  ;;  %v3110_v63 = vrot.slane %v3078_v49, 1 }
 0x2ca   : > { %v1678_v19 = vsel %vm1667_vm2, nan, %v1677_v38  ;;  %v2492_v27 = vsel %vm2409_vm14, %v2491_v31, %v2490_v20  ;;  %v3020_v40 = vmul.f32 %v2979_v11, %v2860_v62  ;;  %v3431_v57 = vrot.slane %v3399_v3, 5 }
 0x2cb   : > { %v2518_v53 = vmul.f32 0.1, %v1678_v19  ;;  %v2495_v58 = vsel %vm7249_vm12, %v7806_v36, %v2492_v27  ;;  %v3481_v47 = vmul.f32 %v6016_v42, %v7174_v44  ;;  %v2494_v29 = vsel %vm2409_vm14, %v2493_v13, %v7144_v37 }
 0x2cc   : > { %4177 = vcosq.f32 %v2495_v58  ;;  %v3512_v23 = vrot.slane %v3480_v41, 6  ;;  %v3079_v30 = vmul.f32 %v5864_v2, %v7244_v9  ;;  %v3594_v45 = vrot.slane %v3562_v10, 7 }
 0x2cd   : > { %v2844_v12 = vmul.f32 %v2803_v33, %v2518_v53  ;;  %4179 = vsinq.f32 %v2495_v58  ;;  %v3060_v33 = vmul.f32 %v5918_v46, %v7231_v32  ;;  %v3160_v5 = vmul.f32 %v5929_v16, %v7231_v32 }
 0x2ce   : > { %v3463_v60 = vadd.f32 %v3431_v57, %v3381_v43  ;;  %v3544_v6 = vadd.f32 %v3512_v23, %v3462_v54  ;;  %v2496_v17 = vsel %vm7249_vm12, 0, %v2494_v29  ;;  %v3242_v1 = vmul.f32 %v5934_v39, %v7231_v32 }
 0x2cf   : > { %v3036_v55 = vadd.f32 %v3020_v40, %v2844_v12  ;;  %v3142_v25 = vadd.f32 %v3110_v63, %v3060_v33  ;;  %v3513_v56 = vrot.slane %v3481_v47, 6  ;;  %v3563_v52 = vmul.f32 %v6019_v8, %v7174_v44 }
 0x2d0   : > { %v3111_v61 = vrot.slane %v3079_v30, 1  ;;  %v3192_v49 = vrot.slane %v3160_v5, 2  ;;  %v3161_v38 = vmul.f32 %v5929_v16, %v7244_v9  ;;  %v2500_v28 = vadd.s32 3, %v2496_v17  ;;  %v2835_v17 = vpop.permute.xlu0 %2834 }
 0x2d1   : > { %v3072_v37 = vmul.f32 %v5864_v2, %v3036_v55  ;;  %v3154_v41 = vmul.f32 %v5929_v16, %v3036_v55  ;;  %v3054_v48 = vmul.f32 %v5918_v46, %v3036_v55  ;;  %v3236_v20 = vmul.f32 %v5934_v39, %v3036_v55 }
 0x2d2   : > { %v3545_v3 = vadd.f32 %v3513_v56, %v3463_v60  ;;  %v3061_v19 = vmul.f32 %v5918_v46, %v7244_v9  ;;  %v3318_v62 = vmul.f32 %v5938_v22, %v3036_v55  ;;  %v3626_v44 = vadd.f32 %v3594_v45, %v3544_v6 }
 0x2d3   : > { %v3104_v59 = vrot.slane %v3072_v37, 1  ;;  %v3186_v13 = vrot.slane %v3154_v41, 2  ;;  %v3224_v11 = vadd.f32 %v3192_v49, %v3142_v25  ;;  %v3324_v10 = vmul.f32 %v5938_v22, %v7231_v32 }
 0x2d4   : > { %v3595_v53 = vrot.slane %v3563_v52, 7  ;;  %v3143_v54 = vadd.f32 %v3111_v61, %v3061_v19  ;;  %v3268_v24 = vrot.slane %v3236_v20, 3  ;;  %v3400_v27 = vmul.f32 %v5961_v4, %v3036_v55 }
 0x2d5   : > { %v3136_v31 = vadd.f32 %v3104_v59, %v3054_v48  ;;  %v3274_v63 = vrot.slane %v3242_v1, 3  ;;  %v3193_v58 = vrot.slane %v3161_v38, 2  ;;  %v3243_v40 = vmul.f32 %v5934_v39, %v7244_v9 }
 0x2d6   : > { %v3627_v12 = vadd.f32 %v3595_v53, %v3545_v3  ;;  %v2501_v57 = vand.u32 3, %v2500_v28  ;;  %v3350_v29 = vrot.slane %v3318_v62, 4  ;;  %v3482_v23 = vmul.f32 %v6016_v42, %v3036_v55  ;;  %v2868_v53 = vld [vmem:[%s4397_s14 + $0x78] sm:$0xff] }
 0x2d7   : > { %v3218_v43 = vadd.f32 %v3186_v13, %v3136_v31  ;;  %v3644_v30 = vadd.f32 %v6107_v7, %v3626_v44  ;;  %v3306_v45 = vadd.f32 %v3274_v63, %v3224_v11  ;;  %v3356_v33 = vrot.slane %v3324_v10, 4 }
 0x2d8   : > { %v3406_v5 = vmul.f32 %v5961_v4, %v7231_v32  ;;  %v3225_v6 = vadd.f32 %v3193_v58, %v3143_v54  ;;  %v3432_v41 = vrot.slane %v3400_v27, 5  ;;  %v3564_v25 = vmul.f32 %v6019_v8, %v3036_v55  ;;  %v3011_v54 = vpop.permute.xlu0 %3010 }
 0x2d9   : > { %v3300_v47 = vadd.f32 %v3268_v24, %v3218_v43  ;;  %v4178_v60 = vpop.eup %4177  ;;  %v3645_v56 = vadd.f32 %v6107_v7, %v3627_v12  ;;  %v3275_v52 = vrot.slane %v3243_v40, 3  ;;  %v3325_v61 = vmul.f32 %v5938_v22, %v7244_v9 }
 0x2da   : > { %v4180_v1 = vpop.eup %4179  ;;  %v2507_v48 = vxor.u32 2147483648, %v4178_v60  ;;  %vm2506_vm8 = vcmp.eq.s32.totalorder %v2501_v57, 2  ;;  %v3514_v49 = vrot.slane %v3482_v23, 6  ;;  %4181 = vtanh.f32 %v3644_v30  ;;  %v7831_v23 = vld [vmem:[#allocation29_spill] sm:$0xff] }
 0x2db   : > { %v3382_v37 = vadd.f32 %v3350_v29, %v3300_v47  ;;  %v2504_v59 = vxor.u32 2147483648, %v4180_v1  ;;  %vm2502_vm3 = vcmp.lt.s32.totalorder %v2501_v57, 2  ;;  %vm2503_vm0 = vcmp.eq.s32.totalorder %v2501_v57, 0 }
 0x2dc   : > { %v2508_v3 = vsel %vm2506_vm8, %v2507_v48, %v4180_v1  ;;  %v3307_v38 = vadd.f32 %v3275_v52, %v3225_v6  ;;  %v3596_v19 = vrot.slane %v3564_v25, 7  ;;  %v3388_v31 = vadd.f32 %v3356_v33, %v3306_v45 }
 0x2dd   : > { %v3464_v20 = vadd.f32 %v3432_v41, %v3382_v37  ;;  %v2505_v28 = vsel %vm2503_vm0, %v4178_v60, %v2504_v59  ;;  %4183 = vtanh.f32 %v3645_v56  ;;  %vm2499_vm1 = vweird.f32 %v7806_v36  ;;  %v7833_v37 = vld [vmem:[#allocation16_spill] sm:$0xff] }
 0x2de   : > { %v2509_v13 = vsel %vm2502_vm3, %v2505_v28, %v2508_v3  ;;  %vm3694_vm6 = vcmask 1043459   ;;  %v3357_v62 = vrot.slane %v3325_v61, 4  ;;  %v3407_v44 = vmul.f32 %v5961_v4, %v7244_v9  ;;  %v7834_v28 = vld [vmem:[#allocation27_spill] sm:$0xff] }
 0x2df   : > { %v3546_v55 = vadd.f32 %v3514_v49, %v3464_v20  ;;  %v2510_v11 = vsel %vm2499_vm1, nan, %v2509_v13  ;;  %v3468_v43 = vadd.f32 %v3436_v0, %v7137_v21  ;;  %v3437_v24 = vrot.slane %v7168_v15, 5 }
 0x2e0   : > { %v3487_v27 = vmul.f32 %v6016_v42, %v7099_v35  ;;  %v2526_v36 = vmul.f32 0.1, %v2510_v11  ;;  %v3438_v63 = vrot.slane %v3406_v5, 5  ;;  %v3488_v12 = vmul.f32 %v6016_v42, %v7231_v32 }
 0x2e1   : > { %v3628_v10 = vadd.f32 %v3596_v19, %v3546_v55  ;;  %v3389_v58 = vadd.f32 %v3357_v62, %v3307_v38  ;;  %v3518_v57 = vrot.slane %v6888_v34, 6  ;;  %v3469_v47 = vadd.f32 %v3437_v24, %v7223_v18 }
 0x2e2   : > { %v2852_v29 = vmul.f32 %v2835_v17, %v2526_v36  ;;  %v3028_v14 = vmul.f32 %v3011_v54, %v2868_v53  ;;  %v3470_v0 = vadd.f32 %v3438_v63, %v3388_v31  ;;  %v3439_v21 = vrot.slane %v3407_v44, 5 }
 0x2e3   : > { %v3646_v40 = vadd.f32 %v6107_v7, %v3628_v10  ;;  %v3489_v15 = vmul.f32 %v6016_v42, %v7244_v9  ;;  %v7832_v30 = vrot.slane %v7831_v23, 7  ;;  %v3550_v33 = vadd.f32 %v3518_v57, %v3468_v43 }
 0x2e4   : > { %vm3697_vm11 = vcmask 1044484   ;;  %v3569_v5 = vmul.f32 %v6019_v8, %v7099_v35  ;;  %v3044_v34 = vadd.f32 %v3028_v14, %v2852_v29  ;;  %v3519_v60 = vrot.slane %v3487_v27, 6 }
 0x2e5   : > { %4185 = vtanh.f32 %v3646_v40  ;;  %v3629_v45 = vadd.f32 %v7832_v30, %v6839_v50  ;;  %v3520_v18 = vrot.slane %v3488_v12, 6  ;;  %v3570_v6 = vmul.f32 %v6019_v8, %v7231_v32 }
 0x2e6   : > { %v3471_v17 = vadd.f32 %v3439_v21, %v3389_v58  ;;  %v3693_v41 = vrot.slane %v7833_v37, 5  ;;  %v3600_v25 = vrot.slane %v7131_v26, 7  ;;  %v3080_v1 = vmul.f32 %v5864_v2, %v3044_v34  ;;  %v7836_v37 = vld [vmem:[#allocation83_spill] sm:$0xff] }
 0x2e7   : > { %v3162_v50 = vmul.f32 %v5929_v16, %v3044_v34  ;;  %v3551_v56 = vadd.f32 %v3519_v60, %v3469_v47  ;;  %v3552_v52 = vadd.f32 %v3520_v18, %v3470_v0  ;;  %v3521_v61 = vrot.slane %v3489_v15, 6  ;;  %v4182_v49 = vpop.eup %4181 }
 0x2e8   : > { %v3571_v35 = vmul.f32 %v6019_v8, %v7244_v9  ;;  %v3647_v48 = vadd.f32 %v6107_v7, %v3629_v45  ;;  %v3062_v59 = vmul.f32 %v5918_v46, %v3044_v34  ;;  %v3112_v32 = vrot.slane %v3080_v1, 1 }
 0x2e9   : > { %v3244_v20 = vmul.f32 %v5934_v39, %v3044_v34  ;;  %v3632_v3 = vadd.f32 %v3600_v25, %v3550_v33  ;;  %v3601_v26 = vrot.slane %v3569_v5, 7  ;;  %v3602_v38 = vrot.slane %v3570_v6, 7  ;;  %v7835_v5 = vld [vmem:[#allocation71_spill] sm:$0xff] }
 0x2ea   : > { %v3553_v2 = vadd.f32 %v3521_v61, %v3471_v17  ;;  %v3695_v16 = vsel %vm3694_vm6, %v3693_v41, %v7834_v28  ;;  %v3144_v55 = vadd.f32 %v3112_v32, %v3062_v59  ;;  %v3194_v19 = vrot.slane %v3162_v50, 2  ;;  %v4184_v9 = vpop.eup %4183 }
 0x2eb   : > { %v3326_v31 = vmul.f32 %v5938_v22, %v3044_v34  ;;  %v3696_v13 = vrot.slane %v7191_v51, 4  ;;  %v3633_v62 = vadd.f32 %v3601_v26, %v3551_v56  ;;  %v3634_v46 = vadd.f32 %v3602_v38, %v3552_v52 }
 0x2ec   : > { %v3603_v44 = vrot.slane %v3571_v35, 7  ;;  %4187 = vtanh.f32 %v3647_v48  ;;  %v3226_v39 = vadd.f32 %v3194_v19, %v3144_v55  ;;  %v3276_v11 = vrot.slane %v3244_v20, 3 }
 0x2ed   : > { %v3408_v10 = vmul.f32 %v5961_v4, %v3044_v34  ;;  %v3650_v53 = vadd.f32 %v6107_v7, %v3632_v3  ;;  %vm3700_vm7 = vcmask 1045509   ;;  %v3699_v54 = vrot.slane %v4182_v49, 3 }
 0x2ee   : > { %v3635_v43 = vadd.f32 %v3603_v44, %v3553_v2  ;;  %v3702_v24 = vrot.slane %v4184_v9, 2  ;;  %v3308_v27 = vadd.f32 %v3276_v11, %v3226_v39  ;;  %v3358_v36 = vrot.slane %v3326_v31, 4 }
 0x2ef   : > { %v3490_v22 = vmul.f32 %v6016_v42, %v3044_v34  ;;  %v3698_v51 = vsel %vm3697_vm11, %v3696_v13, %v3695_v16  ;;  %v3651_v63 = vadd.f32 %v6107_v7, %v3633_v62  ;;  %v3652_v12 = vadd.f32 %v6107_v7, %v3634_v46 }
 0x2f0   : > { %vm3703_vm15 = vcmask 1046534   ;;  %vm3706_vm4 = vcmask 1047559   ;;  %v3390_v4 = vadd.f32 %v3358_v36, %v3308_v27  ;;  %v3440_v40 = vrot.slane %v3408_v10, 5 }
 0x2f1   : > { %v3572_v57 = vmul.f32 %v6019_v8, %v3044_v34  ;;  %v3701_v47 = vsel %vm3700_vm7, %v3699_v54, %v3698_v51  ;;  %v3653_v29 = vadd.f32 %v6107_v7, %v3635_v43  ;;  %vm3724_vm9 = vcmask 130048  }
 0x2f2   : > { %v4186_v58 = vpop.eup %4185  ;;  %4189 = vtanh.f32 %v3650_v53  ;;  %v3704_v14 = vsel %vm3703_vm15, %v3702_v24, %v3701_v47  ;;  %v3472_v0 = vadd.f32 %v3440_v40, %v3390_v4  ;;  %v3522_v21 = vrot.slane %v3490_v22, 6 }
 0x2f3   : > { %v3705_v42 = vrot.slane %v4186_v58, 1  ;;  %4191 = vtanh.f32 %v3651_v63  ;;  %v3604_v23 = vrot.slane %v3572_v57, 7  ;;  %v3708_v34 = vrot.slane %v7835_v5, 7 }
 0x2f4   : > { %4193 = vtanh.f32 %v3652_v12  ;;  %v3554_v8 = vadd.f32 %v3522_v21, %v3472_v0  ;;  %v3710_v41 = vrot.slane %v7836_v37, 6 }
 0x2f5   : > { %v3707_v15 = vsel %vm3706_vm4, %v3705_v42, %v3704_v14  ;;  %4195 = vtanh.f32 %v3653_v29 }
 0x2f6   : > { %3725 = vst.msk [vmem:[%s7342_s22] sm:$0xff] %vm3724_vm9, %v3707_v15  ;;  %v3636_v30 = vadd.f32 %v3604_v23, %v3554_v8 }
 0x2f8   : > { %v3654_v45 = vadd.f32 %v6107_v7, %v3636_v30 }
 0x2f9   : > { %v4188_v33 = vpop.eup %4187 }
 0x2fa   : > { %4197 = vtanh.f32 %v3654_v45  ;;  %v3709_v6 = vsel %vm3688_vm13, %v3708_v34, %v4188_v33 }
 0x2fb   : > { %v3711_v50 = vsel %vm3691_vm5, %v3710_v41, %v3709_v6 }
 0x2fd   : > { %v3766_v3 = vld [vmem:[%s7342_s22] sm:$0xff] (%p7837_p4) }
 0x2fe   : > { %3767 = vst [vmem:[%s3735_s25] sm:$0xff] (%p7837_p4), %v3766_v3 }
 0x2ff   : > { %v4190_v60 = vpop.eup %4189 }
 0x300   : > { %v4192_v18 = vpop.eup %4191  ;;  %v3712_v1 = vrot.slane %v4190_v60, 5 }
 0x301   : > { %v4194_v17 = vpop.eup %4193  ;;  %v3714_v56 = vrot.slane %v4192_v18, 4 }
 0x302   : > { %v4196_v25 = vpop.eup %4195  ;;  %v3716_v52 = vrot.slane %v4194_v17, 3  ;;  %v3713_v7 = vsel %vm3694_vm6, %v3712_v1, %v3711_v50 }
 0x303   : > { %v3718_v61 = vrot.slane %v4196_v25, 2  ;;  %v3715_v48 = vsel %vm3697_vm11, %v3714_v56, %v3713_v7 }
 0x304   : > { %v3717_v59 = vsel %vm3700_vm7, %v3716_v52, %v3715_v48 }
 0x305   : > { %v3719_v20 = vsel %vm3703_vm15, %v3718_v61, %v3717_v59 }
 0x307   : > { %v4198_v35 = vpop.eup %4197  ;;  %3733 = sbr.rel (!%p7837_p4) target bundleno = 788 (0x314), region = 204 }
 0x308   : > { %v3720_v32 = vrot.slane %v4198_v35, 1 }
 0x30a   : > { %v3721_v49 = vsel %vm3706_vm4, %v3720_v32, %v3719_v20 }
 0x30b   : > { %3726 = vst.msk [vmem:[%s7342_s22 + $0x8] sm:$0xff] %vm3724_vm9, %v3721_v49 }
 0x312   : > { %v3768_v26 = vld [vmem:[%s7342_s22 + $0x8] sm:$0xff] }
 0x313   : > { %3769 = vst [vmem:[%s3735_s25 + $0x20] sm:$0xff] %v3768_v26 }
 0x314 PF: > { %p15_p5 = scmp.ge.s32.totalorder %s4308_s26, 6   ;;  %s7838_s23 = smov %s4236_s24 }
 0x315   : > { %s7839_s24 = smov %s4318_s29  ;;  %s7840_s25 = smov %s4308_s26 }
 0x316   :  { %17 = sbr.rel (!%p15_p5) target bundleno = 4 (0x4), region = 298 }
 0x31b   :  { %3785 = vsyncpa [#allocation8], 1 }
 0x31c   :  { %3787 = vsyncpa [#allocation8 + $0x1], 1 }

</bundles_post_ra>
